<compile_context>
chip_gen: v6e
topology: v6e:2x2x1
jax: 0.10.0
libtpu: 0.0.40
codegen_flags: <defaults>
</compile_context>

<pallas_src>
import numpy as np
import jax
import jax.numpy as jnp
from jax import lax
from jax.experimental import pallas as pl
from jax.experimental.pallas import tpu as pltpu  # noqa: F401  (kept for TPU-specific extensions)

# ----------------------------- model sizes (small, deterministic) -------------
B = 2            # batch
S = 8            # seq_len
ENC = 32         # encoder hidden size
EXT = 16         # external word-vector size
SENT = 32        # sentence embedding size
HIN = ENC + EXT + SENT            # 80  -> BiLSTM input size
HH = 32          # lstm_hidden_size (per direction)
ENT = 4          # ent_type_size
DIM = 16         # inner_dim (even, for RoPE)
ED = ENT * DIM   # 64

_PREC = jax.lax.Precision.HIGHEST


# ====================== fused BiLSTM + GlobalPointer head kernel ==============
def egp_fused_kernel(xcat_ref, wih_ref, whh_ref, blstm_ref,
                     whead_ref, bhead_ref, rope_ref, bmask_ref,
                     padscale_ref, bias_ref, out_ref):
    # xcat_ref:   (S*B, 2*HIN)   time-major rows: [x[b,t,:], x[b,S-1-t,:]]
    # wih_ref:    (2*HIN, 8*HH)  fused-gate input projection (fwd/bwd blocks)
    # whh_ref:    (2*HH, 8*HH)   fused-gate recurrent projection (block structured)
    # blstm_ref:  (1, 8*HH)      b_ih + b_hh in fused gate layout
    # whead_ref:  (2*HH, 4*E*D)  [Wq | Wq_rot | Wk | Wk_rot]
    # bhead_ref:  (1, 4*E*D)
    # rope_ref:   (S, 4*E*D)     [cos | sin | cos | sin]
    # bmask_ref:  (E*S, E*D)     0/1 block-diagonal ent mask
    # padscale:   (B, S, 1)      attention_mask * 1/sqrt(D)   (key axis)
    # bias_ref:   (B, S, E*S)    (-(1-pad) - tril) * 1e12 / sqrt(D), tiled over ent
    # out_ref:    (B, S, E*S)    logits, col = e*S + n
    bsz, seq, es = out_ref.shape
    ent = es // seq
    hh = whh_ref.shape[0] // 2
    ed = rope_ref.shape[1] // 4

    # ---- hoisted LSTM input projection: one wide matmul, biases folded in ----
    g_all = (jnp.dot(xcat_ref[...], wih_ref[...],
                     preferred_element_type=jnp.float32, precision=_PREC)
             + blstm_ref[...])                                     # (S*B, 8*HH)
    whh = whh_ref[...]                                             # loop-invariant MXU RHS

    # fused state rows: [._f | ._b] per batch
    h = jnp.zeros((bsz, 2 * hh), jnp.float32)
    c = jnp.zeros((bsz, 2 * hh), jnp.float32)
    hs = []                                                        # per-step (B, 2*HH)

    # Fully unrolled recurrence; forward step t and backward step (S-1-t) share
    # one (B, 2*HH)@(2*HH, 8*HH) matmul and wide EUP ops.
    for t in range(seq):
        rec = jnp.dot(h, whh, preferred_element_type=jnp.float32, precision=_PREC)
        gates = rec + g_all[t * bsz:(t + 1) * bsz, :]              # (B, 8*HH)
        sig = jax.nn.sigmoid(gates[:, 0:6 * hh])                   # i,f,o both dirs (192 lanes)
        g_t = jnp.tanh(gates[:, 6 * hh:8 * hh])                    # g both dirs    (64 lanes)
        i_g = sig[:, 0:2 * hh]
        f_g = sig[:, 2 * hh:4 * hh]
        o_g = sig[:, 4 * hh:6 * hh]
        c = f_g * c + i_g * g_t
        h = o_g * jnp.tanh(c)
        hs.append(h)

    whead = whead_ref[...]
    bhead = bhead_ref[...]
    rope = rope_ref[...]
    bmask = bmask_ref[...]

    # ---- GlobalPointer head, per batch (B=2, unrolled; off the serial chain) --
    for b in range(bsz):
        # lstm output for batch b, rows = time: [h_f(t) | h_b(t)]
        rows = [jnp.concatenate([hs[t][b:b + 1, :hh],
                                 hs[seq - 1 - t][b:b + 1, hh:]], axis=1)
                for t in range(seq)]
        lstm_b = jnp.concatenate(rows, axis=0)                     # (S, 2*HH)

        # single 256-wide matmul, RoPE rotation folded into the weights
        proj = (jnp.dot(lstm_b, whead, preferred_element_type=jnp.float32,
                        precision=_PREC) + bhead)                  # (S, 4*E*D)
        t4 = proj * rope                                           # one full-width VPU mul
        q = t4[:, 0:ed] + t4[:, ed:2 * ed]                         # (S, E*D)
        k = (t4[:, 2 * ed:3 * ed] + t4[:, 3 * ed:4 * ed]) * padscale_ref[b]

        # block-diagonal pointer logits: (S, E*D) x (E*S, E*D)^T -> (S, E*S)
        kbd = jnp.concatenate([k] * ent, axis=0) * bmask           # (E*S, E*D)
        logits = lax.dot_general(q, kbd, (((1,), (1,)), ((), ())),
                                 preferred_element_type=jnp.float32,
                                 precision=_PREC)                  # (S, E*S)
        out_ref[b] = logits + bias_ref[b]


# ====================== one-time parameter preparation ========================
def prepare_egp_params(params, seq, ent_type_size, inner_dim):
    """Hoists all weight rearrangement / constant tables out of the per-call path."""
    hh = params["w_hh_f"].shape[1]
    h2 = 2 * hh
    ent, d = ent_type_size, inner_dim
    ed = ent * d

    # --- fused gate layout: [i_f|i_b|f_f|f_b|o_f|o_b|g_f|g_b], each hh wide ----
    def scatter_gates(w4, off):
        # w4: (rows, 4*hh) columns in PyTorch order [i, f, g, o]
        out = jnp.zeros((w4.shape[0], 8 * hh), jnp.float32)
        out = out.at[:, off + 0 * 2 * hh: off + 0 * 2 * hh + hh].set(w4[:, 0 * hh:1 * hh])  # i
        out = out.at[:, off + 1 * 2 * hh: off + 1 * 2 * hh + hh].set(w4[:, 1 * hh:2 * hh])  # f
        out = out.at[:, off + 3 * 2 * hh: off + 3 * 2 * hh + hh].set(w4[:, 2 * hh:3 * hh])  # g
        out = out.at[:, off + 2 * 2 * hh: off + 2 * 2 * hh + hh].set(w4[:, 3 * hh:4 * hh])  # o
        return out

    wih2 = jnp.concatenate([scatter_gates(params["w_ih_f"].T, 0),
                            scatter_gates(params["w_ih_b"].T, hh)], axis=0)   # (2*HIN, 8*HH)
    whh2 = jnp.concatenate([scatter_gates(params["w_hh_f"].T, 0),
                            scatter_gates(params["w_hh_b"].T, hh)], axis=0)   # (2*HH, 8*HH)
    b_lstm = (scatter_gates((params["b_ih_f"] + params["b_hh_f"])[None, :], 0)
              + scatter_gates((params["b_ih_b"] + params["b_hh_b"])[None, :], hh))  # (1, 8*HH)

    # --- head weights: split dense into q/k halves (columns ordered [ent, dim]) -
    w_t = params["w_dense"].T.reshape(h2, ent, 2, d)
    wq = w_t[:, :, 0, :].reshape(h2, ed)
    wk = w_t[:, :, 1, :].reshape(h2, ed)
    b_r = params["b_dense"].reshape(ent, 2, d)
    bq = b_r[:, 0, :].reshape(1, ed)
    bk = b_r[:, 1, :].reshape(1, ed)

    # exact RoPE pair rotation folded into the weights: y[2j]=-x[2j+1], y[2j+1]=x[2j]
    def rot_half(w):
        v = w.reshape(w.shape[0], ent, d)
        v2 = jnp.stack([-v[..., 1::2], v[..., 0::2]], axis=-1).reshape(v.shape)
        return v2.reshape(w.shape)

    w_head = jnp.concatenate([wq, rot_half(wq), wk, rot_half(wk)], axis=1)     # (2*HH, 4*E*D)
    b_head = jnp.concatenate([bq, rot_half(bq), bk, rot_half(bk)], axis=1)     # (1, 4*E*D)

    # --- merged sinusoidal RoPE table [cos|sin|cos|sin] ------------------------
    pos = jnp.arange(seq, dtype=jnp.float32)[:, None]
    idx = jnp.arange(d // 2, dtype=jnp.float32)
    theta = jnp.power(10000.0, -2.0 * idx / d)
    emb = pos * theta                                                           # (S, D/2)
    pos_emb = jnp.stack([jnp.sin(emb), jnp.cos(emb)], axis=-1).reshape(seq, d)
    cos_full = jnp.repeat(pos_emb[:, 1::2], 2, axis=-1)                         # (S, D)
    sin_full = jnp.repeat(pos_emb[:, 0::2], 2, axis=-1)
    cos_tile = jnp.tile(cos_full, (1, ent))                                     # (S, E*D)
    sin_tile = jnp.tile(sin_full, (1, ent))
    rope = jnp.concatenate([cos_tile, sin_tile, cos_tile, sin_tile], axis=1)    # (S, 4*E*D)

    # --- block-diagonal ent-type mask for the pointer logits matmul ------------
    blockmask = jnp.asarray(np.kron(np.eye(ent, dtype=np.float32),
                                    np.ones((seq, d), np.float32)))             # (E*S, E*D)

    return {"wih2": wih2, "whh2": whh2, "b_lstm": b_lstm,
            "w_head": w_head, "b_head": b_head,
            "rope": rope, "blockmask": blockmask}


# =============================== wrapper ======================================
def egp_pallas(x, attention_mask, prep):
    bsz, seq, hin = x.shape
    es, edim = prep["blockmask"].shape
    ent = es // seq
    d = edim // ent
    scale = 1.0 / float(d) ** 0.5

    # time-major fused LSTM input: row (t*B + b) = [x[b, t, :], x[b, S-1-t, :]]
    xt = jnp.swapaxes(x, 0, 1)                                     # (S, B, HIN)
    xr = xt[::-1]                                                  # (S, B, HIN)
    x_cat = jnp.concatenate([xt, xr], axis=-1).reshape(seq * bsz, 2 * hin)

    # masks: multiplicative key-axis mask (folded into k) + additive bias
    pad = attention_mask.astype(jnp.float32)                       # (B, S)
    padscale = (pad * scale)[:, :, None]                           # (B, S, 1)
    tril = jnp.tril(jnp.ones((seq, seq), jnp.float32), -1)         # constant-folded under jit
    bias = (-(1.0 - pad)[:, None, :] - tril[None, :, :]) * (1e12 * scale)   # (B, S, S)
    bias_tiled = jnp.tile(bias, (1, 1, ent))                       # (B, S, E*S)

    out = pl.pallas_call(
        egp_fused_kernel,
        out_shape=jax.ShapeDtypeStruct((bsz, seq, ent * seq), jnp.float32),
    )(x_cat, prep["wih2"], prep["whh2"], prep["b_lstm"], prep["w_head"],
      prep["b_head"], prep["rope"], prep["blockmask"], padscale, bias_tiled)

    # (B, S, E*S) -> (B, E, S, S)
    return out.reshape(bsz, seq, ent, seq).transpose(0, 2, 1, 3)


# =============================== full forward =================================
@jax.jit
def efficient_global_pointer_forward(last_hidden_state, attention_mask,
                                     external_vectors, sentence_embeddings, prep):
    bsz, seq, _ = last_hidden_state.shape
    sent_exp = jnp.broadcast_to(sentence_embeddings[:, None, :],
                                (bsz, seq, sentence_embeddings.shape[-1]))
    concat_state = jnp.concatenate([last_hidden_state, external_vectors, sent_exp], axis=-1)
    # dropout: identity (eval mode)
    return egp_pallas(concat_state, attention_mask, prep)


# =============================== reference (plain JAX) ========================
def reference_forward(last_hidden_state, attention_mask, external_vectors,
                      sentence_embeddings, params, ent_type_size, inner_dim):
    bsz, seq, _ = last_hidden_state.shape
    sent_exp = jnp.broadcast_to(sentence_embeddings[:, None, :],
                                (bsz, seq, sentence_embeddings.shape[-1]))
    x = jnp.concatenate([last_hidden_state, external_vectors, sent_exp], axis=-1)

    def lstm_dir(xx, w_ih, w_hh, b_ih, b_hh, reverse):
        hh = w_hh.shape[1]

        def step(carry, x_t):
            h, c = carry
            g = (jnp.dot(x_t, w_ih.T, precision=_PREC)
                 + jnp.dot(h, w_hh.T, precision=_PREC) + b_ih + b_hh)
            i = jax.nn.sigmoid(g[:, :hh])
            f = jax.nn.sigmoid(g[:, hh:2 * hh])
            gg = jnp.tanh(g[:, 2 * hh:3 * hh])
            o = jax.nn.sigmoid(g[:, 3 * hh:])
            c = f * c + i * gg
            h = o * jnp.tanh(c)
            return (h, c), h

        xs = jnp.swapaxes(xx, 0, 1)
        if reverse:
            xs = xs[::-1]
        init = (jnp.zeros((xx.shape[0], hh)), jnp.zeros((xx.shape[0], hh)))
        _, hs = lax.scan(step, init, xs)
        if reverse:
            hs = hs[::-1]
        return jnp.swapaxes(hs, 0, 1)

    fwd = lstm_dir(x, params["w_ih_f"], params["w_hh_f"], params["b_ih_f"], params["b_hh_f"], False)
    bwd = lstm_dir(x, params["w_ih_b"], params["w_hh_b"], params["b_ih_b"], params["b_hh_b"], True)
    lstm_out = jnp.concatenate([fwd, bwd], axis=-1)

    outputs = jnp.dot(lstm_out, params["w_dense"].T, precision=_PREC) + params["b_dense"]
    outputs = outputs.reshape(bsz, seq, ent_type_size, 2 * inner_dim)
    qw, kw = outputs[..., :inner_dim], outputs[..., inner_dim:]

    pos = jnp.arange(seq, dtype=jnp.float32)[:, None]
    idx = jnp.arange(inner_dim // 2, dtype=jnp.float32)
    theta = jnp.power(10000.0, -2.0 * idx / inner_dim)
    emb = pos * theta
    pos_emb = jnp.stack([jnp.sin(emb), jnp.cos(emb)], axis=-1).reshape(seq, inner_dim)
    cos_pos = jnp.repeat(pos_emb[None, :, None, 1::2], 2, axis=-1)
    sin_pos = jnp.repeat(pos_emb[None, :, None, 0::2], 2, axis=-1)
    qw2 = jnp.stack([-qw[..., 1::2], qw[..., 0::2]], axis=-1).reshape(qw.shape)
    qw = qw * cos_pos + qw2 * sin_pos
    kw2 = jnp.stack([-kw[..., 1::2], kw[..., 0::2]], axis=-1).reshape(kw.shape)
    kw = kw * cos_pos + kw2 * sin_pos

    logits = jnp.einsum('bmhd,bnhd->bhmn', qw, kw, precision=_PREC)
    pad_mask = jnp.broadcast_to(attention_mask[:, None, None, :].astype(jnp.float32), logits.shape)
    logits = logits * pad_mask - (1.0 - pad_mask) * 1e12
    tril = jnp.tril(jnp.ones((seq, seq), jnp.float32), -1)
    logits = logits - tril * 1e12
    return logits / (inner_dim ** 0.5)


# =============================== params & main ================================
def init_params(key):
    ks = jax.random.split(key, 10)

    def w(k, shape, scale=0.1):
        return jax.random.normal(k, shape, jnp.float32) * scale

    return {
        "w_ih_f": w(ks[0], (4 * HH, HIN)),
        "w_hh_f": w(ks[1], (4 * HH, HH)),
        "b_ih_f": w(ks[2], (4 * HH,)),
        "b_hh_f": w(ks[3], (4 * HH,)),
        "w_ih_b": w(ks[4], (4 * HH, HIN)),
        "w_hh_b": w(ks[5], (4 * HH, HH)),
        "b_ih_b": w(ks[6], (4 * HH,)),
        "b_hh_b": w(ks[7], (4 * HH,)),
        "w_dense": w(ks[8], (ENT * DIM * 2, 2 * HH)),
        "b_dense": w(ks[9], (ENT * DIM * 2,)),
    }


if __name__ == "__main__":
    key = jax.random.PRNGKey(0)
    kp, k1, k2, k3 = jax.random.split(key, 4)
    params = init_params(kp)
    prep = prepare_egp_params(params, S, ENT, DIM)   # one-time weight preparation

    last_hidden_state = jax.random.normal(k1, (B, S, ENC), jnp.float32)
    external_vectors = jax.random.normal(k2, (B, S, EXT), jnp.float32)
    sentence_embeddings = jax.random.normal(k3, (B, SENT), jnp.float32)
    attention_mask = jnp.array([[1, 1, 1, 1, 1, 1, 1, 0],
                                [1, 1, 1, 1, 1, 0, 0, 0]], dtype=jnp.float32)

    logits = efficient_global_pointer_forward(
        last_hidden_state, attention_mask, external_vectors, sentence_embeddings, prep)
    logits = jax.block_until_ready(logits)

    ref = reference_forward(last_hidden_state, attention_mask, external_vectors,
                            sentence_embeddings, params, ENT, DIM)
    ref = jax.block_until_ready(ref)

    np.testing.assert_allclose(np.asarray(logits), np.asarray(ref), rtol=1e-4, atol=1e-4)
    assert logits.shape == (B, ENT, S, S)
    print("KERNEL_OK")
</pallas_src>

<mosaic_0001>
module attributes {stable_mosaic.version = 11 : i64} {
  func.func @egp_fused_kernel(%arg0: memref<16x160xf32, #tpu.memory_space<vmem>>, %arg1: memref<160x256xf32, #tpu.memory_space<vmem>>, %arg2: memref<64x256xf32, #tpu.memory_space<vmem>>, %arg3: memref<1x256xf32, #tpu.memory_space<vmem>>, %arg4: memref<64x256xf32, #tpu.memory_space<vmem>>, %arg5: memref<1x256xf32, #tpu.memory_space<vmem>>, %arg6: memref<8x256xf32, #tpu.memory_space<vmem>>, %arg7: memref<32x64xf32, #tpu.memory_space<vmem>>, %arg8: memref<2x8x1xf32, #tpu.memory_space<vmem>>, %arg9: memref<2x8x32xf32, #tpu.memory_space<vmem>>, %arg10: memref<2x8x32xf32, #tpu.memory_space<vmem>>) attributes {dimension_semantics = [], scalar_prefetch = 0 : i64, scratch_operands = 0 : i64, tpu.core_type = #tpu.core_type<tc>} {
    %c0 = arith.constant 0 : index
    %c0_0 = arith.constant 0 : index
    %0 = vector.load %arg0[%c0, %c0_0] : memref<16x160xf32, #tpu.memory_space<vmem>>, vector<16x160xf32>
    %c0_1 = arith.constant 0 : index
    %c0_2 = arith.constant 0 : index
    %1 = vector.load %arg1[%c0_1, %c0_2] : memref<160x256xf32, #tpu.memory_space<vmem>>, vector<160x256xf32>
    %cst = arith.constant dense<0.000000e+00> : vector<16x256xf32>
    %2 = tpu.matmul %0, %1, %cst {dimension_numbers = #tpu.dot_dimension_numbers<[1], [0], [0], [1], [0, 0, 1, 1], [], []>, precision = #tpu.contract_precision<fp32>} : vector<16x160xf32>, vector<160x256xf32>, vector<16x256xf32> -> vector<16x256xf32>
    %c0_3 = arith.constant 0 : index
    %c0_4 = arith.constant 0 : index
    %3 = vector.load %arg3[%c0_3, %c0_4] : memref<1x256xf32, #tpu.memory_space<vmem>>, vector<1x256xf32>
    %4 = vector.broadcast %3 : vector<1x256xf32> to vector<16x256xf32>
    %5 = arith.addf %2, %4 : vector<16x256xf32>
    %c0_5 = arith.constant 0 : index
    %c0_6 = arith.constant 0 : index
    %6 = vector.load %arg2[%c0_5, %c0_6] : memref<64x256xf32, #tpu.memory_space<vmem>>, vector<64x256xf32>
    %cst_7 = arith.constant 0.000000e+00 : f32
    %7 = vector.broadcast %cst_7 : f32 to vector<2x64xf32>
    %cst_8 = arith.constant 0.000000e+00 : f32
    %8 = vector.broadcast %cst_8 : f32 to vector<2x64xf32>
    %cst_9 = arith.constant dense<0.000000e+00> : vector<2x256xf32>
    %9 = tpu.matmul %7, %6, %cst_9 {dimension_numbers = #tpu.dot_dimension_numbers<[1], [0], [0], [1], [0, 0, 1, 1], [], []>, precision = #tpu.contract_precision<fp32>} : vector<2x64xf32>, vector<64x256xf32>, vector<2x256xf32> -> vector<2x256xf32>
    %10 = vector.extract_strided_slice %5 {offsets = [0, 0], sizes = [2, 256], strides = [1, 1]} : vector<16x256xf32> to vector<2x256xf32>
    %11 = arith.addf %9, %10 : vector<2x256xf32>
    %12 = vector.extract_strided_slice %11 {offsets = [0, 0], sizes = [2, 192], strides = [1, 1]} : vector<2x256xf32> to vector<2x192xf32>
    %13 = arith.negf %12 : vector<2x192xf32>
    %14 = math.exp %13 : vector<2x192xf32>
    %cst_10 = arith.constant 1.000000e+00 : f32
    %15 = vector.broadcast %cst_10 : f32 to vector<2x192xf32>
    %16 = arith.addf %15, %14 : vector<2x192xf32>
    %17 = arith.divf %15, %16 : vector<2x192xf32>
    %18 = vector.extract_strided_slice %11 {offsets = [0, 192], sizes = [2, 64], strides = [1, 1]} : vector<2x256xf32> to vector<2x64xf32>
    %19 = math.tanh %18 : vector<2x64xf32>
    %20 = vector.extract_strided_slice %17 {offsets = [0, 0], sizes = [2, 64], strides = [1, 1]} : vector<2x192xf32> to vector<2x64xf32>
    %21 = vector.extract_strided_slice %17 {offsets = [0, 64], sizes = [2, 64], strides = [1, 1]} : vector<2x192xf32> to vector<2x64xf32>
    %22 = vector.extract_strided_slice %17 {offsets = [0, 128], sizes = [2, 64], strides = [1, 1]} : vector<2x192xf32> to vector<2x64xf32>
    %23 = arith.mulf %21, %8 : vector<2x64xf32>
    %24 = arith.mulf %20, %19 : vector<2x64xf32>
    %25 = arith.addf %23, %24 : vector<2x64xf32>
    %26 = math.tanh %25 : vector<2x64xf32>
    %27 = arith.mulf %22, %26 : vector<2x64xf32>
    %cst_11 = arith.constant dense<0.000000e+00> : vector<2x256xf32>
    %28 = tpu.matmul %27, %6, %cst_11 {dimension_numbers = #tpu.dot_dimension_numbers<[1], [0], [0], [1], [0, 0, 1, 1], [], []>, precision = #tpu.contract_precision<fp32>} : vector<2x64xf32>, vector<64x256xf32>, vector<2x256xf32> -> vector<2x256xf32>
    %29 = vector.extract_strided_slice %5 {offsets = [2, 0], sizes = [2, 256], strides = [1, 1]} : vector<16x256xf32> to vector<2x256xf32>
    %30 = arith.addf %28, %29 : vector<2x256xf32>
    %31 = vector.extract_strided_slice %30 {offsets = [0, 0], sizes = [2, 192], strides = [1, 1]} : vector<2x256xf32> to vector<2x192xf32>
    %32 = arith.negf %31 : vector<2x192xf32>
    %33 = math.exp %32 : vector<2x192xf32>
    %cst_12 = arith.constant 1.000000e+00 : f32
    %34 = vector.broadcast %cst_12 : f32 to vector<2x192xf32>
    %35 = arith.addf %34, %33 : vector<2x192xf32>
    %36 = arith.divf %34, %35 : vector<2x192xf32>
    %37 = vector.extract_strided_slice %30 {offsets = [0, 192], sizes = [2, 64], strides = [1, 1]} : vector<2x256xf32> to vector<2x64xf32>
    %38 = math.tanh %37 : vector<2x64xf32>
    %39 = vector.extract_strided_slice %36 {offsets = [0, 0], sizes = [2, 64], strides = [1, 1]} : vector<2x192xf32> to vector<2x64xf32>
    %40 = vector.extract_strided_slice %36 {offsets = [0, 64], sizes = [2, 64], strides = [1, 1]} : vector<2x192xf32> to vector<2x64xf32>
    %41 = vector.extract_strided_slice %36 {offsets = [0, 128], sizes = [2, 64], strides = [1, 1]} : vector<2x192xf32> to vector<2x64xf32>
    %42 = arith.mulf %40, %25 : vector<2x64xf32>
    %43 = arith.mulf %39, %38 : vector<2x64xf32>
    %44 = arith.addf %42, %43 : vector<2x64xf32>
    %45 = math.tanh %44 : vector<2x64xf32>
    %46 = arith.mulf %41, %45 : vector<2x64xf32>
    %cst_13 = arith.constant dense<0.000000e+00> : vector<2x256xf32>
    %47 = tpu.matmul %46, %6, %cst_13 {dimension_numbers = #tpu.dot_dimension_numbers<[1], [0], [0], [1], [0, 0, 1, 1], [], []>, precision = #tpu.contract_precision<fp32>} : vector<2x64xf32>, vector<64x256xf32>, vector<2x256xf32> -> vector<2x256xf32>
    %48 = vector.extract_strided_slice %5 {offsets = [4, 0], sizes = [2, 256], strides = [1, 1]} : vector<16x256xf32> to vector<2x256xf32>
    %49 = arith.addf %47, %48 : vector<2x256xf32>
    %50 = vector.extract_strided_slice %49 {offsets = [0, 0], sizes = [2, 192], strides = [1, 1]} : vector<2x256xf32> to vector<2x192xf32>
    %51 = arith.negf %50 : vector<2x192xf32>
    %52 = math.exp %51 : vector<2x192xf32>
    %cst_14 = arith.constant 1.000000e+00 : f32
    %53 = vector.broadcast %cst_14 : f32 to vector<2x192xf32>
    %54 = arith.addf %53, %52 : vector<2x192xf32>
    %55 = arith.divf %53, %54 : vector<2x192xf32>
    %56 = vector.extract_strided_slice %49 {offsets = [0, 192], sizes = [2, 64], strides = [1, 1]} : vector<2x256xf32> to vector<2x64xf32>
    %57 = math.tanh %56 : vector<2x64xf32>
    %58 = vector.extract_strided_slice %55 {offsets = [0, 0], sizes = [2, 64], strides = [1, 1]} : vector<2x192xf32> to vector<2x64xf32>
    %59 = vector.extract_strided_slice %55 {offsets = [0, 64], sizes = [2, 64], strides = [1, 1]} : vector<2x192xf32> to vector<2x64xf32>
    %60 = vector.extract_strided_slice %55 {offsets = [0, 128], sizes = [2, 64], strides = [1, 1]} : vector<2x192xf32> to vector<2x64xf32>
    %61 = arith.mulf %59, %44 : vector<2x64xf32>
    %62 = arith.mulf %58, %57 : vector<2x64xf32>
    %63 = arith.addf %61, %62 : vector<2x64xf32>
    %64 = math.tanh %63 : vector<2x64xf32>
    %65 = arith.mulf %60, %64 : vector<2x64xf32>
    %cst_15 = arith.constant dense<0.000000e+00> : vector<2x256xf32>
    %66 = tpu.matmul %65, %6, %cst_15 {dimension_numbers = #tpu.dot_dimension_numbers<[1], [0], [0], [1], [0, 0, 1, 1], [], []>, precision = #tpu.contract_precision<fp32>} : vector<2x64xf32>, vector<64x256xf32>, vector<2x256xf32> -> vector<2x256xf32>
    %67 = vector.extract_strided_slice %5 {offsets = [6, 0], sizes = [2, 256], strides = [1, 1]} : vector<16x256xf32> to vector<2x256xf32>
    %68 = arith.addf %66, %67 : vector<2x256xf32>
    %69 = vector.extract_strided_slice %68 {offsets = [0, 0], sizes = [2, 192], strides = [1, 1]} : vector<2x256xf32> to vector<2x192xf32>
    %70 = arith.negf %69 : vector<2x192xf32>
    %71 = math.exp %70 : vector<2x192xf32>
    %cst_16 = arith.constant 1.000000e+00 : f32
    %72 = vector.broadcast %cst_16 : f32 to vector<2x192xf32>
    %73 = arith.addf %72, %71 : vector<2x192xf32>
    %74 = arith.divf %72, %73 : vector<2x192xf32>
    %75 = vector.extract_strided_slice %68 {offsets = [0, 192], sizes = [2, 64], strides = [1, 1]} : vector<2x256xf32> to vector<2x64xf32>
    %76 = math.tanh %75 : vector<2x64xf32>
    %77 = vector.extract_strided_slice %74 {offsets = [0, 0], sizes = [2, 64], strides = [1, 1]} : vector<2x192xf32> to vector<2x64xf32>
    %78 = vector.extract_strided_slice %74 {offsets = [0, 64], sizes = [2, 64], strides = [1, 1]} : vector<2x192xf32> to vector<2x64xf32>
    %79 = vector.extract_strided_slice %74 {offsets = [0, 128], sizes = [2, 64], strides = [1, 1]} : vector<2x192xf32> to vector<2x64xf32>
    %80 = arith.mulf %78, %63 : vector<2x64xf32>
    %81 = arith.mulf %77, %76 : vector<2x64xf32>
    %82 = arith.addf %80, %81 : vector<2x64xf32>
    %83 = math.tanh %82 : vector<2x64xf32>
    %84 = arith.mulf %79, %83 : vector<2x64xf32>
    %cst_17 = arith.constant dense<0.000000e+00> : vector<2x256xf32>
    %85 = tpu.matmul %84, %6, %cst_17 {dimension_numbers = #tpu.dot_dimension_numbers<[1], [0], [0], [1], [0, 0, 1, 1], [], []>, precision = #tpu.contract_precision<fp32>} : vector<2x64xf32>, vector<64x256xf32>, vector<2x256xf32> -> vector<2x256xf32>
    %86 = vector.extract_strided_slice %5 {offsets = [8, 0], sizes = [2, 256], strides = [1, 1]} : vector<16x256xf32> to vector<2x256xf32>
    %87 = arith.addf %85, %86 : vector<2x256xf32>
    %88 = vector.extract_strided_slice %87 {offsets = [0, 0], sizes = [2, 192], strides = [1, 1]} : vector<2x256xf32> to vector<2x192xf32>
    %89 = arith.negf %88 : vector<2x192xf32>
    %90 = math.exp %89 : vector<2x192xf32>
    %cst_18 = arith.constant 1.000000e+00 : f32
    %91 = vector.broadcast %cst_18 : f32 to vector<2x192xf32>
    %92 = arith.addf %91, %90 : vector<2x192xf32>
    %93 = arith.divf %91, %92 : vector<2x192xf32>
    %94 = vector.extract_strided_slice %87 {offsets = [0, 192], sizes = [2, 64], strides = [1, 1]} : vector<2x256xf32> to vector<2x64xf32>
    %95 = math.tanh %94 : vector<2x64xf32>
    %96 = vector.extract_strided_slice %93 {offsets = [0, 0], sizes = [2, 64], strides = [1, 1]} : vector<2x192xf32> to vector<2x64xf32>
    %97 = vector.extract_strided_slice %93 {offsets = [0, 64], sizes = [2, 64], strides = [1, 1]} : vector<2x192xf32> to vector<2x64xf32>
    %98 = vector.extract_strided_slice %93 {offsets = [0, 128], sizes = [2, 64], strides = [1, 1]} : vector<2x192xf32> to vector<2x64xf32>
    %99 = arith.mulf %97, %82 : vector<2x64xf32>
    %100 = arith.mulf %96, %95 : vector<2x64xf32>
    %101 = arith.addf %99, %100 : vector<2x64xf32>
    %102 = math.tanh %101 : vector<2x64xf32>
    %103 = arith.mulf %98, %102 : vector<2x64xf32>
    %cst_19 = arith.constant dense<0.000000e+00> : vector<2x256xf32>
    %104 = tpu.matmul %103, %6, %cst_19 {dimension_numbers = #tpu.dot_dimension_numbers<[1], [0], [0], [1], [0, 0, 1, 1], [], []>, precision = #tpu.contract_precision<fp32>} : vector<2x64xf32>, vector<64x256xf32>, vector<2x256xf32> -> vector<2x256xf32>
    %105 = vector.extract_strided_slice %5 {offsets = [10, 0], sizes = [2, 256], strides = [1, 1]} : vector<16x256xf32> to vector<2x256xf32>
    %106 = arith.addf %104, %105 : vector<2x256xf32>
    %107 = vector.extract_strided_slice %106 {offsets = [0, 0], sizes = [2, 192], strides = [1, 1]} : vector<2x256xf32> to vector<2x192xf32>
    %108 = arith.negf %107 : vector<2x192xf32>
    %109 = math.exp %108 : vector<2x192xf32>
    %cst_20 = arith.constant 1.000000e+00 : f32
    %110 = vector.broadcast %cst_20 : f32 to vector<2x192xf32>
    %111 = arith.addf %110, %109 : vector<2x192xf32>
    %112 = arith.divf %110, %111 : vector<2x192xf32>
    %113 = vector.extract_strided_slice %106 {offsets = [0, 192], sizes = [2, 64], strides = [1, 1]} : vector<2x256xf32> to vector<2x64xf32>
    %114 = math.tanh %113 : vector<2x64xf32>
    %115 = vector.extract_strided_slice %112 {offsets = [0, 0], sizes = [2, 64], strides = [1, 1]} : vector<2x192xf32> to vector<2x64xf32>
    %116 = vector.extract_strided_slice %112 {offsets = [0, 64], sizes = [2, 64], strides = [1, 1]} : vector<2x192xf32> to vector<2x64xf32>
    %117 = vector.extract_strided_slice %112 {offsets = [0, 128], sizes = [2, 64], strides = [1, 1]} : vector<2x192xf32> to vector<2x64xf32>
    %118 = arith.mulf %116, %101 : vector<2x64xf32>
    %119 = arith.mulf %115, %114 : vector<2x64xf32>
    %120 = arith.addf %118, %119 : vector<2x64xf32>
    %121 = math.tanh %120 : vector<2x64xf32>
    %122 = arith.mulf %117, %121 : vector<2x64xf32>
    %cst_21 = arith.constant dense<0.000000e+00> : vector<2x256xf32>
    %123 = tpu.matmul %122, %6, %cst_21 {dimension_numbers = #tpu.dot_dimension_numbers<[1], [0], [0], [1], [0, 0, 1, 1], [], []>, precision = #tpu.contract_precision<fp32>} : vector<2x64xf32>, vector<64x256xf32>, vector<2x256xf32> -> vector<2x256xf32>
    %124 = vector.extract_strided_slice %5 {offsets = [12, 0], sizes = [2, 256], strides = [1, 1]} : vector<16x256xf32> to vector<2x256xf32>
    %125 = arith.addf %123, %124 : vector<2x256xf32>
    %126 = vector.extract_strided_slice %125 {offsets = [0, 0], sizes = [2, 192], strides = [1, 1]} : vector<2x256xf32> to vector<2x192xf32>
    %127 = arith.negf %126 : vector<2x192xf32>
    %128 = math.exp %127 : vector<2x192xf32>
    %cst_22 = arith.constant 1.000000e+00 : f32
    %129 = vector.broadcast %cst_22 : f32 to vector<2x192xf32>
    %130 = arith.addf %129, %128 : vector<2x192xf32>
    %131 = arith.divf %129, %130 : vector<2x192xf32>
    %132 = vector.extract_strided_slice %125 {offsets = [0, 192], sizes = [2, 64], strides = [1, 1]} : vector<2x256xf32> to vector<2x64xf32>
    %133 = math.tanh %132 : vector<2x64xf32>
    %134 = vector.extract_strided_slice %131 {offsets = [0, 0], sizes = [2, 64], strides = [1, 1]} : vector<2x192xf32> to vector<2x64xf32>
    %135 = vector.extract_strided_slice %131 {offsets = [0, 64], sizes = [2, 64], strides = [1, 1]} : vector<2x192xf32> to vector<2x64xf32>
    %136 = vector.extract_strided_slice %131 {offsets = [0, 128], sizes = [2, 64], strides = [1, 1]} : vector<2x192xf32> to vector<2x64xf32>
    %137 = arith.mulf %135, %120 : vector<2x64xf32>
    %138 = arith.mulf %134, %133 : vector<2x64xf32>
    %139 = arith.addf %137, %138 : vector<2x64xf32>
    %140 = math.tanh %139 : vector<2x64xf32>
    %141 = arith.mulf %136, %140 : vector<2x64xf32>
    %cst_23 = arith.constant dense<0.000000e+00> : vector<2x256xf32>
    %142 = tpu.matmul %141, %6, %cst_23 {dimension_numbers = #tpu.dot_dimension_numbers<[1], [0], [0], [1], [0, 0, 1, 1], [], []>, precision = #tpu.contract_precision<fp32>} : vector<2x64xf32>, vector<64x256xf32>, vector<2x256xf32> -> vector<2x256xf32>
    %143 = vector.extract_strided_slice %5 {offsets = [14, 0], sizes = [2, 256], strides = [1, 1]} : vector<16x256xf32> to vector<2x256xf32>
    %144 = arith.addf %142, %143 : vector<2x256xf32>
    %145 = vector.extract_strided_slice %144 {offsets = [0, 0], sizes = [2, 192], strides = [1, 1]} : vector<2x256xf32> to vector<2x192xf32>
    %146 = arith.negf %145 : vector<2x192xf32>
    %147 = math.exp %146 : vector<2x192xf32>
    %cst_24 = arith.constant 1.000000e+00 : f32
    %148 = vector.broadcast %cst_24 : f32 to vector<2x192xf32>
    %149 = arith.addf %148, %147 : vector<2x192xf32>
    %150 = arith.divf %148, %149 : vector<2x192xf32>
    %151 = vector.extract_strided_slice %144 {offsets = [0, 192], sizes = [2, 64], strides = [1, 1]} : vector<2x256xf32> to vector<2x64xf32>
    %152 = math.tanh %151 : vector<2x64xf32>
    %153 = vector.extract_strided_slice %150 {offsets = [0, 0], sizes = [2, 64], strides = [1, 1]} : vector<2x192xf32> to vector<2x64xf32>
    %154 = vector.extract_strided_slice %150 {offsets = [0, 64], sizes = [2, 64], strides = [1, 1]} : vector<2x192xf32> to vector<2x64xf32>
    %155 = vector.extract_strided_slice %150 {offsets = [0, 128], sizes = [2, 64], strides = [1, 1]} : vector<2x192xf32> to vector<2x64xf32>
    %156 = arith.mulf %154, %139 : vector<2x64xf32>
    %157 = arith.mulf %153, %152 : vector<2x64xf32>
    %158 = arith.addf %156, %157 : vector<2x64xf32>
    %159 = math.tanh %158 : vector<2x64xf32>
    %160 = arith.mulf %155, %159 : vector<2x64xf32>
    %c0_25 = arith.constant 0 : index
    %c0_26 = arith.constant 0 : index
    %161 = vector.load %arg4[%c0_25, %c0_26] : memref<64x256xf32, #tpu.memory_space<vmem>>, vector<64x256xf32>
    %c0_27 = arith.constant 0 : index
    %c0_28 = arith.constant 0 : index
    %162 = vector.load %arg5[%c0_27, %c0_28] : memref<1x256xf32, #tpu.memory_space<vmem>>, vector<1x256xf32>
    %c0_29 = arith.constant 0 : index
    %c0_30 = arith.constant 0 : index
    %163 = vector.load %arg6[%c0_29, %c0_30] : memref<8x256xf32, #tpu.memory_space<vmem>>, vector<8x256xf32>
    %c0_31 = arith.constant 0 : index
    %c0_32 = arith.constant 0 : index
    %164 = vector.load %arg7[%c0_31, %c0_32] : memref<32x64xf32, #tpu.memory_space<vmem>>, vector<32x64xf32>
    %165 = vector.extract_strided_slice %27 {offsets = [0, 0], sizes = [1, 32], strides = [1, 1]} : vector<2x64xf32> to vector<1x32xf32>
    %166 = vector.extract_strided_slice %160 {offsets = [0, 32], sizes = [1, 32], strides = [1, 1]} : vector<2x64xf32> to vector<1x32xf32>
    %167 = tpu.concatenate %165, %166 in 1 : vector<1x32xf32>, vector<1x32xf32> -> vector<1x64xf32>
    %168 = vector.extract_strided_slice %46 {offsets = [0, 0], sizes = [1, 32], strides = [1, 1]} : vector<2x64xf32> to vector<1x32xf32>
    %169 = vector.extract_strided_slice %141 {offsets = [0, 32], sizes = [1, 32], strides = [1, 1]} : vector<2x64xf32> to vector<1x32xf32>
    %170 = tpu.concatenate %168, %169 in 1 : vector<1x32xf32>, vector<1x32xf32> -> vector<1x64xf32>
    %171 = vector.extract_strided_slice %65 {offsets = [0, 0], sizes = [1, 32], strides = [1, 1]} : vector<2x64xf32> to vector<1x32xf32>
    %172 = vector.extract_strided_slice %122 {offsets = [0, 32], sizes = [1, 32], strides = [1, 1]} : vector<2x64xf32> to vector<1x32xf32>
    %173 = tpu.concatenate %171, %172 in 1 : vector<1x32xf32>, vector<1x32xf32> -> vector<1x64xf32>
    %174 = vector.extract_strided_slice %84 {offsets = [0, 0], sizes = [1, 32], strides = [1, 1]} : vector<2x64xf32> to vector<1x32xf32>
    %175 = vector.extract_strided_slice %103 {offsets = [0, 32], sizes = [1, 32], strides = [1, 1]} : vector<2x64xf32> to vector<1x32xf32>
    %176 = tpu.concatenate %174, %175 in 1 : vector<1x32xf32>, vector<1x32xf32> -> vector<1x64xf32>
    %177 = vector.extract_strided_slice %103 {offsets = [0, 0], sizes = [1, 32], strides = [1, 1]} : vector<2x64xf32> to vector<1x32xf32>
    %178 = vector.extract_strided_slice %84 {offsets = [0, 32], sizes = [1, 32], strides = [1, 1]} : vector<2x64xf32> to vector<1x32xf32>
    %179 = tpu.concatenate %177, %178 in 1 : vector<1x32xf32>, vector<1x32xf32> -> vector<1x64xf32>
    %180 = vector.extract_strided_slice %122 {offsets = [0, 0], sizes = [1, 32], strides = [1, 1]} : vector<2x64xf32> to vector<1x32xf32>
    %181 = vector.extract_strided_slice %65 {offsets = [0, 32], sizes = [1, 32], strides = [1, 1]} : vector<2x64xf32> to vector<1x32xf32>
    %182 = tpu.concatenate %180, %181 in 1 : vector<1x32xf32>, vector<1x32xf32> -> vector<1x64xf32>
    %183 = vector.extract_strided_slice %141 {offsets = [0, 0], sizes = [1, 32], strides = [1, 1]} : vector<2x64xf32> to vector<1x32xf32>
    %184 = vector.extract_strided_slice %46 {offsets = [0, 32], sizes = [1, 32], strides = [1, 1]} : vector<2x64xf32> to vector<1x32xf32>
    %185 = tpu.concatenate %183, %184 in 1 : vector<1x32xf32>, vector<1x32xf32> -> vector<1x64xf32>
    %186 = vector.extract_strided_slice %160 {offsets = [0, 0], sizes = [1, 32], strides = [1, 1]} : vector<2x64xf32> to vector<1x32xf32>
    %187 = vector.extract_strided_slice %27 {offsets = [0, 32], sizes = [1, 32], strides = [1, 1]} : vector<2x64xf32> to vector<1x32xf32>
    %188 = tpu.concatenate %186, %187 in 1 : vector<1x32xf32>, vector<1x32xf32> -> vector<1x64xf32>
    %189 = tpu.concatenate %167, %170, %173, %176, %179, %182, %185, %188 in 0 : vector<1x64xf32>, vector<1x64xf32>, vector<1x64xf32>, vector<1x64xf32>, vector<1x64xf32>, vector<1x64xf32>, vector<1x64xf32>, vector<1x64xf32> -> vector<8x64xf32>
    %cst_33 = arith.constant dense<0.000000e+00> : vector<8x256xf32>
    %190 = tpu.matmul %189, %161, %cst_33 {dimension_numbers = #tpu.dot_dimension_numbers<[1], [0], [0], [1], [0, 0, 1, 1], [], []>, precision = #tpu.contract_precision<fp32>} : vector<8x64xf32>, vector<64x256xf32>, vector<8x256xf32> -> vector<8x256xf32>
    %191 = vector.broadcast %162 : vector<1x256xf32> to vector<8x256xf32>
    %192 = arith.addf %190, %191 : vector<8x256xf32>
    %193 = arith.mulf %192, %163 : vector<8x256xf32>
    %194 = vector.extract_strided_slice %193 {offsets = [0, 0], sizes = [8, 64], strides = [1, 1]} : vector<8x256xf32> to vector<8x64xf32>
    %195 = vector.extract_strided_slice %193 {offsets = [0, 64], sizes = [8, 64], strides = [1, 1]} : vector<8x256xf32> to vector<8x64xf32>
    %196 = arith.addf %194, %195 : vector<8x64xf32>
    %197 = vector.extract_strided_slice %193 {offsets = [0, 128], sizes = [8, 64], strides = [1, 1]} : vector<8x256xf32> to vector<8x64xf32>
    %198 = vector.extract_strided_slice %193 {offsets = [0, 192], sizes = [8, 64], strides = [1, 1]} : vector<8x256xf32> to vector<8x64xf32>
    %199 = arith.addf %197, %198 : vector<8x64xf32>
    %c0_34 = arith.constant 0 : index
    %c0_35 = arith.constant 0 : index
    %c0_36 = arith.constant 0 : index
    %200 = vector.load %arg8[%c0_34, %c0_35, %c0_36] : memref<2x8x1xf32, #tpu.memory_space<vmem>>, vector<1x8x1xf32>
    %201 = vector.shape_cast %200 : vector<1x8x1xf32> to vector<8x1xf32>
    %202 = vector.broadcast %201 : vector<8x1xf32> to vector<8x64xf32>
    %203 = arith.mulf %199, %202 : vector<8x64xf32>
    %204 = tpu.concatenate %203, %203, %203, %203 in 0 : vector<8x64xf32>, vector<8x64xf32>, vector<8x64xf32>, vector<8x64xf32> -> vector<32x64xf32>
    %205 = arith.mulf %204, %164 : vector<32x64xf32>
    %cst_37 = arith.constant dense<0.000000e+00> : vector<8x32xf32>
    %206 = tpu.matmul %196, %205, %cst_37 {dimension_numbers = #tpu.dot_dimension_numbers<[1], [1], [0], [0], [0, 0, 1, 0], [], []>, precision = #tpu.contract_precision<fp32>} : vector<8x64xf32>, vector<32x64xf32>, vector<8x32xf32> -> vector<8x32xf32>
    %c0_38 = arith.constant 0 : index
    %c0_39 = arith.constant 0 : index
    %c0_40 = arith.constant 0 : index
    %207 = vector.load %arg9[%c0_38, %c0_39, %c0_40] : memref<2x8x32xf32, #tpu.memory_space<vmem>>, vector<1x8x32xf32>
    %208 = vector.shape_cast %207 : vector<1x8x32xf32> to vector<8x32xf32>
    %209 = arith.addf %206, %208 : vector<8x32xf32>
    %c0_41 = arith.constant 0 : index
    %c0_42 = arith.constant 0 : index
    %c0_43 = arith.constant 0 : index
    %210 = vector.load %arg10[%c0_41, %c0_42, %c0_43] : memref<2x8x32xf32, #tpu.memory_space<vmem>>, vector<1x8x32xf32>
    %211 = vector.shape_cast %210 : vector<1x8x32xf32> to vector<8x32xf32>
    %212 = vector.shape_cast %209 : vector<8x32xf32> to vector<1x8x32xf32>
    tpu.vector_store %arg10[%c0_41, %c0_42, %c0_43], %212 {strides = array<i32>} : memref<2x8x32xf32, #tpu.memory_space<vmem>>, vector<1x8x32xf32>,
    %213 = vector.extract_strided_slice %27 {offsets = [1, 0], sizes = [1, 32], strides = [1, 1]} : vector<2x64xf32> to vector<1x32xf32>
    %214 = vector.extract_strided_slice %160 {offsets = [1, 32], sizes = [1, 32], strides = [1, 1]} : vector<2x64xf32> to vector<1x32xf32>
    %215 = tpu.concatenate %213, %214 in 1 : vector<1x32xf32>, vector<1x32xf32> -> vector<1x64xf32>
    %216 = vector.extract_strided_slice %46 {offsets = [1, 0], sizes = [1, 32], strides = [1, 1]} : vector<2x64xf32> to vector<1x32xf32>
    %217 = vector.extract_strided_slice %141 {offsets = [1, 32], sizes = [1, 32], strides = [1, 1]} : vector<2x64xf32> to vector<1x32xf32>
    %218 = tpu.concatenate %216, %217 in 1 : vector<1x32xf32>, vector<1x32xf32> -> vector<1x64xf32>
    %219 = vector.extract_strided_slice %65 {offsets = [1, 0], sizes = [1, 32], strides = [1, 1]} : vector<2x64xf32> to vector<1x32xf32>
    %220 = vector.extract_strided_slice %122 {offsets = [1, 32], sizes = [1, 32], strides = [1, 1]} : vector<2x64xf32> to vector<1x32xf32>
    %221 = tpu.concatenate %219, %220 in 1 : vector<1x32xf32>, vector<1x32xf32> -> vector<1x64xf32>
    %222 = vector.extract_strided_slice %84 {offsets = [1, 0], sizes = [1, 32], strides = [1, 1]} : vector<2x64xf32> to vector<1x32xf32>
    %223 = vector.extract_strided_slice %103 {offsets = [1, 32], sizes = [1, 32], strides = [1, 1]} : vector<2x64xf32> to vector<1x32xf32>
    %224 = tpu.concatenate %222, %223 in 1 : vector<1x32xf32>, vector<1x32xf32> -> vector<1x64xf32>
    %225 = vector.extract_strided_slice %103 {offsets = [1, 0], sizes = [1, 32], strides = [1, 1]} : vector<2x64xf32> to vector<1x32xf32>
    %226 = vector.extract_strided_slice %84 {offsets = [1, 32], sizes = [1, 32], strides = [1, 1]} : vector<2x64xf32> to vector<1x32xf32>
    %227 = tpu.concatenate %225, %226 in 1 : vector<1x32xf32>, vector<1x32xf32> -> vector<1x64xf32>
    %228 = vector.extract_strided_slice %122 {offsets = [1, 0], sizes = [1, 32], strides = [1, 1]} : vector<2x64xf32> to vector<1x32xf32>
    %229 = vector.extract_strided_slice %65 {offsets = [1, 32], sizes = [1, 32], strides = [1, 1]} : vector<2x64xf32> to vector<1x32xf32>
    %230 = tpu.concatenate %228, %229 in 1 : vector<1x32xf32>, vector<1x32xf32> -> vector<1x64xf32>
    %231 = vector.extract_strided_slice %141 {offsets = [1, 0], sizes = [1, 32], strides = [1, 1]} : vector<2x64xf32> to vector<1x32xf32>
    %232 = vector.extract_strided_slice %46 {offsets = [1, 32], sizes = [1, 32], strides = [1, 1]} : vector<2x64xf32> to vector<1x32xf32>
    %233 = tpu.concatenate %231, %232 in 1 : vector<1x32xf32>, vector<1x32xf32> -> vector<1x64xf32>
    %234 = vector.extract_strided_slice %160 {offsets = [1, 0], sizes = [1, 32], strides = [1, 1]} : vector<2x64xf32> to vector<1x32xf32>
    %235 = vector.extract_strided_slice %27 {offsets = [1, 32], sizes = [1, 32], strides = [1, 1]} : vector<2x64xf32> to vector<1x32xf32>
    %236 = tpu.concatenate %234, %235 in 1 : vector<1x32xf32>, vector<1x32xf32> -> vector<1x64xf32>
    %237 = tpu.concatenate %215, %218, %221, %224, %227, %230, %233, %236 in 0 : vector<1x64xf32>, vector<1x64xf32>, vector<1x64xf32>, vector<1x64xf32>, vector<1x64xf32>, vector<1x64xf32>, vector<1x64xf32>, vector<1x64xf32> -> vector<8x64xf32>
    %cst_44 = arith.constant dense<0.000000e+00> : vector<8x256xf32>
    %238 = tpu.matmul %237, %161, %cst_44 {dimension_numbers = #tpu.dot_dimension_numbers<[1], [0], [0], [1], [0, 0, 1, 1], [], []>, precision = #tpu.contract_precision<fp32>} : vector<8x64xf32>, vector<64x256xf32>, vector<8x256xf32> -> vector<8x256xf32>
    %239 = vector.broadcast %162 : vector<1x256xf32> to vector<8x256xf32>
    %240 = arith.addf %238, %239 : vector<8x256xf32>
    %241 = arith.mulf %240, %163 : vector<8x256xf32>
    %242 = vector.extract_strided_slice %241 {offsets = [0, 0], sizes = [8, 64], strides = [1, 1]} : vector<8x256xf32> to vector<8x64xf32>
    %243 = vector.extract_strided_slice %241 {offsets = [0, 64], sizes = [8, 64], strides = [1, 1]} : vector<8x256xf32> to vector<8x64xf32>
    %244 = arith.addf %242, %243 : vector<8x64xf32>
    %245 = vector.extract_strided_slice %241 {offsets = [0, 128], sizes = [8, 64], strides = [1, 1]} : vector<8x256xf32> to vector<8x64xf32>
    %246 = vector.extract_strided_slice %241 {offsets = [0, 192], sizes = [8, 64], strides = [1, 1]} : vector<8x256xf32> to vector<8x64xf32>
    %247 = arith.addf %245, %246 : vector<8x64xf32>
    %c1 = arith.constant 1 : index
    %c0_45 = arith.constant 0 : index
    %c0_46 = arith.constant 0 : index
    %248 = vector.load %arg8[%c1, %c0_45, %c0_46] : memref<2x8x1xf32, #tpu.memory_space<vmem>>, vector<1x8x1xf32>
    %249 = vector.shape_cast %248 : vector<1x8x1xf32> to vector<8x1xf32>
    %250 = vector.broadcast %249 : vector<8x1xf32> to vector<8x64xf32>
    %251 = arith.mulf %247, %250 : vector<8x64xf32>
    %252 = tpu.concatenate %251, %251, %251, %251 in 0 : vector<8x64xf32>, vector<8x64xf32>, vector<8x64xf32>, vector<8x64xf32> -> vector<32x64xf32>
    %253 = arith.mulf %252, %164 : vector<32x64xf32>
    %cst_47 = arith.constant dense<0.000000e+00> : vector<8x32xf32>
    %254 = tpu.matmul %244, %253, %cst_47 {dimension_numbers = #tpu.dot_dimension_numbers<[1], [1], [0], [0], [0, 0, 1, 0], [], []>, precision = #tpu.contract_precision<fp32>} : vector<8x64xf32>, vector<32x64xf32>, vector<8x32xf32> -> vector<8x32xf32>
    %c1_48 = arith.constant 1 : index
    %c0_49 = arith.constant 0 : index
    %c0_50 = arith.constant 0 : index
    %255 = vector.load %arg9[%c1_48, %c0_49, %c0_50] : memref<2x8x32xf32, #tpu.memory_space<vmem>>, vector<1x8x32xf32>
    %256 = vector.shape_cast %255 : vector<1x8x32xf32> to vector<8x32xf32>
    %257 = arith.addf %254, %256 : vector<8x32xf32>
    %c1_51 = arith.constant 1 : index
    %c0_52 = arith.constant 0 : index
    %c0_53 = arith.constant 0 : index
    %258 = vector.load %arg10[%c1_51, %c0_52, %c0_53] : memref<2x8x32xf32, #tpu.memory_space<vmem>>, vector<1x8x32xf32>
    %259 = vector.shape_cast %258 : vector<1x8x32xf32> to vector<8x32xf32>
    %260 = vector.shape_cast %257 : vector<8x32xf32> to vector<1x8x32xf32>
    tpu.vector_store %arg10[%c1_51, %c0_52, %c0_53], %260 {strides = array<i32>} : memref<2x8x32xf32, #tpu.memory_space<vmem>>, vector<1x8x32xf32>,
    return
  }
}

</mosaic_0001>

<bundles_post_ra>
// kernel: tile.9
= control target key start
LH: loop header
LB: loop body
LE: loop exit
PB: predicated region body
PF: predicated region fallthrough
CT: control target
= control target key end

     0   :  { %vm83_vm0 = vcmask 1047556   ;;  %vm85_vm1 = vcmask 64512   ;;  %s196_s9 = smov 24   ;;  %s197_s14 = smov 8   ;;  %vm104_vm2 = vcmask 261312   ;;  %vm125_vm3 = vcmask 195712   ;;  %s290_s0 = inlined_call_operand.vmem [shape: f32[2,8,4,8], index: 0, kind: input, shape index: {}]   ;;  %s291_s1 = inlined_call_operand.vmem [shape: f32[2,8,32], index: 1, kind: output, shape index: {}]  }
   0x1   :  { %v181_v0 = vld [vmem:[%s290_s0 + $0x1c] sm:$0xf]  ;;  %v182_v1 = vld [vmem:[%s290_s0 + $0x18] sm:$0xf]  ;;  %v183_v2 = vld [vmem:[%s290_s0 + $0x14] sm:$0xf] }
   0x2   :  { %49 = vst [vmem:[#allocation0 + $0x38] sm:$0xf] %v181_v0  ;;  %54 = vst [vmem:[#allocation0 + $0x30] sm:$0xf] %v182_v1  ;;  %v184_v3 = vld [vmem:[%s290_s0 + $0x10] sm:$0xf] }
   0x3   :  { %59 = vst [vmem:[#allocation0 + $0x28] sm:$0xf] %v183_v2  ;;  %v185_v4 = vld [vmem:[%s290_s0 + $0xc] sm:$0xf]  ;;  %v186_v5 = vld [vmem:[%s290_s0 + $0x8] sm:$0xf] }
   0x4   :  { %64 = vst [vmem:[#allocation0 + $0x20] sm:$0xf] %v184_v3  ;;  %69 = vst [vmem:[#allocation0 + $0x18] sm:$0xf] %v185_v4  ;;  %v187_v6 = vld [vmem:[%s290_s0 + $0x4] sm:$0xf] }
   0x5   :  { %74 = vst [vmem:[#allocation0 + $0x10] sm:$0xf] %v186_v5  ;;  %v79_v7 = vld [vmem:[%s290_s0] sm:$0xf]  ;;  %78 = vst [vmem:[#allocation0 + $0x8] sm:$0xf] %v187_v6 }
   0x6   :  { %80 = vst [vmem:[#allocation0] sm:$0xf] %v79_v7  ;;  %v173_v8 = vld [vmem:[%s290_s0 + $0x3c] sm:$0xf]  ;;  %v174_v9 = vld [vmem:[%s290_s0 + $0x38] sm:$0xf] }
   0x7   :  { %9 = vst [vmem:[#allocation0 + $0x78] sm:$0xf] %v173_v8  ;;  %14 = vst [vmem:[#allocation0 + $0x70] sm:$0xf] %v174_v9  ;;  %v175_v10 = vld [vmem:[%s290_s0 + $0x34] sm:$0xf] }
   0x8   :  { %v176_v11 = vld [vmem:[%s290_s0 + $0x30] sm:$0xf]  ;;  %v177_v12 = vld [vmem:[%s290_s0 + $0x2c] sm:$0xf]  ;;  %19 = vst [vmem:[#allocation0 + $0x68] sm:$0xf] %v175_v10 }
   0x9   :  { %24 = vst [vmem:[#allocation0 + $0x60] sm:$0xf] %v176_v11  ;;  %29 = vst [vmem:[#allocation0 + $0x58] sm:$0xf] %v177_v12  ;;  %v178_v13 = vld [vmem:[%s290_s0 + $0x28] sm:$0xf] }
   0xa   :  { %v179_v14 = vld [vmem:[%s290_s0 + $0x24] sm:$0xf]  ;;  %v180_v15 = vld [vmem:[%s290_s0 + $0x20] sm:$0xf]  ;;  %34 = vst [vmem:[#allocation0 + $0x50] sm:$0xf] %v178_v13 }
   0xb   :  { %39 = vst [vmem:[#allocation0 + $0x48] sm:$0xf] %v179_v14  ;;  %44 = vst [vmem:[#allocation0 + $0x40] sm:$0xf] %v180_v15  ;;  %s195_s0 = smov 16   ;;  %vm146_vm4 = vcmask 130112  }
   0xc   :  { %v120_v16 = vld [vmem:[#allocation0 + $0x2] ss:$8 sm:$0xf0]   ;;  %v99_v17 = vld [vmem:[#allocation0 + $0x3] ss:$8 sm:$0xf0]  }
   0xd   :  { %v118_v18 = vld [vmem:[#allocation0 + $0x2] ss:$8 sm:$0xf]   ;;  %v97_v19 = vld [vmem:[#allocation0 + $0x3] ss:$8 sm:$0xf]  }
   0xe   :  { %v122_v20 = vsel %vm83_vm0, %v120_v16, %v118_v18  ;;  %v101_v21 = vsel %vm83_vm0, %v99_v17, %v97_v19  ;;  %v139_v24 = vld [vmem:[#allocation0 + $0x1] ss:$8 sm:$0xf]   ;;  %v81_v32 = vld [vmem:[#allocation0] ss:$8 sm:$0xf]  }
   0xf   :  { %123 = vrot.lane.b32.xlu1 %v122_v20, %s195_s0  ;;  %102 = vrot.lane.b32.xlu0 %v101_v21, %s196_s9  ;;  %v141_v25 = vld [vmem:[#allocation0 + $0x1] ss:$8 sm:$0xf0]   ;;  %v82_v33 = vld [vmem:[#allocation0] ss:$8 sm:$0xf0]  }
  0x10   :  { %v130_v22 = vld [vmem:[#allocation0 + $0x42] ss:$8 sm:$0xf0]   ;;  %v109_v23 = vld [vmem:[#allocation0 + $0x43] ss:$8 sm:$0xf0]   ;;  %v84_v34 = vsel %vm83_vm0, %v82_v33, %v81_v32  ;;  %v143_v38 = vsel %vm83_vm0, %v141_v25, %v139_v24 }
  0x11   :  { %v151_v31 = vld [vmem:[#allocation0 + $0x41] ss:$8 sm:$0xf0]   ;;  %v90_v36 = vld [vmem:[#allocation0 + $0x40] ss:$8 sm:$0xf0]  }
  0x12   :  { %v128_v26 = vld [vmem:[#allocation0 + $0x42] ss:$8 sm:$0xf]   ;;  %v107_v27 = vld [vmem:[#allocation0 + $0x43] ss:$8 sm:$0xf]  }
  0x13   :  { %v132_v28 = vsel %vm83_vm0, %v130_v22, %v128_v26  ;;  %v111_v29 = vsel %vm83_vm0, %v109_v23, %v107_v27  ;;  %v149_v30 = vld [vmem:[#allocation0 + $0x41] ss:$8 sm:$0xf]   ;;  %v88_v35 = vld [vmem:[#allocation0 + $0x40] ss:$8 sm:$0xf]  }
  0x14   :  { %133 = vrot.lane.b32.xlu1 %v132_v28, %s195_s0  ;;  %112 = vrot.lane.b32.xlu0 %v111_v29, %s196_s9  ;;  %v153_v37 = vsel %vm83_vm0, %v151_v31, %v149_v30  ;;  %86 = vst.msk [vmem:[%s291_s1] sm:$0xff] %vm85_vm1, %v84_v34   ;;  %v92_v39 = vsel %vm83_vm0, %v90_v36, %v88_v35 }
  0x15   :  { %188 = vst.msk [vmem:[%s291_s1 + $0x8] sm:$0xff] %vm85_vm1, %v92_v39  }
  0x18   :  { %154 = vrot.lane.b32.xlu1 %v153_v37, %s197_s14  ;;  %144 = vrot.lane.b32.xlu0 %v143_v38, %s197_s14 }
  0x81   :  { %v124_v40 = vpop.permute.xlu1 %123   ;;  %v103_v41 = vpop.permute.xlu0 %102  }
  0x82   :  { %105 = vst.msk [vmem:[%s291_s1] sm:$0xff] %vm104_vm2, %v103_v41  }
  0x83   :  { %126 = vst.msk [vmem:[%s291_s1] sm:$0xff] %vm125_vm3, %v124_v40  }
  0x86   :  { %v134_v42 = vpop.permute.xlu1 %133   ;;  %v113_v43 = vpop.permute.xlu0 %112  }
  0x87   :  { %189 = vst.msk [vmem:[%s291_s1 + $0x8] sm:$0xff] %vm104_vm2, %v113_v43  }
  0x88   :  { %190 = vst.msk [vmem:[%s291_s1 + $0x8] sm:$0xff] %vm125_vm3, %v134_v42  }
  0x8a   :  { %v155_v44 = vpop.permute.xlu1 %154   ;;  %v145_v45 = vpop.permute.xlu0 %144  }
  0x8b   :  { %191 = vst.msk [vmem:[%s291_s1 + $0x8] sm:$0xff] %vm146_vm4, %v155_v44   ;;  %147 = vst.msk [vmem:[%s291_s1] sm:$0xff] %vm146_vm4, %v145_v45  }

// kernel: efficient_global_pointer_forward.1
= control target key start
LH: loop header
LB: loop body
LE: loop exit
PB: predicated region body
PF: predicated region fallthrough
CT: control target
= control target key end

     0   :  { %15 = vsyncpa [#allocation3], 0  ;;  %s9425_s13 = smov [#allocation2]   ;;  %s12310_s0 = inlined_call_operand.vmem [shape: f32[16,160], index: 0, kind: input, shape index: {}]   ;;  %s12311_s1 = inlined_call_operand.vmem [shape: f32[160,256], index: 1, kind: input, shape index: {}]   ;;  %s12312_s2 = inlined_call_operand.vmem [shape: f32[64,256], index: 2, kind: input, shape index: {}]   ;;  %s12313_s3 = inlined_call_operand.vmem [shape: f32[1,256], index: 3, kind: input, shape index: {}]   ;;  %s12314_s4 = inlined_call_operand.hbm [shape: f32[64,256], index: 4, kind: input, shape index: {}]   ;;  %s12315_s5 = inlined_call_operand.vmem [shape: f32[1,256], index: 5, kind: input, shape index: {}]   ;;  %s12316_s6 = inlined_call_operand.vmem [shape: f32[8,256], index: 6, kind: input, shape index: {}]   ;;  %s12317_s7 = inlined_call_operand.vmem [shape: f32[32,64], index: 7, kind: input, shape index: {}]   ;;  %s12318_s8 = inlined_call_operand.vmem [shape: f32[2,8,1], index: 8, kind: input, shape index: {}]   ;;  %s12319_s9 = inlined_call_operand.vmem [shape: f32[2,8,32], index: 9, kind: input, shape index: {}]   ;;  %s12320_s10 = inlined_call_operand.vmem [shape: f32[2,8,32], index: 10, kind: output, shape index: {}]  }
   0x1   :  { %s29_s14 = sshll.u32 %s9425_s13, 4  ;;  %s30_s14 = int_to_ptr.vmem [resolvable:$true] %s29_s14 }
   0x2   :  { %s9411_s15 = scalar_lea.vmem %s30_s14, 2048  ;;  %p9416_p1 = scmp.lt.s32.totalorder %s30_s14, %s30_s14 }
   0x3   :  { %p9412_p0 = scmp.ne.s32.totalorder %s30_s14, %s9411_s15  ;;  %p9417_p2 = scmp.lt.s32.totalorder %s9411_s15, %s9411_s15 }
   0x5   :  { %p9418_p3 = por %p9417_p2, %p9416_p1 }
   0x7   :  { %p9419_p4 = pnand %p9418_p3, %p9412_p0 }
   0x9   :  { %9422 = shalt.err (!%p9419_p4)
}
   0xa   :  { %s9426_s16 = smov 256   ;;  %s9427_s17 = smov 16  }
   0xb   :  { %35 = dma.hbm_to_vmem [thread:$0]  %s12314_s4, 2048, %s30_s14, [#allocation3], %s9426_s16, %s9426_s16, %s9427_s17  }
   0xc   :  { %9423 = dma.done.wait [#allocation3], 2048  }
   0xd   :  { %9424 = vsyncadd [#allocation3], 4294965248  ;;  %v84_v0 = vld [vmem:[%s12311_s1 + $0xf8] sm:$0xff]  ;;  %v83_v1 = vld [vmem:[%s12311_s1 + $0xf0] sm:$0xff]  ;;  %vm105_vm0 = vcmask 261120   ;;  %vm1162_vm1 = vcmask 523264  }
   0xe   :  { %v82_v2 = vld [vmem:[%s12311_s1 + $0xe8] sm:$0xff]  ;;  %v9499_v3 = vand.u32 4294901760, %v84_v0  ;;  %v9501_v4 = vand.u32 4294901760, %v83_v1  ;;  %v81_v6 = vld [vmem:[%s12311_s1 + $0xe0] sm:$0xff]  ;;  %v80_v7 = vld [vmem:[%s12311_s1 + $0xd8] sm:$0xff]  ;;  %vm6683_vm2 = vcmask 1040384  }
   0xf   :  { %v9503_v5 = vand.u32 4294901760, %v82_v2  ;;  %v79_v8 = vld [vmem:[%s12311_s1 + $0xd0] sm:$0xff]  ;;  %v9514_v9 = vand.u32 4294901760, %v81_v6  ;;  %v9516_v10 = vand.u32 4294901760, %v80_v7  ;;  %v78_v12 = vld [vmem:[%s12311_s1 + $0xc8] sm:$0xff]  ;;  %v77_v13 = vld [vmem:[%s12311_s1 + $0xc0] sm:$0xff] }
  0x10   :  { %v9518_v11 = vand.u32 4294901760, %v79_v8  ;;  %v76_v14 = vld [vmem:[%s12311_s1 + $0xb8] sm:$0xff]  ;;  %113 = vmatprep.subr.mxu0 %v9499_v3  ;;  %v9530_v15 = vand.u32 4294901760, %v78_v12  ;;  %v9532_v16 = vand.u32 4294901760, %v77_v13  ;;  %v9537_v18 = vsub.f32 %v84_v0, %v9499_v3  ;;  %v9542_v19 = vld [vmem:[%s12311_s1 + $0xb0] sm:$0xff]  ;;  %v9547_v20 = vld [vmem:[%s12311_s1 + $0xa8] sm:$0xff] }
  0x11   :  { %v9534_v17 = vand.u32 4294901760, %v76_v14  ;;  %v9552_v21 = vld [vmem:[%s12311_s1 + $0xa0] sm:$0xff]  ;;  %115 = vmatpush1.msra.mxu0 %v9501_v4  ;;  %v9556_v22 = vand.u32 4294901760, %v9542_v19  ;;  %v9559_v23 = vsub.f32 %v83_v1, %v9501_v4  ;;  %v9562_v24 = vand.u32 4294901760, %v9547_v20  ;;  %v9570_v26 = vld [vmem:[%s12311_s1 + $0x98] sm:$0xff]  ;;  %v9575_v27 = vld [vmem:[%s12311_s1 + $0x90] sm:$0xff] }
  0x12   :  { %v9565_v25 = vsub.f32 %v82_v2, %v9503_v5  ;;  %v9580_v28 = vld [vmem:[%s12311_s1 + $0x88] sm:$0xff]  ;;  %117 = vmatprep.subr.mxu0 %v9503_v5  ;;  %v12334_v29 = vand.u32 4294901760, %v9537_v18  ;;  %v9585_v30 = vand.u32 4294901760, %v9552_v21  ;;  %v9588_v31 = vsub.f32 %v81_v6, %v9514_v9  ;;  %v9605_v37 = vld [vmem:[%s12311_s1 + $0x80] sm:$0xff]  ;;  %v9632_v46 = vld [vmem:[%s12311_s1 + $0x78] sm:$0xff] }
  0x13   :  { %v9591_v32 = vand.u32 4294901760, %v9570_v26  ;;  %119 = vmatpush1.msra.mxu0 %v9514_v9  ;;  %v12333_v33 = vand.u32 4294901760, %v9559_v23  ;;  %v9597_v35 = vsub.f32 %v80_v7, %v9516_v10  ;;  %v9600_v36 = vand.u32 4294901760, %v9575_v27  ;;  %v9645_v51 = vld [vmem:[%s12311_s1 + $0x70] sm:$0xff]  ;;  %v9655_v56 = vld [vmem:[%s12311_s1 + $0x68] sm:$0xff]  ;;  %v9670_v61 = vld [vmem:[%s12311_s1 + $0x60] sm:$0xff] }
  0x14   :  { %12551 = vst [vmem:[#allocation5_spill] sm:$0xff] %v9585_v30  ;;  %v12331_v34 = vand.u32 4294901760, %v9565_v25  ;;  %121 = vmatprep.subr.mxu0 %v9516_v10  ;;  %v252_v38 = vsub.f32 %v9537_v18, %v12334_v29  ;;  %v12330_v39 = vand.u32 4294901760, %v9588_v31  ;;  %v9613_v40 = vsub.f32 %v79_v8, %v9518_v11  ;;  %v9685_v2 = vld [vmem:[%s12311_s1 + $0x58] sm:$0xff] }
  0x15   :  { %12552 = vst [vmem:[#allocation6_spill] sm:$0xff] %v9591_v32  ;;  %12553 = vst [vmem:[#allocation7_spill] sm:$0xff] %v9600_v36  ;;  %v9616_v41 = vand.u32 4294901760, %v9580_v28  ;;  %123 = vmatpush1.msra.mxu0 %v9518_v11  ;;  %v258_v42 = vsub.f32 %v9559_v23, %v12333_v33  ;;  %v12328_v44 = vand.u32 4294901760, %v9597_v35  ;;  %v9627_v45 = vsub.f32 %v78_v12, %v9530_v15  ;;  %v9821_v33 = vld [vmem:[%s12311_s1 + $0x18] sm:$0xff] }
  0x16   :  { %v264_v43 = vsub.f32 %v9565_v25, %v12331_v34  ;;  %125 = vmatprep.subr.mxu0 %v9530_v15  ;;  %v253_v47 = vand.u32 4294901760, %v252_v38  ;;  %v270_v48 = vsub.f32 %v9588_v31, %v12330_v39  ;;  %v12326_v49 = vand.u32 4294901760, %v9613_v40 }
  0x17   :  { %12554 = vst [vmem:[#allocation8_spill] sm:$0xff] %v9616_v41  ;;  %v9640_v50 = vand.u32 4294901760, %v9605_v37  ;;  %127 = vmatpush1.msra.mxu0 %v9532_v16  ;;  %v259_v52 = vand.u32 4294901760, %v258_v42  ;;  %v276_v54 = vsub.f32 %v9597_v35, %v12328_v44  ;;  %v12325_v55 = vand.u32 4294901760, %v9627_v45  ;;  %v9794_v44 = vld [vmem:[%s12311_s1 + $0x28] sm:$0xff] }
  0x18   :  { %v265_v53 = vand.u32 4294901760, %v264_v43  ;;  %129 = vmatprep.subr.mxu0 %v9534_v17  ;;  %254 = vmatprep.subr.mxu1 %v253_v47  ;;  %v271_v57 = vand.u32 4294901760, %v270_v48  ;;  %v282_v58 = vsub.f32 %v9613_v40, %v12326_v49  ;;  %v9662_v59 = vsub.f32 %v77_v13, %v9532_v16  ;;  %v9699_v13 = vld [vmem:[%s12311_s1 + $0x50] sm:$0xff] }
  0x19   :  { %12555 = vst [vmem:[#allocation9_spill] sm:$0xff] %v9640_v50  ;;  %v9665_v60 = vand.u32 4294901760, %v9632_v46  ;;  %131 = vmatpush1.msra.mxu0 %v9556_v22  ;;  %260 = vmatpush1.msra.mxu1 %v259_v52  ;;  %v277_v62 = vand.u32 4294901760, %v276_v54  ;;  %v288_v63 = vsub.f32 %v9627_v45, %v12325_v55  ;;  %v9677_v0 = vsub.f32 %v76_v14, %v9534_v17  ;;  %v9778_v49 = vld [vmem:[%s12311_s1 + $0x30] sm:$0xff] }
  0x1a   :  { %v9680_v1 = vand.u32 4294901760, %v9645_v51  ;;  %133 = vmatprep.subr.mxu0 %v9562_v24  ;;  %266 = vmatprep.subr.mxu1 %v265_v53  ;;  %v283_v6 = vand.u32 4294901760, %v282_v58  ;;  %v12323_v7 = vand.u32 4294901760, %v9662_v59  ;;  %v9691_v8 = vsub.f32 %v9542_v19, %v9556_v22 }
  0x1b   :  { %12556 = vst [vmem:[#allocation10_spill] sm:$0xff] %v9665_v60  ;;  %v9694_v12 = vand.u32 4294901760, %v9655_v56  ;;  %135 = vmatpush1.msra.mxu0 %v9585_v30  ;;  %272 = vmatpush1.msra.mxu1 %v271_v57  ;;  %v289_v14 = vand.u32 4294901760, %v288_v63  ;;  %v12321_v38 = vand.u32 4294901760, %v9677_v0  ;;  %v9705_v42 = vsub.f32 %v9547_v20, %v9562_v24  ;;  %v9725_v20 = vld [vmem:[%s12311_s1 + $0x48] sm:$0xff] }
  0x1c   :  { %12557 = vst [vmem:[#allocation11_spill] sm:$0xff] %v9680_v1  ;;  %v9708_v19 = vand.u32 4294901760, %v9670_v61  ;;  %137 = vmatprep.subr.mxu0 %v9591_v32  ;;  %278 = vmatprep.subr.mxu1 %v277_v62  ;;  %v294_v43 = vsub.f32 %v9662_v59, %v12323_v7  ;;  %v12322_v47 = vand.u32 4294901760, %v9691_v8  ;;  %v9717_v48 = vsub.f32 %v9552_v21, %v9585_v30 }
  0x1d   :  { %12558 = vst [vmem:[#allocation12_spill] sm:$0xff] %v9694_v12  ;;  %v9720_v52 = vand.u32 4294901760, %v9685_v2  ;;  %139 = vmatpush1.msra.mxu0 %v9600_v36  ;;  %284 = vmatpush1.msra.mxu1 %v283_v6  ;;  %v300_v53 = vsub.f32 %v9677_v0, %v12321_v38  ;;  %v12324_v54 = vand.u32 4294901760, %v9705_v42  ;;  %v9734_v21 = vsub.f32 %v9570_v26, %v9591_v32  ;;  %v9751_v26 = vld [vmem:[%s12311_s1 + $0x40] sm:$0xff] }
  0x1e   :  { %12559 = vst [vmem:[#allocation13_spill] sm:$0xff] %v9708_v19  ;;  %v9737_v57 = vand.u32 4294901760, %v9699_v13  ;;  %141 = vmatprep.subr.mxu0 %v9616_v41  ;;  %290 = vmatprep.subr.mxu1 %v289_v14  ;;  %v295_v58 = vand.u32 4294901760, %v294_v43  ;;  %v306_v62 = vsub.f32 %v9691_v8, %v12322_v47  ;;  %v12327_v63 = vand.u32 4294901760, %v9717_v48 }
  0x1f   :  { %12560 = vst [vmem:[#allocation14_spill] sm:$0xff] %v9720_v52  ;;  %v9746_v6 = vsub.f32 %v9575_v27, %v9600_v36  ;;  %143 = vmatpush1.msra.mxu0 %v9640_v50  ;;  %v301_v38 = vand.u32 4294901760, %v300_v53  ;;  %v312_v14 = vsub.f32 %v9705_v42, %v12324_v54  ;;  %v12329_v43 = vand.u32 4294901760, %v9734_v21  ;;  %v9764_v27 = vld [vmem:[%s12311_s1 + $0x38] sm:$0xff]  ;;  %v9932_v36 = vld [vmem:[%s12311_s1 + $0x128] sm:$0xff] }
  0x20   :  { %12561 = vst [vmem:[#allocation15_spill] sm:$0xff] %v9737_v57  ;;  %v9759_v47 = vand.u32 4294901760, %v9725_v20  ;;  %296 = vmatpush1.msra.mxu1 %v295_v58  ;;  %145 = vmatprep.subr.mxu0 %v9665_v60  ;;  %v307_v7 = vand.u32 4294901760, %v306_v62  ;;  %v318_v53 = vsub.f32 %v9717_v48, %v12327_v63  ;;  %v9773_v55 = vsub.f32 %v9580_v28, %v9616_v41  ;;  %v9916_v41 = vld [vmem:[%s12311_s1 + $0x130] sm:$0xff] }
  0x21   :  { %v12332_v54 = vand.u32 4294901760, %v9746_v6  ;;  %302 = vmatprep.subr.mxu1 %v301_v38  ;;  %147 = vmatpush1.msra.mxu0 %v9680_v1  ;;  %v313_v58 = vand.u32 4294901760, %v312_v14  ;;  %v324_v62 = vsub.f32 %v9734_v21, %v12329_v43  ;;  %v9785_v63 = vand.u32 4294901760, %v9751_v26 }
  0x22   :  { %12562 = vst [vmem:[#allocation16_spill] sm:$0xff] %v9759_v47  ;;  %v9789_v28 = vsub.f32 %v9605_v37, %v9640_v50  ;;  %308 = vmatpush1.msra.mxu1 %v307_v7  ;;  %149 = vmatprep.subr.mxu0 %v9694_v12  ;;  %v319_v38 = vand.u32 4294901760, %v318_v53  ;;  %v12337_v43 = vand.u32 4294901760, %v9773_v55  ;;  %v9802_v39 = vand.u32 4294901760, %v9764_v27  ;;  %v9807_v37 = vld [vmem:[%s12311_s1 + $0x20] sm:$0xff] }
  0x23   :  { %12563 = vst [vmem:[#allocation17_spill] sm:$0xff] %v9785_v63  ;;  %v330_v14 = vsub.f32 %v9746_v6, %v12332_v54  ;;  %314 = vmatprep.subr.mxu1 %v313_v58  ;;  %151 = vmatpush1.msra.mxu0 %v9708_v19  ;;  %v325_v7 = vand.u32 4294901760, %v324_v62  ;;  %v9813_v34 = vsub.f32 %v9632_v46, %v9665_v60  ;;  %v9816_v54 = vand.u32 4294901760, %v9778_v49 }
  0x24   :  { %12564 = vst [vmem:[#allocation18_spill] sm:$0xff] %v9802_v39  ;;  %v12338_v53 = vand.u32 4294901760, %v9789_v28  ;;  %320 = vmatpush1.msra.mxu1 %v319_v38  ;;  %153 = vmatprep.subr.mxu0 %v9720_v52  ;;  %v336_v62 = vsub.f32 %v9773_v55, %v12337_v43  ;;  %v9829_v46 = vsub.f32 %v9645_v51, %v9680_v1  ;;  %v9832_v29 = vand.u32 4294901760, %v9794_v44  ;;  %v9849_v51 = vld [vmem:[%s12311_s1 + $0x10] sm:$0xff] }
  0x25   :  { %12565 = vst [vmem:[#allocation19_spill] sm:$0xff] %v9816_v54  ;;  %v331_v58 = vand.u32 4294901760, %v330_v14  ;;  %326 = vmatprep.subr.mxu1 %v325_v7  ;;  %155 = vmatpush1.msra.mxu0 %v9737_v57  ;;  %v9841_v60 = vsub.f32 %v9655_v56, %v9694_v12  ;;  %v9844_v43 = vand.u32 4294901760, %v9807_v37  ;;  %v9855_v14 = vsub.f32 %v9670_v61, %v9708_v19  ;;  %v9863_v12 = vld [vmem:[%s12311_s1 + $0x8] sm:$0xff] }
  0x26   :  { %12566 = vst [vmem:[#allocation20_spill] sm:$0xff] %v9832_v29  ;;  %v342_v38 = vsub.f32 %v9789_v28, %v12338_v53  ;;  %157 = vmatprep.subr.mxu0 %v9759_v47  ;;  %v337_v7 = vand.u32 4294901760, %v336_v62  ;;  %v9858_v56 = vand.u32 4294901760, %v9821_v33  ;;  %v12570_v1 = vand.u32 4294901760, %v9813_v34 }
  0x27   :  { %12567 = vst [vmem:[#allocation21_spill] sm:$0xff] %v9844_v43  ;;  %332 = vmatpush1.msra.mxu1 %v331_v58  ;;  %12568 = vst [vmem:[#allocation22_spill] sm:$0xff] %v9855_v14  ;;  %159 = vmatpush1.msra.mxu0 %v9785_v63  ;;  %v12355_v53 = vand.u32 4294901760, %v9841_v60  ;;  %v9872_v61 = vsub.f32 %v9685_v2, %v9720_v52  ;;  %v12572_v19 = vand.u32 4294901760, %v9829_v46  ;;  %v9889_v2 = vld [vmem:[%s12311_s1] sm:$0xff]  ;;  %v9897_v52 = vand.u32 4294901760, %v9863_v12 }
  0x28   :  { %12569 = vst [vmem:[#allocation23_spill] sm:$0xff] %v9858_v56  ;;  %v343_v58 = vand.u32 4294901760, %v342_v38  ;;  %v348_v62 = vsub.f32 %v9813_v34, %v12570_v1  ;;  %338 = vmatprep.subr.mxu1 %v337_v7  ;;  %161 = vmatprep.subr.mxu0 %v9802_v39  ;;  %v9880_v38 = vand.u32 4294901760, %v9849_v51  ;;  %v9884_v1 = vsub.f32 %v9699_v13, %v9737_v57  ;;  %v9902_v13 = vld [vmem:[%s12311_s1 + $0x138] sm:$0xff] }
  0x29   :  { %12571 = vst [vmem:[#allocation24_spill] sm:$0xff] %v9872_v61  ;;  %v354_v50 = vsub.f32 %v9829_v46, %v12572_v19  ;;  %163 = vmatpush1.msra.mxu0 %v9816_v54  ;;  %v360_v19 = vsub.f32 %v9841_v60, %v12355_v53  ;;  %12575 = vst [vmem:[#allocation27_spill] sm:$0xff] %v9897_v52  ;;  %v9911_v53 = vsub.f32 %v9725_v20, %v9759_v47  ;;  %v9959_v47 = vld [vmem:[%s12311_s1 + $0x118] sm:$0xff]  ;;  %vm6685_vm3 = vcmask 1041408  }
  0x2a   :  { %12573 = vst [vmem:[#allocation25_spill] sm:$0xff] %v9880_v38  ;;  %12574 = vst [vmem:[#allocation26_spill] sm:$0xff] %v9884_v1  ;;  %344 = vmatpush1.msra.mxu1 %v343_v58  ;;  %v349_v7 = vand.u32 4294901760, %v348_v62  ;;  %165 = vmatprep.subr.mxu0 %v9832_v29  ;;  %v12576_v58 = vand.u32 4294901760, %v9855_v14  ;;  %v9927_v20 = vsub.f32 %v9751_v26, %v9785_v63  ;;  %v9945_v26 = vld [vmem:[%s12311_s1 + $0x120] sm:$0xff]  ;;  %vm6687_vm4 = vcmask 1042432  }
  0x2b   :  { %v355_v57 = vand.u32 4294901760, %v354_v50  ;;  %12577 = vst [vmem:[#allocation28_spill] sm:$0xff] %v9911_v53  ;;  %v361_v32 = vand.u32 4294901760, %v360_v19  ;;  %167 = vmatpush1.msra.mxu0 %v9844_v43  ;;  %v12578_v50 = vand.u32 4294901760, %v9872_v61  ;;  %v12581_v19 = vand.u32 4294901760, %v9884_v1 }
  0x2c   :  { %v366_v62 = vsub.f32 %v9855_v14, %v12576_v58  ;;  %350 = vmatprep.subr.mxu1 %v349_v7  ;;  %v9923_v58 = vand.u32 4294901760, %v9889_v2  ;;  %12580 = vst [vmem:[#allocation30_spill] sm:$0xff] %v9927_v20  ;;  %169 = vmatprep.subr.mxu0 %v9858_v56  ;;  %v9979_v14 = vsub.f32 %v9794_v44, %v9832_v29  ;;  %v9996_v44 = vand.u32 4294901760, %v9959_v47  ;;  %v10001_v29 = vld [vmem:[%s12311_s1 + $0x108] sm:$0xff] }
  0x2d   :  { %v372_v30 = vsub.f32 %v9872_v61, %v12578_v50  ;;  %356 = vmatpush1.msra.mxu1 %v355_v57  ;;  %v378_v50 = vsub.f32 %v9884_v1, %v12581_v19  ;;  %v9940_v61 = vand.u32 4294901760, %v9902_v13  ;;  %171 = vmatpush1.msra.mxu0 %v9880_v38  ;;  %v9954_v19 = vand.u32 4294901760, %v9916_v41 }
  0x2e   :  { %12579 = vst [vmem:[#allocation29_spill] sm:$0xff] %v9923_v58  ;;  %v367_v7 = vand.u32 4294901760, %v366_v62  ;;  %362 = vmatprep.subr.mxu1 %v361_v32  ;;  %v9951_v62 = vsub.f32 %v9764_v27, %v9802_v39  ;;  %173 = vmatprep.subr.mxu0 %v9897_v52  ;;  %v9967_v27 = vsub.f32 %v9778_v49, %v9816_v54  ;;  %v9970_v57 = vand.u32 4294901760, %v9932_v36  ;;  %v9987_v49 = vld [vmem:[%s12311_s1 + $0x110] sm:$0xff] }
  0x2f   :  { %12582 = vst [vmem:[#allocation31_spill] sm:$0xff] %v9940_v61  ;;  %v373_v63 = vand.u32 4294901760, %v372_v30  ;;  %12584 = vst [vmem:[#allocation33_spill] sm:$0xff] %v9954_v19  ;;  %v379_v1 = vand.u32 4294901760, %v378_v50  ;;  %v12585_v30 = vand.u32 4294901760, %v9911_v53  ;;  %175 = vmatpush1.msra.mxu0 %v9923_v58  ;;  %v12588_v39 = vand.u32 4294901760, %v9927_v20 }
  0x30   :  { %12583 = vst [vmem:[#allocation32_spill] sm:$0xff] %v9951_v62  ;;  %368 = vmatpush1.msra.mxu1 %v367_v7  ;;  %12586 = vst [vmem:[#allocation34_spill] sm:$0xff] %v9967_v27  ;;  %201 = vmatprep.subr.mxu0 %v9940_v61  ;;  %v9993_v50 = vsub.f32 %v9807_v37, %v9844_v43  ;;  %v10010_v37 = vsub.f32 %v9821_v33, %v9858_v56  ;;  %v12595_v43 = vand.u32 4294901760, %v9967_v27  ;;  %v10027_v33 = vld [vmem:[%s12311_s1 + $0x100] sm:$0xff]  ;;  %vm6689_vm5 = vcmask 1043456  }
  0x31   :  { %v384_v32 = vsub.f32 %v9911_v53, %v12585_v30  ;;  %12587 = vst [vmem:[#allocation35_spill] sm:$0xff] %v9970_v57  ;;  %374 = vmatprep.subr.mxu1 %v373_v63  ;;  %v390_v7 = vsub.f32 %v9927_v20, %v12588_v39  ;;  %12589 = vst [vmem:[#allocation36_spill] sm:$0xff] %v9979_v14  ;;  %v9982_v30 = vand.u32 4294901760, %v9945_v26  ;;  %203 = vmatpush2.msra.mxu0 %v9954_v19  ;;  %vm6691_vm6 = vcmask 1044480  }
  0x32   :  { %380 = vmatpush1.msra.mxu1 %v379_v1  ;;  %12591 = vst [vmem:[#allocation38_spill] sm:$0xff] %v9993_v50  ;;  %12592 = vst [vmem:[#allocation39_spill] sm:$0xff] %v9996_v44  ;;  %v12593_v1 = vand.u32 4294901760, %v9951_v62  ;;  %v12388_v39 = vand.u32 4294901760, %v9979_v14  ;;  %v402_v20 = vsub.f32 %v9967_v27, %v12595_v43  ;;  %205 = vmatprep.subr.mxu0 %v9970_v57  ;;  %v10018_v53 = vand.u32 4294901760, %v9987_v49 }
  0x33   :  { %12590 = vst [vmem:[#allocation37_spill] sm:$0xff] %v9982_v30  ;;  %v385_v63 = vand.u32 4294901760, %v384_v32  ;;  %v391_v54 = vand.u32 4294901760, %v390_v7  ;;  %12594 = vst [vmem:[#allocation40_spill] sm:$0xff] %v10010_v37  ;;  %207 = vmatpush2.msra.mxu0 %v9982_v30  ;;  %v10035_v56 = vand.u32 4294901760, %v10001_v29  ;;  %v12597_v27 = vand.u32 4294901760, %v9993_v50 }
  0x34   :  { %v396_v32 = vsub.f32 %v9951_v62, %v12593_v1  ;;  %12596 = vst [vmem:[#allocation41_spill] sm:$0xff] %v10018_v53  ;;  %v10022_v1 = vsub.f32 %v9849_v51, %v9880_v38  ;;  %v408_v43 = vsub.f32 %v9979_v14, %v12388_v39  ;;  %v50_v51 = vld [vmem:[%s12310_s0 + $0x8] sm:$0xff]  ;;  %v403_v38 = vand.u32 4294901760, %v402_v20  ;;  %209 = vmatprep.subr.mxu0 %v9996_v44 }
  0x35   :  { %386 = vmatprep.subr.mxu1 %v385_v63  ;;  %v10047_v39 = vsub.f32 %v9863_v12, %v9897_v52  ;;  %v12598_v14 = vand.u32 4294901760, %v10010_v37  ;;  %211 = vmatpush2.msra.mxu0 %v10018_v53  ;;  %v10054_v20 = vand.u32 4294901760, %v10027_v33  ;;  %v49_v12 = vld [vmem:[%s12310_s0] sm:$0xff]  ;;  %v107_v52 = vsel %vm105_vm0, %v50_v51, 0 }
  0x36   :  { %392 = vmatpush1.msra.mxu1 %v391_v54  ;;  %v397_v63 = vand.u32 4294901760, %v396_v32  ;;  %v414_v54 = vsub.f32 %v9993_v50, %v12597_v27  ;;  %v12399_v32 = vand.u32 4294901760, %v10022_v1  ;;  %v409_v7 = vand.u32 4294901760, %v408_v43  ;;  %213 = vmatprep.subr.mxu0 %v10035_v56 }
  0x37   :  { %v420_v62 = vsub.f32 %v10010_v37, %v12598_v14  ;;  %v10058_v27 = vsub.f32 %v9889_v2, %v9923_v58  ;;  %v12400_v14 = vand.u32 4294901760, %v10047_v39  ;;  %215 = vmatpush2.msra.mxu0 %v10054_v20  ;;  %v10071_v58 = vand.u32 4294901760, %v107_v52 }
  0x38   :  { %398 = vmatprep.subr.mxu1 %v397_v63  ;;  %v415_v63 = vand.u32 4294901760, %v414_v54  ;;  %v426_v43 = vsub.f32 %v10022_v1, %v12399_v32  ;;  %532 = vmatprep.subr.mxu0 %v9537_v18  ;;  %vm6693_vm7 = vcmask 1045504   ;;  %vm6695_vm8 = vcmask 1046528  }
  0x39   :  { %12599 = vst [vmem:[#allocation42_spill] sm:$0xff] %v10058_v27  ;;  %404 = vmatpush1.msra.mxu1 %v403_v38  ;;  %v421_v37 = vand.u32 4294901760, %v420_v62  ;;  %v12401_v2 = vand.u32 4294901760, %v10058_v27  ;;  %12600 = vst [vmem:[#allocation43_spill] sm:$0xff] %v10071_v58  ;;  %v10075_v38 = vsub.f32 %v9902_v13, %v9940_v61  ;;  %v432_v32 = vsub.f32 %v10047_v39, %v12400_v14 }
  0x3a   :  { %410 = vmatprep.subr.mxu1 %v409_v7  ;;  %v427_v54 = vand.u32 4294901760, %v426_v43  ;;  %v10081_v7 = vand.u32 4294901760, %v49_v12  ;;  %v10085_v62 = vsub.f32 %v9916_v41, %v9954_v19  ;;  %v10091_v51 = vsub.f32 %v107_v52, %v10071_v58  ;;  %514 = vmatprep.mubr.f32.mxu1 %v10071_v58 }
  0x3b   :  { %416 = vmatpush1.msra.mxu1 %v415_v63  ;;  %v438_v13 = vsub.f32 %v10058_v27, %v12401_v2  ;;  %v10096_v43 = vsub.f32 %v9932_v36, %v9970_v57  ;;  %v433_v14 = vand.u32 4294901760, %v432_v32  ;;  %v10105_v2 = vsub.f32 %v9945_v26, %v9982_v30 }
  0x3c   :  { %12601 = vst [vmem:[#allocation44_spill] sm:$0xff] %v10081_v7  ;;  %422 = vmatprep.subr.mxu1 %v421_v37  ;;  %v10100_v41 = vsub.f32 %v49_v12, %v10081_v7  ;;  %v12406_v37 = vand.u32 4294901760, %v10085_v62  ;;  %v12409_v63 = vand.u32 4294901760, %v10091_v51  ;;  %v12602_v19 = vand.u32 4294901760, %v10075_v38 }
  0x3d   :  { %428 = vmatpush1.msra.mxu1 %v427_v54  ;;  %v439_v52 = vand.u32 4294901760, %v438_v13  ;;  %v12412_v58 = vand.u32 4294901760, %v10096_v43  ;;  %v10119_v26 = vsub.f32 %v9959_v47, %v9996_v44  ;;  %v10129_v32 = vsub.f32 %v9987_v49, %v10018_v53 }
  0x3e   :  { %v468_v36 = vsub.f32 %v10075_v38, %v12602_v19  ;;  %434 = vmatprep.subr.mxu1 %v433_v14  ;;  %v474_v12 = vsub.f32 %v10085_v62, %v12406_v37  ;;  %v219_v19 = vsub.f32 %v10091_v51, %v12409_v63  ;;  %v12604_v37 = vand.u32 4294901760, %v10100_v41 }
  0x3f   :  { %440 = vmatpush1.msra.mxu1 %v439_v52  ;;  %v480_v14 = vsub.f32 %v10096_v43, %v12412_v58  ;;  %12603 = vst [vmem:[#allocation45_spill] sm:$0xff] %v10129_v32  ;;  %v12605_v52 = vand.u32 4294901760, %v10105_v2  ;;  %v12420_v63 = vand.u32 4294901760, %v10119_v26  ;;  %v12419_v58 = vand.u32 4294901760, %v10129_v32 }
  0x40   :  { %v469_v13 = vand.u32 4294901760, %v468_v36  ;;  %v225_v54 = vsub.f32 %v10100_v41, %v12604_v37  ;;  %v475_v47 = vand.u32 4294901760, %v474_v12  ;;  %v220_v36 = vand.u32 4294901760, %v219_v19 }
  0x41   :  { %v486_v44 = vsub.f32 %v10105_v2, %v12605_v52  ;;  %v481_v30 = vand.u32 4294901760, %v480_v14  ;;  %v10141_v49 = vsub.f32 %v10001_v29, %v10035_v56  ;;  %v492_v37 = vsub.f32 %v10119_v26, %v12420_v63  ;;  %v52_v14 = vld [vmem:[%s12310_s0 + $0x18] sm:$0xff]  ;;  %v51_v52 = vld [vmem:[%s12310_s0 + $0x10] sm:$0xff]  ;;  %v12616_v63 = vld [vmem:[#allocation9_spill] sm:$0xff] }
  0x42   :  { %470 = vmatprep.subr.mxu1 %v469_v13  ;;  %v226_v53 = vand.u32 4294901760, %v225_v54  ;;  %v10148_v12 = vsub.f32 %v10027_v33, %v10054_v20  ;;  %221 = vmatprep.mubr.f32.mxu0 %v220_v36  ;;  %v498_v19 = vsub.f32 %v10129_v32, %v12419_v58  ;;  %v12615_v58 = vld [vmem:[#allocation30_spill] sm:$0xff]  ;;  %vm9431_vm9 = vmmov 0  }
  0x43   :  { %476 = vmatpush2.msra.mxu1 %v475_v47  ;;  %v487_v57 = vand.u32 4294901760, %v486_v44  ;;  %v12418_v29 = vand.u32 4294901760, %v10141_v49  ;;  %v493_v54 = vand.u32 4294901760, %v492_v37  ;;  %v110_v47 = vsel %vm105_vm0, %v52_v14, 0  ;;  %v12612_v14 = vld [vmem:[#allocation7_spill] sm:$0xff] }
  0x44   :  { %12606 = vst [vmem:[#allocation46_spill] sm:$0xff] %v10148_v12  ;;  %482 = vmatprep.subr.mxu1 %v481_v30  ;;  %227 = vmatmul.mubr.f32.vlgmr.msra.gmra.mxu0 %v226_v53  ;;  %v12417_v44 = vand.u32 4294901760, %v10148_v12  ;;  %v499_v13 = vand.u32 4294901760, %v498_v19  ;;  %v10192_v36 = vand.u32 4294901760, %v110_v47  ;;  %v10196_v37 = vand.u32 4294901760, %v51_v52  ;;  %v12607_v19 = vld [vmem:[#allocation22_spill] sm:$0xff] }
  0x45   :  { %488 = vmatpush2.msra.mxu1 %v487_v57  ;;  %535 = vmatpush1.msra.mxu0 %v9559_v23  ;;  %v504_v33 = vsub.f32 %v10141_v49, %v12418_v29  ;;  %v12614_v29 = vld [vmem:[#allocation8_spill] sm:$0xff] }
  0x46   :  { %538 = vmatprep.subr.mxu0 %v9565_v25  ;;  %494 = vmatprep.subr.mxu1 %v493_v54  ;;  %v510_v30 = vsub.f32 %v10148_v12, %v12417_v44  ;;  %v12608_v54 = vld [vmem:[#allocation5_spill] sm:$0xff]  ;;  %v12613_v44 = vld [vmem:[#allocation28_spill] sm:$0xff] }
  0x47   :  { %541 = vmatpush1.msra.mxu0 %v9588_v31  ;;  %500 = vmatpush2.msra.mxu1 %v499_v13  ;;  %v505_v53 = vand.u32 4294901760, %v504_v33  ;;  %v10205_v13 = vsub.f32 %v110_v47, %v10192_v36  ;;  %v12609_v33 = vld [vmem:[#allocation24_spill] sm:$0xff] }
  0x48   :  { %544 = vmatprep.subr.mxu0 %v9597_v35  ;;  %v511_v57 = vand.u32 4294901760, %v510_v30  ;;  %v12610_v30 = vld [vmem:[#allocation6_spill] sm:$0xff] }
  0x49   :  { %547 = vmatpush1.msra.mxu0 %v9613_v40  ;;  %506 = vmatprep.subr.mxu1 %v505_v53  ;;  %v10210_v53 = vsub.f32 %v51_v52, %v10196_v37  ;;  %v12424_v47 = vand.u32 4294901760, %v10205_v13 }
  0x4a   :  { %550 = vmatprep.subr.mxu0 %v9627_v45  ;;  %512 = vmatpush2.msra.mxu1 %v511_v57  ;;  %v12611_v57 = vld [vmem:[#allocation26_spill] sm:$0xff] }
  0x4b   :  { %553 = vmatpush1.msra.mxu0 %v9662_v59  ;;  %516 = vmatmul.mubr.f32.vlgmr.msra.gmra.mxu1 %v10081_v7  ;;  %v12617_v7 = vld [vmem:[#allocation32_spill] sm:$0xff]  ;;  %v12425_v52 = vand.u32 4294901760, %v10210_v53 }
  0x4c   :  { %556 = vmatprep.subr.mxu0 %v9677_v0  ;;  %696 = vmatprep.subr.mxu1 %v9499_v3 }
  0x4d   :  { %559 = vmatpush1.msra.mxu0 %v9691_v8  ;;  %698 = vmatpush1.msra.mxu1 %v9501_v4 }
  0x4e   :  { %562 = vmatprep.subr.mxu0 %v9705_v42  ;;  %700 = vmatprep.subr.mxu1 %v9503_v5 }
  0x4f   :  { %565 = vmatpush1.msra.mxu0 %v9717_v48  ;;  %702 = vmatpush1.msra.mxu1 %v9514_v9 }
  0x50   :  { %568 = vmatprep.subr.mxu0 %v9734_v21  ;;  %704 = vmatprep.subr.mxu1 %v9516_v10 }
  0x51   :  { %571 = vmatpush1.msra.mxu0 %v9746_v6  ;;  %706 = vmatpush1.msra.mxu1 %v9518_v11 }
  0x52   :  { %574 = vmatprep.subr.mxu0 %v9773_v55  ;;  %708 = vmatprep.subr.mxu1 %v9530_v15 }
  0x53   :  { %577 = vmatpush1.msra.mxu0 %v9789_v28  ;;  %710 = vmatpush1.msra.mxu1 %v9532_v16 }
  0x54   :  { %580 = vmatprep.subr.mxu0 %v9813_v34  ;;  %712 = vmatprep.subr.mxu1 %v9534_v17 }
  0x55   :  { %583 = vmatpush1.msra.mxu0 %v9829_v46  ;;  %714 = vmatpush1.msra.mxu1 %v9556_v22 }
  0x56   :  { %586 = vmatprep.subr.mxu0 %v9841_v60  ;;  %716 = vmatprep.subr.mxu1 %v9562_v24 }
  0x57   :  { %589 = vmatpush1.msra.mxu0 %v12607_v19  ;;  %718 = vmatpush1.msra.mxu1 %v12608_v54 }
  0x58   :  { %592 = vmatprep.subr.mxu0 %v12609_v33  ;;  %720 = vmatprep.subr.mxu1 %v12610_v30  ;;  %v12618_v30 = vld [vmem:[#allocation10_spill] sm:$0xff] }
  0x59   :  { %595 = vmatpush1.msra.mxu0 %v12611_v57  ;;  %722 = vmatpush1.msra.mxu1 %v12612_v14  ;;  %v12619_v33 = vld [vmem:[#allocation34_spill] sm:$0xff]  ;;  %v12620_v57 = vld [vmem:[#allocation11_spill] sm:$0xff]  ;;  %v12621_v14 = vld [vmem:[#allocation36_spill] sm:$0xff] }
  0x5a   :  { %598 = vmatprep.subr.mxu0 %v12613_v44  ;;  %724 = vmatprep.subr.mxu1 %v12614_v29  ;;  %v12622_v44 = vld [vmem:[#allocation12_spill] sm:$0xff] }
  0x5b   :  { %601 = vmatpush1.msra.mxu0 %v12615_v58  ;;  %726 = vmatpush1.msra.mxu1 %v12616_v63  ;;  %v12623_v58 = vld [vmem:[#allocation13_spill] sm:$0xff]  ;;  %v12624_v63 = vld [vmem:[#allocation40_spill] sm:$0xff] }
  0x5c   :  { %604 = vmatprep.subr.mxu0 %v12617_v7  ;;  %728 = vmatprep.subr.mxu1 %v12618_v30  ;;  %v235_v7 = vsub.f32 %v10205_v13, %v12424_v47  ;;  %v12625_v30 = vld [vmem:[#allocation14_spill] sm:$0xff] }
  0x5d   :  { %607 = vmatpush1.msra.mxu0 %v12619_v33  ;;  %730 = vmatpush1.msra.mxu1 %v12620_v57  ;;  %v241_v57 = vsub.f32 %v10210_v53, %v12425_v52  ;;  %v12630_v52 = vld [vmem:[#allocation19_spill] sm:$0xff] }
  0x5e   :  { %610 = vmatprep.subr.mxu0 %v12621_v14  ;;  %732 = vmatprep.subr.mxu1 %v12622_v44  ;;  %v12626_v14 = vld [vmem:[#allocation15_spill] sm:$0xff]  ;;  %v236_v47 = vand.u32 4294901760, %v235_v7 }
  0x5f   :  { %613 = vmatpush1.msra.mxu0 %v9993_v50  ;;  %734 = vmatpush1.msra.mxu1 %v12623_v58  ;;  %v12627_v50 = vld [vmem:[#allocation16_spill] sm:$0xff]  ;;  %v12628_v58 = vld [vmem:[#allocation17_spill] sm:$0xff]  ;;  %v12633_v7 = vld [vmem:[#allocation23_spill] sm:$0xff] }
  0x60   :  { %616 = vmatprep.subr.mxu0 %v12624_v63  ;;  %736 = vmatprep.subr.mxu1 %v12625_v30  ;;  %v12629_v30 = vld [vmem:[#allocation18_spill] sm:$0xff]  ;;  %v242_v63 = vand.u32 4294901760, %v241_v57  ;;  %v12634_v57 = vld [vmem:[#allocation25_spill] sm:$0xff] }
  0x61   :  { %619 = vmatpush1.msra.mxu0 %v10022_v1  ;;  %738 = vmatpush1.msra.mxu1 %v12626_v14  ;;  %v12631_v14 = vld [vmem:[#allocation20_spill] sm:$0xff] }
  0x62   :  { %622 = vmatprep.subr.mxu0 %v10047_v39  ;;  %740 = vmatprep.subr.mxu1 %v12627_v50 }
  0x63   :  { %625 = vmatpush1.msra.mxu0 %v10058_v27  ;;  %742 = vmatpush1.msra.mxu1 %v12628_v58  ;;  %v12632_v27 = vld [vmem:[#allocation21_spill] sm:$0xff] }
  0x64   :  { %652 = vmatprep.subr.mxu0 %v10075_v38  ;;  %744 = vmatprep.subr.mxu1 %v12629_v30 }
  0x65   :  { %655 = vmatpush2.msra.mxu0 %v10085_v62  ;;  %746 = vmatpush1.msra.mxu1 %v12630_v52  ;;  %v12635_v52 = vld [vmem:[#allocation27_spill] sm:$0xff] }
  0x66   :  { %658 = vmatprep.subr.mxu0 %v10096_v43  ;;  %748 = vmatprep.subr.mxu1 %v12631_v14 }
  0x67   :  { %237 = vmatprep.mubr.f32.mxu0 %v236_v47  ;;  %661 = vmatpush2.msra.mxu0 %v10105_v2  ;;  %v12636_v47 = vld [vmem:[#allocation29_spill] sm:$0xff] }
  0x68   :  { %750 = vmatpush1.msra.mxu1 %v12632_v27  ;;  %243 = vmatmul.mubr.f32.gmra.mxu0 %v242_v63  ;;  %v12637_v63 = vand.u32 4294901760, %v9537_v18  ;;  %v12644_v18 = vld [vmem:[#allocation39_spill] sm:$0xff] }
  0x69   :  { %664 = vmatprep.subr.mxu0 %v10119_v26  ;;  %752 = vmatprep.subr.mxu1 %v12633_v7 }
  0x6a   :  { %667 = vmatpush2.msra.mxu0 %v10129_v32  ;;  %754 = vmatpush1.msra.mxu1 %v12634_v57  ;;  %v12638_v32 = vld [vmem:[#allocation33_spill] sm:$0xff]  ;;  %v12639_v57 = vand.u32 4294901760, %v9559_v23  ;;  %v12645_v23 = vand.u32 4294901760, %v9597_v35  ;;  %v12650_v35 = vand.u32 4294901760, %v9662_v59  ;;  %v12655_v59 = vand.u32 4294901760, %v10205_v13 }
  0x6b   :  { %670 = vmatprep.subr.mxu0 %v10141_v49  ;;  %756 = vmatprep.subr.mxu1 %v12635_v52  ;;  %v12640_v52 = vld [vmem:[#allocation35_spill] sm:$0xff] }
  0x6c   :  { %673 = vmatpush2.msra.mxu0 %v10148_v12  ;;  %676 = vmatprep.mubr.f32.mxu0 %v10091_v51  ;;  %v12641_v12 = vand.u32 4294901760, %v9565_v25  ;;  %v12647_v25 = vand.u32 4294901760, %v9613_v40  ;;  %v12653_v40 = vand.u32 4294901760, %v9691_v8  ;;  %v12662_v8 = vand.u32 4294901760, %v9813_v34 }
  0x6d   :  { %758 = vmatpush1.msra.mxu1 %v12636_v47  ;;  %679 = vmatmul.mubr.f32.vlgmr.msra.gmra.mxu0 %v10100_v41  ;;  %v12642_v47 = vld [vmem:[#allocation37_spill] sm:$0xff] }
  0x6e   :  { %784 = vmatprep.subr.mxu1 %v9940_v61  ;;  %827 = vmatprep.subr.mxu0 %v12637_v63  ;;  %v12643_v61 = vand.u32 4294901760, %v9588_v31  ;;  %v12649_v31 = vand.u32 4294901760, %v10091_v51  ;;  %v12652_v63 = vand.u32 4294901760, %v9677_v0  ;;  %v12656_v51 = vand.u32 4294901760, %v9717_v48  ;;  %v12671_v48 = vld [vmem:[#allocation7_spill] sm:$0xff] }
  0x6f   :  { %786 = vmatpush2.msra.mxu1 %v12638_v32  ;;  %831 = vmatpush1.msra.mxu0 %v12639_v57  ;;  %v12646_v57 = vld [vmem:[#allocation41_spill] sm:$0xff]  ;;  %v12658_v0 = vand.u32 4294901760, %v10210_v53 }
  0x70   :  { %522 = vmatprep.mubr.f32.mxu1 %v10192_v36  ;;  %788 = vmatprep.subr.mxu1 %v12640_v52 }
  0x71   :  { %835 = vmatprep.subr.mxu0 %v12641_v12  ;;  %524 = vmatmul.mubr.f32.gmra.mxu1 %v10196_v37  ;;  %v12648_v12 = vand.u32 4294901760, %v9627_v45  ;;  %v12654_v45 = vand.u32 4294901760, %v9705_v42 }
  0x72   :  { %790 = vmatpush2.msra.mxu1 %v12642_v47  ;;  %839 = vmatpush1.msra.mxu0 %v12643_v61  ;;  %v12651_v61 = vand.u32 4294901760, %v10100_v41  ;;  %v12679_v41 = vld [vmem:[#allocation10_spill] sm:$0xff] }
  0x73   :  { %686 = vmatprep.mubr.f32.mxu0 %v10205_v13  ;;  %792 = vmatprep.subr.mxu1 %v12644_v18  ;;  %v12682_v13 = vld [vmem:[#allocation36_spill] sm:$0xff] }
  0x74   :  { %843 = vmatprep.subr.mxu0 %v12645_v23  ;;  %689 = vmatmul.mubr.f32.gmra.mxu0 %v10210_v53  ;;  %v12683_v53 = vand.u32 4294901760, %v12682_v13  ;;  %v12712_v13 = vld [vmem:[#allocation31_spill] sm:$0xff] }
  0x75   :  { %794 = vmatpush2.msra.mxu1 %v12646_v57  ;;  %847 = vmatpush1.msra.mxu0 %v12647_v25  ;;  %v12686_v25 = vld [vmem:[#allocation13_spill] sm:$0xff] }
  0x76   :  { %796 = vmatprep.subr.mxu1 %v10035_v56  ;;  %851 = vmatprep.subr.mxu0 %v12648_v12  ;;  %v12687_v12 = vld [vmem:[#allocation40_spill] sm:$0xff] }
  0x77   :  { %798 = vmatpush2.msra.mxu1 %v10054_v20  ;;  %802 = vmatprep.mubr.f32.mxu1 %v12649_v31  ;;  %v12688_v31 = vand.u32 4294901760, %v12687_v12 }
  0x78   :  { %855 = vmatpush1.msra.mxu0 %v12650_v35  ;;  %806 = vmatmul.mubr.f32.vlgmr.msra.gmra.mxu1 %v12651_v61  ;;  %v12689_v35 = vld [vmem:[#allocation14_spill] sm:$0xff]  ;;  %v1160_v61 = vld [vmem:[%s12312_s2 + $0x70] sm:$0xff] }
  0x79   :  { %859 = vmatprep.subr.mxu0 %v12652_v63  ;;  %1026 = vmatprep.subr.mxu1 %v9499_v3  ;;  %v12657_v3 = vand.u32 4294901760, %v9734_v21  ;;  %v12691_v63 = vld [vmem:[#allocation15_spill] sm:$0xff] }
  0x7a   :  { %863 = vmatpush1.msra.mxu0 %v12653_v40  ;;  %1028 = vmatpush1.msra.mxu1 %v9501_v4  ;;  %v12659_v4 = vand.u32 4294901760, %v9746_v6  ;;  %v12676_v6 = vld [vmem:[#allocation9_spill] sm:$0xff]  ;;  %v12692_v40 = vand.u32 4294901760, %v10047_v39  ;;  %v12696_v39 = vand.u32 4294901760, %v10085_v62  ;;  %v12699_v62 = vand.u32 4294901760, %v10105_v2 }
  0x7b   :  { %867 = vmatprep.subr.mxu0 %v12654_v45  ;;  %1030 = vmatprep.subr.mxu1 %v9503_v5  ;;  %v12660_v5 = vand.u32 4294901760, %v9773_v55  ;;  %v12668_v55 = vld [vmem:[#allocation6_spill] sm:$0xff] }
  0x7c   :  { %814 = vmatprep.mubr.f32.mxu1 %v12655_v59  ;;  %871 = vmatpush1.msra.mxu0 %v12656_v51  ;;  %v1159_v45 = vld [vmem:[%s12312_s2 + $0x68] sm:$0xff] }
  0x7d   :  { %1032 = vmatpush1.msra.mxu1 %v9514_v9  ;;  %875 = vmatprep.subr.mxu0 %v12657_v3  ;;  %v12661_v9 = vand.u32 4294901760, %v9789_v28  ;;  %v12677_v28 = vld [vmem:[#allocation32_spill] sm:$0xff]  ;;  %v12693_v59 = vld [vmem:[#allocation42_spill] sm:$0xff] }
  0x7e   :  { %818 = vmatmul.mubr.f32.gmra.mxu1 %v12658_v0  ;;  %1034 = vmatprep.subr.mxu1 %v9516_v10  ;;  %v12663_v10 = vand.u32 4294901760, %v9829_v46  ;;  %v12678_v46 = vand.u32 4294901760, %v12677_v28  ;;  %v12694_v51 = vand.u32 4294901760, %v12693_v59  ;;  %v12695_v0 = vand.u32 4294901760, %v10075_v38  ;;  %v12710_v28 = vld [vmem:[#allocation29_spill] sm:$0xff] }
  0x7f   :  { %879 = vmatpush1.msra.mxu0 %v12659_v4  ;;  %1036 = vmatpush1.msra.mxu1 %v9518_v11  ;;  %v12664_v11 = vand.u32 4294901760, %v9841_v60  ;;  %v12697_v4 = vld [vmem:[#allocation19_spill] sm:$0xff]  ;;  %v12698_v38 = vand.u32 4294901760, %v10096_v43 }
  0x80   :  { %883 = vmatprep.subr.mxu0 %v12660_v5  ;;  %1038 = vmatprep.subr.mxu1 %v9530_v15  ;;  %v12665_v15 = vand.u32 4294901760, %v12607_v19  ;;  %v12680_v19 = vand.u32 4294901760, %v12619_v33  ;;  %v1161_v33 = vld [vmem:[%s12312_s2 + $0x78] sm:$0xff]  ;;  %v10390_v5 = vand.u32 4294901760, %v1159_v45 }
  0x81   :  { %887 = vmatpush1.msra.mxu0 %v12661_v9  ;;  %1040 = vmatpush1.msra.mxu1 %v9532_v16  ;;  %v12666_v16 = vld [vmem:[#allocation24_spill] sm:$0xff]  ;;  %v10377_v3 = vand.u32 4294901760, %v1161_v33 }
  0x82   :  { %891 = vmatprep.subr.mxu0 %v12662_v8  ;;  %1042 = vmatprep.subr.mxu1 %v9534_v17  ;;  %v12667_v34 = vand.u32 4294901760, %v12666_v16  ;;  %v12669_v17 = vld [vmem:[#allocation26_spill] sm:$0xff] }
  0x83   :  { %895 = vmatpush1.msra.mxu0 %v12663_v10  ;;  %1044 = vmatpush1.msra.mxu1 %v9556_v22  ;;  %v12670_v42 = vand.u32 4294901760, %v12669_v17  ;;  %v12672_v22 = vld [vmem:[#allocation28_spill] sm:$0xff]  ;;  %v1155_v8 = vld [vmem:[%s12312_s2 + $0x48] sm:$0xff]  ;;  %v10410_v43 = vsub.f32 %v1161_v33, %v10377_v3  ;;  %v12701_v10 = vand.u32 4294901760, %v10119_v26  ;;  %v12705_v26 = vand.u32 4294901760, %v10141_v49  ;;  %v1152_v49 = vld [vmem:[%s12312_s2 + $0x30] sm:$0xff] }
  0x84   :  { %899 = vmatprep.subr.mxu0 %v12664_v11  ;;  %1046 = vmatprep.subr.mxu1 %v9562_v24  ;;  %v12673_v60 = vand.u32 4294901760, %v12672_v22  ;;  %v12674_v24 = vld [vmem:[#allocation30_spill] sm:$0xff]  ;;  %v10434_v17 = vand.u32 4294901760, %v1155_v8  ;;  %v10479_v12 = vand.u32 4294901760, %v1152_v49 }
  0x85   :  { %903 = vmatpush1.msra.mxu0 %v12665_v15  ;;  %1048 = vmatpush1.msra.mxu1 %v12608_v54  ;;  %v12675_v21 = vand.u32 4294901760, %v12674_v24  ;;  %v12681_v54 = vld [vmem:[#allocation11_spill] sm:$0xff]  ;;  %12700 = vst [vmem:[#allocation22_spill] sm:$0xff] %v10410_v43  ;;  %v12704_v15 = vld [vmem:[#allocation25_spill] sm:$0xff]  ;;  %v10443_v24 = vand.u32 4294901760, %v10410_v43 }
  0x86   :  { %907 = vmatprep.subr.mxu0 %v12667_v34  ;;  %1050 = vmatprep.subr.mxu1 %v12668_v55  ;;  %v1154_v34 = vld [vmem:[%s12312_s2 + $0x40] sm:$0xff]  ;;  %v10429_v55 = vsub.f32 %v1159_v45, %v10390_v5 }
  0x87   :  { %911 = vmatpush1.msra.mxu0 %v12670_v42  ;;  %1052 = vmatpush1.msra.mxu1 %v12671_v48  ;;  %v1153_v42 = vld [vmem:[%s12312_s2 + $0x38] sm:$0xff]  ;;  %v12707_v48 = vld [vmem:[#allocation46_spill] sm:$0xff]  ;;  %v1277_v33 = vsub.f32 %v10410_v43, %v10443_v24 }
  0x88   :  { %915 = vmatprep.subr.mxu0 %v12673_v60  ;;  %1054 = vmatprep.subr.mxu1 %v12614_v29  ;;  %v12684_v29 = vld [vmem:[#allocation38_spill] sm:$0xff]  ;;  %v12708_v22 = vand.u32 4294901760, %v12707_v48  ;;  %v12709_v60 = vld [vmem:[#allocation43_spill] sm:$0xff] }
  0x89   :  { %919 = vmatpush1.msra.mxu0 %v12675_v21  ;;  %1056 = vmatpush1.msra.mxu1 %v12676_v6  ;;  %v12685_v23 = vand.u32 4294901760, %v12684_v29  ;;  %v10469_v29 = vand.u32 4294901760, %v10429_v55 }
  0x8a   :  { %923 = vmatprep.subr.mxu0 %v12678_v46  ;;  %1058 = vmatprep.subr.mxu1 %v12679_v41  ;;  %v12711_v46 = vld [vmem:[#allocation44_spill] sm:$0xff]  ;;  %v10456_v41 = vand.u32 4294901760, %v1154_v34 }
  0x8b   :  { %927 = vmatpush1.msra.mxu0 %v12680_v19  ;;  %1060 = vmatpush1.msra.mxu1 %v12681_v54  ;;  %v1151_v19 = vld [vmem:[%s12312_s2 + $0x28] sm:$0xff] }
  0x8c   :  { %931 = vmatprep.subr.mxu0 %v12683_v53  ;;  %1062 = vmatprep.subr.mxu1 %v12622_v44  ;;  %v12690_v44 = vand.u32 4294901760, %v10022_v1  ;;  %v10379_v1 = vand.u32 4294901760, %v1160_v61  ;;  %v10466_v53 = vand.u32 4294901760, %v1153_v42  ;;  %v10512_v59 = vsub.f32 %v1154_v34, %v10456_v41 }
  0x8d   :  { %935 = vmatpush1.msra.mxu0 %v12685_v23  ;;  %1064 = vmatpush1.msra.mxu1 %v12686_v25  ;;  %v1150_v23 = vld [vmem:[%s12312_s2 + $0x20] sm:$0xff] }
  0x8e   :  { %939 = vmatprep.subr.mxu0 %v12688_v31  ;;  %1066 = vmatprep.subr.mxu1 %v12689_v35  ;;  %v1149_v31 = vld [vmem:[%s12312_s2 + $0x18] sm:$0xff]  ;;  %v10485_v35 = vsub.f32 %v1155_v8, %v10434_v17 }
  0x8f   :  { %943 = vmatpush1.msra.mxu0 %v12690_v44  ;;  %1068 = vmatpush1.msra.mxu1 %v12691_v63  ;;  %v1148_v63 = vld [vmem:[%s12312_s2 + $0x10] sm:$0xff] }
  0x90   :  { %947 = vmatprep.subr.mxu0 %v12692_v40  ;;  %1070 = vmatprep.subr.mxu1 %v12627_v50  ;;  %v1158_v50 = vld [vmem:[%s12312_s2 + $0x60] sm:$0xff]  ;;  %v10506_v40 = vand.u32 4294901760, %v1150_v23 }
  0x91   :  { %951 = vmatpush1.msra.mxu0 %v12694_v51  ;;  %1072 = vmatpush1.msra.mxu1 %v12628_v58  ;;  %v1157_v58 = vld [vmem:[%s12312_s2 + $0x58] sm:$0xff]  ;;  %v10404_v9 = vand.u32 4294901760, %v1158_v50  ;;  %v1289_v51 = vsub.f32 %v10429_v55, %v10469_v29 }
  0x92   :  { %979 = vmatprep.subr.mxu0 %v12695_v0  ;;  %1074 = vmatprep.subr.mxu1 %v12629_v30  ;;  %v1156_v30 = vld [vmem:[%s12312_s2 + $0x50] sm:$0xff]  ;;  %v10418_v2 = vand.u32 4294901760, %v1157_v58  ;;  %v10518_v0 = vand.u32 4294901760, %v1149_v31 }
  0x93   :  { %983 = vmatpush2.msra.mxu0 %v12696_v39  ;;  %1076 = vmatpush1.msra.mxu1 %v12697_v4  ;;  %v10423_v16 = vand.u32 4294901760, %v1156_v30  ;;  %v10452_v6 = vsub.f32 %v1158_v50, %v10404_v9  ;;  %v10527_v39 = vsub.f32 %v1153_v42, %v10466_v53  ;;  %v10566_v34 = vand.u32 4294901760, %v1289_v51 }
  0x94   :  { %987 = vmatprep.subr.mxu0 %v12698_v38  ;;  %1078 = vmatprep.subr.mxu1 %v12631_v14  ;;  %v10413_v14 = vsub.f32 %v1160_v61, %v10379_v1  ;;  %v10462_v54 = vsub.f32 %v1157_v58, %v10418_v2  ;;  %v10493_v61 = vand.u32 4294901760, %v1151_v19  ;;  %v10536_v58 = vand.u32 4294901760, %v10485_v35 }
  0x95   :  { %991 = vmatpush2.msra.mxu0 %v12699_v62  ;;  %1080 = vmatpush1.msra.mxu1 %v12632_v27  ;;  %v12702_v27 = vld [vmem:[#allocation45_spill] sm:$0xff]  ;;  %v10475_v25 = vsub.f32 %v1156_v30, %v10423_v16  ;;  %v10496_v44 = vand.u32 4294901760, %v10452_v6  ;;  %v10539_v38 = vsub.f32 %v1152_v49, %v10479_v12  ;;  %v10543_v30 = vand.u32 4294901760, %v1277_v33  ;;  %12719 = vst [vmem:[#allocation18_spill] sm:$0xff] %v10566_v34 }
  0x96   :  { %995 = vmatprep.subr.mxu0 %v12701_v10  ;;  %1082 = vmatprep.subr.mxu1 %v12633_v7  ;;  %v12703_v11 = vand.u32 4294901760, %v12702_v27  ;;  %v12706_v7 = vld [vmem:[#allocation27_spill] sm:$0xff]  ;;  %v10449_v21 = vand.u32 4294901760, %v10413_v14  ;;  %v10509_v45 = vand.u32 4294901760, %v10462_v54  ;;  %12715 = vst [vmem:[#allocation34_spill] sm:$0xff] %v10536_v58  ;;  %v10550_v10 = vsub.f32 %v1151_v19, %v10493_v61 }
  0x97   :  { %1084 = vmatpush1.msra.mxu1 %v12704_v15  ;;  %1009 = vmatprep.mubr.f32.mxu0 %v12709_v60  ;;  %v10521_v50 = vand.u32 4294901760, %v10475_v25  ;;  %12716 = vst [vmem:[#allocation12_spill] sm:$0xff] %v10543_v30  ;;  %v1295_v8 = vsub.f32 %v10452_v6, %v10496_v44  ;;  %v10562_v15 = vsub.f32 %v1150_v23, %v10506_v40  ;;  %v10581_v42 = vand.u32 4294901760, %v10539_v38 }
  0x98   :  { %999 = vmatpush2.msra.mxu0 %v12703_v11  ;;  %1086 = vmatprep.subr.mxu1 %v12706_v7  ;;  %12713 = vst [vmem:[#allocation5_spill] sm:$0xff] %v10509_v45  ;;  %v1301_v27 = vsub.f32 %v10462_v54, %v10509_v45  ;;  %v10559_v11 = vand.u32 4294901760, %v10512_v59  ;;  %v10574_v7 = vsub.f32 %v1149_v31, %v10518_v0 }
  0x99   :  { %1003 = vmatprep.subr.mxu0 %v12705_v26  ;;  %1088 = vmatpush1.msra.mxu1 %v12710_v28  ;;  %12714 = vst [vmem:[#allocation8_spill] sm:$0xff] %v10521_v50  ;;  %v10571_v26 = vand.u32 4294901760, %v10527_v39  ;;  %12721 = vst [vmem:[#allocation21_spill] sm:$0xff] %v10581_v42  ;;  %v10603_v19 = vand.u32 4294901760, %v10562_v15 }
  0x9a   :  { %1007 = vmatpush2.msra.mxu0 %v12708_v22  ;;  %1114 = vmatprep.subr.mxu1 %v12712_v13  ;;  %12718 = vst [vmem:[#allocation17_spill] sm:$0xff] %v10559_v11  ;;  %v10588_v22 = vand.u32 4294901760, %v1295_v8  ;;  %v10598_v28 = vand.u32 4294901760, %v1301_v27  ;;  %v10615_v33 = vand.u32 4294901760, %v10574_v7 }
  0x9b   :  { %1011 = vmatmul.mubr.f32.vlgmr.msra.gmra.mxu0 %v12711_v46  ;;  %1183 = vmatprep.subr.mxu0 %v10377_v3  ;;  %12720 = vst [vmem:[#allocation20_spill] sm:$0xff] %v10571_v26  ;;  %12725 = vst [vmem:[#allocation37_spill] sm:$0xff] %v10603_v19  ;;  %v1325_v31 = vsub.f32 %v10527_v39, %v10571_v26  ;;  %v1343_v8 = vsub.f32 %v10562_v15, %v10603_v19 }
  0x9c   :  { %1116 = vmatpush2.msra.mxu1 %v12638_v32  ;;  %1185 = vmatpush1.msra.mxu0 %v10379_v1  ;;  %v1283_v32 = vsub.f32 %v10413_v14, %v10449_v21  ;;  %12722 = vst [vmem:[#allocation23_spill] sm:$0xff] %v10588_v22  ;;  %12724 = vst [vmem:[#allocation35_spill] sm:$0xff] %v10598_v28 }
  0x9d   :  { %1118 = vmatprep.subr.mxu1 %v12640_v52  ;;  %1187 = vmatprep.subr.mxu0 %v10390_v5  ;;  %v1147_v52 = vld [vmem:[%s12312_s2 + $0x8] sm:$0xff]  ;;  %12727 = vst [vmem:[#allocation41_spill] sm:$0xff] %v10615_v33 }
  0x9e   :  { %1017 = vmatprep.mubr.f32.mxu0 %v10192_v36  ;;  %1120 = vmatpush2.msra.mxu1 %v12642_v47  ;;  %v1146_v47 = vld [vmem:[%s12312_s2] sm:$0xff]  ;;  %v10533_v4 = vand.u32 4294901760, %v1147_v52  ;;  %v10545_v62 = vand.u32 4294901760, %v1283_v32 }
  0x9f   :  { %1189 = vmatpush1.msra.mxu0 %v10404_v9  ;;  %1122 = vmatprep.subr.mxu1 %v12644_v18  ;;  %v10531_v18 = vand.u32 4294901760, %v1148_v63 }
  0xa0   :  { %1019 = vmatmul.mubr.f32.gmra.mxu0 %v10196_v37  ;;  %1191 = vmatprep.subr.mxu0 %v10418_v2  ;;  %12717 = vst [vmem:[#allocation16_spill] sm:$0xff] %v10545_v62  ;;  %v10594_v49 = vsub.f32 %v1147_v52, %v10533_v4 }
  0xa1   :  { %1124 = vmatpush2.msra.mxu1 %v12646_v57  ;;  %1193 = vmatpush1.msra.mxu0 %v10423_v16  ;;  %v10556_v57 = vand.u32 4294901760, %v1146_v47  ;;  %v10584_v48 = vsub.f32 %v1148_v63, %v10531_v18  ;;  %v1331_v63 = vsub.f32 %v10539_v38, %v10581_v42 }
  0xa2   :  { %1126 = vmatprep.subr.mxu1 %v10035_v56  ;;  %1195 = vmatprep.subr.mxu0 %v10434_v17  ;;  %v1307_v56 = vsub.f32 %v10475_v25, %v10521_v50 }
  0xa3   :  { %1128 = vmatpush2.msra.mxu1 %v10054_v20  ;;  %1130 = vmatprep.mubr.f32.mxu1 %v12709_v60  ;;  %v1313_v20 = vsub.f32 %v10485_v35, %v10536_v58  ;;  %v10591_v60 = vand.u32 4294901760, %v10550_v10  ;;  %v10606_v13 = vsub.f32 %v1146_v47, %v10556_v57  ;;  %v10624_v52 = vand.u32 4294901760, %v10584_v48 }
  0xa4   :  { %1197 = vmatpush1.msra.mxu0 %v10456_v41  ;;  %1132 = vmatmul.mubr.f32.vlgmr.msra.gmra.mxu1 %v12711_v46  ;;  %v1319_v46 = vsub.f32 %v10512_v59, %v10559_v11  ;;  %v10610_v23 = vand.u32 4294901760, %v1307_v56  ;;  %v10631_v47 = vand.u32 4294901760, %v10594_v49  ;;  %v10644_v56 = vand.u32 4294901760, %v1325_v31 }
  0xa5   :  { %1199 = vmatprep.subr.mxu0 %v10466_v53  ;;  %1279 = vmatprep.subr.mxu1 %v10543_v30  ;;  %12723 = vst [vmem:[#allocation33_spill] sm:$0xff] %v10591_v60  ;;  %v10619_v32 = vand.u32 4294901760, %v1313_v20  ;;  %12729 = vst [vmem:[#allocation6_spill] sm:$0xff] %v10624_v52  ;;  %v1337_v51 = vsub.f32 %v10550_v10, %v10591_v60  ;;  %v10640_v27 = vand.u32 4294901760, %v10606_v13 }
  0xa6   :  { %1201 = vmatpush1.msra.mxu0 %v10479_v12  ;;  %1285 = vmatpush1.msra.mxu1 %v10545_v62  ;;  %12726 = vst [vmem:[#allocation39_spill] sm:$0xff] %v10610_v23  ;;  %12730 = vst [vmem:[#allocation26_spill] sm:$0xff] %v10631_v47  ;;  %v1349_v20 = vsub.f32 %v10574_v7, %v10615_v33  ;;  %v1361_v31 = vsub.f32 %v10594_v49, %v10631_v47 }
  0xa7   :  { %1203 = vmatprep.subr.mxu0 %v10493_v61  ;;  %1291 = vmatprep.subr.mxu1 %v10566_v34  ;;  %12728 = vst [vmem:[#allocation24_spill] sm:$0xff] %v10619_v32  ;;  %12732 = vst [vmem:[#allocation28_spill] sm:$0xff] %v10640_v27 }
  0xa8   :  { %1138 = vmatprep.mubr.f32.mxu1 %v10192_v36  ;;  %1205 = vmatpush1.msra.mxu0 %v10506_v40  ;;  %v10635_v36 = vand.u32 4294901760, %v1319_v46  ;;  %12733 = vst [vmem:[#allocation30_spill] sm:$0xff] %v10644_v56  ;;  %v1355_v46 = vsub.f32 %v10584_v48, %v10624_v52 }
  0xa9   :  { %1297 = vmatpush1.msra.mxu1 %v10588_v22  ;;  %1207 = vmatprep.subr.mxu0 %v10518_v0  ;;  %v10668_v22 = vand.u32 4294901760, %v1349_v20  ;;  %v12741_v20 = vmov 0.0  }
  0xaa   :  { %1140 = vmatmul.mubr.f32.gmra.mxu1 %v10196_v37  ;;  %1303 = vmatprep.subr.mxu1 %v10598_v28  ;;  %12731 = vst [vmem:[#allocation7_spill] sm:$0xff] %v10635_v36  ;;  %v10650_v37 = vand.u32 4294901760, %v1331_v63  ;;  %v12438_v28 = vmov 0.0   ;;  %v1367_v63 = vsub.f32 %v10606_v13, %v10640_v27 }
  0xab   :  { %1209 = vmatpush1.msra.mxu0 %v10531_v18  ;;  %1309 = vmatpush1.msra.mxu1 %v10610_v23  ;;  %v10656_v23 = vand.u32 4294901760, %v1337_v51  ;;  %12737 = vst [vmem:[#allocation11_spill] sm:$0xff] %v10668_v22  ;;  %v10672_v51 = vand.u32 4294901760, %v1355_v46  ;;  %v12742_v46 = vld [vmem:[#allocation23_spill] sm:$0xff] }
  0xac   :  { %1211 = vmatprep.subr.mxu0 %v10533_v4  ;;  %1315 = vmatprep.subr.mxu1 %v10619_v32  ;;  %12734 = vst [vmem:[#allocation9_spill] sm:$0xff] %v10650_v37  ;;  %v10662_v32 = vand.u32 4294901760, %v1343_v8  ;;  %v10676_v8 = vand.u32 4294901760, %v1361_v31  ;;  %v12743_v31 = vld [vmem:[#allocation35_spill] sm:$0xff] }
  0xad   :  { %1213 = vmatpush1.msra.mxu0 %v10556_v57  ;;  %1246 = vmatprep.mubr.f32.mxu0 %v12438_v28  ;;  %12735 = vst [vmem:[#allocation32_spill] sm:$0xff] %v10656_v23  ;;  %12738 = vst [vmem:[#allocation36_spill] sm:$0xff] %v10672_v51 }
  0xae   :  { %1321 = vmatpush1.msra.mxu1 %v10635_v36  ;;  %1252 = vmatmul.mubr.f32.vlgmr.msra.gmra.mxu0 %v12438_v28  ;;  %12736 = vst [vmem:[#allocation10_spill] sm:$0xff] %v10662_v32  ;;  %12739 = vst [vmem:[#allocation38_spill] sm:$0xff] %v10676_v8  ;;  %v10680_v28 = vand.u32 4294901760, %v1367_v63  ;;  %v12744_v63 = vld [vmem:[#allocation39_spill] sm:$0xff] }
  0xaf   :  { %1327 = vmatprep.subr.mxu1 %v10644_v56  ;;  %1428 = vmatprep.subr.mxu0 %v10410_v43 }
  0xb0   :  { %1333 = vmatpush1.msra.mxu1 %v10650_v37  ;;  %1431 = vmatpush1.msra.mxu0 %v10413_v14  ;;  %12740 = vst [vmem:[#allocation13_spill] sm:$0xff] %v10680_v28 }
  0xb1   :  { %1339 = vmatprep.subr.mxu1 %v10656_v23  ;;  %1434 = vmatprep.subr.mxu0 %v10429_v55 }
  0xb2   :  { %1345 = vmatpush1.msra.mxu1 %v10662_v32  ;;  %1437 = vmatpush1.msra.mxu0 %v10452_v6 }
  0xb3   :  { %1351 = vmatprep.subr.mxu1 %v10668_v22  ;;  %1440 = vmatprep.subr.mxu0 %v10462_v54 }
  0xb4   :  { %1357 = vmatpush1.msra.mxu1 %v10672_v51  ;;  %1443 = vmatpush1.msra.mxu0 %v10475_v25 }
  0xb5   :  { %1363 = vmatprep.subr.mxu1 %v10676_v8  ;;  %1446 = vmatprep.subr.mxu0 %v10485_v35 }
  0xb6   :  { %1369 = vmatpush1.msra.mxu1 %v10680_v28  ;;  %1402 = vmatprep.mubr.f32.mxu1 %v12741_v20 }
  0xb7   :  { %1449 = vmatpush1.msra.mxu0 %v10512_v59  ;;  %1404 = vmatmul.mubr.f32.vlgmr.msra.gmra.mxu1 %v12741_v20 }
  0xb8   :  { %1452 = vmatprep.subr.mxu0 %v10527_v39  ;;  %1532 = vmatprep.subr.mxu1 %v10377_v3 }
  0xb9   :  { %1455 = vmatpush1.msra.mxu0 %v10539_v38  ;;  %1534 = vmatpush1.msra.mxu1 %v10379_v1 }
  0xba   :  { %1458 = vmatprep.subr.mxu0 %v10550_v10  ;;  %1536 = vmatprep.subr.mxu1 %v10390_v5 }
  0xbb   :  { %1461 = vmatpush1.msra.mxu0 %v10562_v15  ;;  %1538 = vmatpush1.msra.mxu1 %v10404_v9 }
  0xbc   :  { %1464 = vmatprep.subr.mxu0 %v10574_v7  ;;  %1540 = vmatprep.subr.mxu1 %v10418_v2 }
  0xbd   :  { %1467 = vmatpush1.msra.mxu0 %v10584_v48  ;;  %1542 = vmatpush1.msra.mxu1 %v10423_v16 }
  0xbe   :  { %1470 = vmatprep.subr.mxu0 %v10594_v49  ;;  %1544 = vmatprep.subr.mxu1 %v10434_v17 }
  0xbf   :  { %1473 = vmatpush1.msra.mxu0 %v10606_v13  ;;  %1506 = vmatprep.mubr.f32.mxu0 %v12741_v20 }
  0xc0   :  { %1546 = vmatpush1.msra.mxu1 %v10456_v41  ;;  %1509 = vmatmul.mubr.f32.vlgmr.msra.gmra.mxu0 %v12741_v20 }
  0xc1   :  { %1548 = vmatprep.subr.mxu1 %v10466_v53  ;;  %1624 = vmatprep.subr.mxu0 %v10443_v24 }
  0xc2   :  { %1550 = vmatpush1.msra.mxu1 %v10479_v12  ;;  %1628 = vmatpush1.msra.mxu0 %v10449_v21 }
  0xc3   :  { %1552 = vmatprep.subr.mxu1 %v10493_v61  ;;  %1632 = vmatprep.subr.mxu0 %v10469_v29 }
  0xc4   :  { %1554 = vmatpush1.msra.mxu1 %v10506_v40  ;;  %1636 = vmatpush1.msra.mxu0 %v10496_v44 }
  0xc5   :  { %1556 = vmatprep.subr.mxu1 %v10518_v0  ;;  %1640 = vmatprep.subr.mxu0 %v10509_v45 }
  0xc6   :  { %1558 = vmatpush1.msra.mxu1 %v10531_v18  ;;  %1644 = vmatpush1.msra.mxu0 %v10521_v50 }
  0xc7   :  { %1560 = vmatprep.subr.mxu1 %v10533_v4  ;;  %1648 = vmatprep.subr.mxu0 %v10536_v58 }
  0xc8   :  { %1562 = vmatpush1.msra.mxu1 %v10556_v57  ;;  %1595 = vmatprep.mubr.f32.mxu1 %v12741_v20 }
  0xc9   :  { %1652 = vmatpush1.msra.mxu0 %v10559_v11  ;;  %1599 = vmatmul.mubr.f32.vlgmr.msra.gmra.mxu1 %v12741_v20 }
  0xca   :  { %1656 = vmatprep.subr.mxu0 %v10571_v26  ;;  %1742 = vmatprep.subr.mxu1 %v10377_v3 }
  0xcb   :  { %1660 = vmatpush1.msra.mxu0 %v10581_v42  ;;  %1744 = vmatpush1.msra.mxu1 %v10379_v1 }
  0xcc   :  { %1664 = vmatprep.subr.mxu0 %v10591_v60  ;;  %1746 = vmatprep.subr.mxu1 %v10390_v5 }
  0xcd   :  { %1668 = vmatpush1.msra.mxu0 %v10603_v19  ;;  %1748 = vmatpush1.msra.mxu1 %v10404_v9 }
  0xce   :  { %1672 = vmatprep.subr.mxu0 %v10615_v33  ;;  %1750 = vmatprep.subr.mxu1 %v10418_v2 }
  0xcf   :  { %1676 = vmatpush1.msra.mxu0 %v10624_v52  ;;  %1752 = vmatpush1.msra.mxu1 %v10423_v16 }
  0xd0   :  { %1680 = vmatprep.subr.mxu0 %v10631_v47  ;;  %1754 = vmatprep.subr.mxu1 %v10434_v17 }
  0xd1   :  { %1684 = vmatpush1.msra.mxu0 %v10640_v27  ;;  %1717 = vmatprep.mubr.f32.mxu0 %v12741_v20  ;;  %v12745_v27 = vld [vmem:[#allocation24_spill] sm:$0xff] }
  0xd2   :  { %1756 = vmatpush1.msra.mxu1 %v10456_v41  ;;  %1719 = vmatmul.mubr.f32.vlgmr.msra.gmra.mxu0 %v12741_v20 }
  0xd3   :  { %1758 = vmatprep.subr.mxu1 %v10466_v53  ;;  %1805 = vmatprep.mubr.f32.mxu1 %v12741_v20 }
  0xd4   :  { %1760 = vmatpush1.msra.mxu1 %v10479_v12  ;;  %1869 = vmatprep.subr.mxu0 %v10377_v3 }
  0xd5   :  { %1762 = vmatprep.subr.mxu1 %v10493_v61  ;;  %1871 = vmatpush1.msra.mxu0 %v10379_v1 }
  0xd6   :  { %1764 = vmatpush1.msra.mxu1 %v10506_v40  ;;  %1873 = vmatprep.subr.mxu0 %v10390_v5 }
  0xd7   :  { %1766 = vmatprep.subr.mxu1 %v10518_v0  ;;  %1875 = vmatpush1.msra.mxu0 %v10404_v9 }
  0xd8   :  { %1768 = vmatpush1.msra.mxu1 %v10531_v18  ;;  %1877 = vmatprep.subr.mxu0 %v10418_v2 }
  0xd9   :  { %1770 = vmatprep.subr.mxu1 %v10533_v4  ;;  %1879 = vmatpush1.msra.mxu0 %v10423_v16 }
  0xda   :  { %1772 = vmatpush1.msra.mxu1 %v10556_v57  ;;  %1881 = vmatprep.subr.mxu0 %v10434_v17 }
  0xdb   :  { %1807 = vmatmul.mubr.f32.vlgmr.msra.gmra.mxu1 %v12741_v20  ;;  %1965 = vmatprep.subr.mxu1 %v10543_v30 }
  0xdc   :  { %1971 = vmatpush1.msra.mxu1 %v10545_v62  ;;  %1883 = vmatpush1.msra.mxu0 %v10456_v41 }
  0xdd   :  { %1977 = vmatprep.subr.mxu1 %v10566_v34  ;;  %1885 = vmatprep.subr.mxu0 %v10466_v53 }
  0xde   :  { %1983 = vmatpush1.msra.mxu1 %v12742_v46  ;;  %2088 = vmatprep.mubr.f32.mxu1 %v12741_v20 }
  0xdf   :  { %1989 = vmatprep.subr.mxu1 %v12743_v31  ;;  %1887 = vmatpush1.msra.mxu0 %v10479_v12 }
  0xe0   :  { %1995 = vmatpush1.msra.mxu1 %v12744_v63  ;;  %1889 = vmatprep.subr.mxu0 %v10493_v61 }
  0xe1   :  { %2001 = vmatprep.subr.mxu1 %v12745_v27  ;;  %1891 = vmatpush1.msra.mxu0 %v10506_v40 }
  0xe2   :  { %2007 = vmatpush1.msra.mxu1 %v10635_v36  ;;  %1893 = vmatprep.subr.mxu0 %v10518_v0 }
  0xe3   :  { %2013 = vmatprep.subr.mxu1 %v10644_v56  ;;  %1895 = vmatpush1.msra.mxu0 %v10531_v18 }
  0xe4   :  { %2019 = vmatpush1.msra.mxu1 %v10650_v37  ;;  %1897 = vmatprep.subr.mxu0 %v10533_v4  ;;  %v95_v37 = vlaneseq }
  0xe5   :  { %2025 = vmatprep.subr.mxu1 %v10656_v23  ;;  %1899 = vmatpush1.msra.mxu0 %v10556_v57 }
  0xe6   :  { %2031 = vmatpush1.msra.mxu1 %v10662_v32  ;;  %1932 = vmatprep.mubr.f32.mxu0 %v12741_v20  ;;  %v10792_v23 = vshrl.u32 %v95_v37, 7  ;;  %v93_v32 = vld [vmem:[%s12313_s3] sm:$0x3]  ;;  %s9429_s3 = smov 64  }
  0xe7   :  { %2037 = vmatprep.subr.mxu1 %v10668_v22  ;;  %2114 = vmatprep.subr.mxu0 %v10410_v43 }
  0xe8   :  { %2043 = vmatpush1.msra.mxu1 %v10672_v51  ;;  %12746 = vst [vmem:[#allocation40_spill] sm:$0xff] %v10792_v23  ;;  %v12474_v56 = vsub.s32 0, %v10792_v23 }
  0xe9   :  { %2049 = vmatprep.subr.mxu1 %v10676_v8 }
  0xea   :  { %2055 = vmatpush1.msra.mxu1 %v10680_v28  ;;  %v98_v43 = vrot.slane %v93_v32, %v12474_v56  ;;  %v12489_v28 = vsub.s32 1, %v10792_v23 }
  0xeb   :  { %2218 = vmatprep.subr.mxu1 %v10377_v3 }
  0xec   :  { %v102_v37 = vrot.slane %v93_v32, %v12489_v28 }
 0x104   :  { %v228_v22 = vpop.f32.mrf.mxu0 }
 0x105   :  { %v229_v51 = vadd.f32 %v228_v22, %v98_v43 }
 0x106   :  { %v230_v27 = vpop.f32.mrf.mxu0 }
 0x10b   :  { %v517_v36 = vpop.f32.mrf.mxu1 }
 0x10c   :  { %v518_v8 = vadd.f32 %v517_v36, %v229_v51 }
 0x10d   :  { %v519_v33 = vpop.f32.mrf.mxu1 }
 0x128   :  { %v244_v63 = vpop.f32.mrf.mxu0 }
 0x129   :  { %v245_v31 = vadd.f32 %v244_v63, %v98_v43 }
 0x12a   :  { %v246_v47 = vpop.f32.mrf.mxu0 }
 0x12b   :  { %v247_v46 = vadd.f32 %v246_v47, %v102_v37 }
 0x12d   :  { %v680_v52 = vpop.f32.mrf.mxu0 }
 0x12e   :  { %v681_v34 = vadd.f32 %v680_v52, %v518_v8 }
 0x12f   :  { %v682_v62 = vpop.f32.mrf.mxu0 }
 0x131   :  { %v525_v19 = vpop.f32.mrf.mxu1 }
 0x132   :  { %v526_v56 = vadd.f32 %v525_v19, %v245_v31 }
 0x133   :  { %v527_v30 = vpop.f32.mrf.mxu1 }
 0x134   :  { %v528_v22 = vadd.f32 %v527_v30, %v247_v46  ;;  %v690_v60 = vpop.f32.mrf.mxu0 }
 0x135   :  { %v691_v36 = vadd.f32 %v690_v60, %v526_v56 }
 0x136   :  { %v692_v51 = vpop.f32.mrf.mxu0 }
 0x137   :  { %v693_v42 = vadd.f32 %v692_v51, %v528_v22 }
 0x138   :  { %v807_v26 = vpop.f32.mrf.mxu1 }
 0x139   :  { %v808_v11 = vadd.f32 %v807_v26, %v681_v34 }
 0x13a   :  { %v809_v58 = vpop.f32.mrf.mxu1 }
 0x13e   :  { %v819_v23 = vpop.f32.mrf.mxu1 }
 0x13f   :  { %v820_v32 = vadd.f32 %v819_v23, %v691_v36 }
 0x140   :  { %v821_v43 = vpop.f32.mrf.mxu1 }
 0x141   :  { %v822_v63 = vadd.f32 %v821_v43, %v693_v42  ;;  %v231_v43 = vadd.f32 %v230_v27, %v102_v37 }
 0x15b   :  { %v1012_v47 = vpop.f32.mrf.mxu0 }
 0x15c   :  { %v1013_v28 = vadd.f32 %v1012_v47, %v808_v11 }
 0x15d   :  { %v1014_v52 = vpop.f32.mrf.mxu0 }
 0x160   :  { %v1020_v8 = vpop.f32.mrf.mxu0 }
 0x161   :  { %v1021_v50 = vadd.f32 %v1020_v8, %v820_v32 }
 0x162   :  { %v1022_v45 = vpop.f32.mrf.mxu0 }
 0x163   :  { %v1023_v19 = vadd.f32 %v1022_v45, %v822_v63 }
 0x164   :  { %v1133_v31 = vpop.f32.mrf.mxu1 }
 0x165   :  { %v10803_v30 = vadd.f32 %v1133_v31, %v1013_v28  ;;  %v520_v28 = vadd.f32 %v519_v33, %v231_v43 }
 0x166   :  { %v1135_v60 = vpop.f32.mrf.mxu1 }
 0x167   :  { %12747 = vst [vmem:[#allocation14_spill] sm:$0xff] %v10803_v30  ;;  %v683_v8 = vadd.f32 %v682_v62, %v520_v28 }
 0x169   :  { %v810_v31 = vadd.f32 %v809_v58, %v683_v8 }
 0x16a   :  { %v1141_v56 = vpop.f32.mrf.mxu1 }
 0x16b   :  { %v10805_v46 = vadd.f32 %v1141_v56, %v1021_v50  ;;  %v1015_v50 = vadd.f32 %v1014_v52, %v810_v31 }
 0x16c   :  { %v1143_v34 = vpop.f32.mrf.mxu1 }
 0x16d   :  { %12748 = vst [vmem:[#allocation15_spill] sm:$0xff] %v10805_v46  ;;  %v10807_v26 = vadd.f32 %v1143_v34, %v1023_v19  ;;  %v10810_v46 = vadd.f32 %v1135_v60, %v1015_v50 }
 0x16e   :  { %v1253_v23 = vpop.f32.mrf.mxu0 }
 0x16f   :  { %12749 = vst [vmem:[#allocation42_spill] sm:$0xff] %v10807_v26  ;;  %v1254_v42 = vadd.f32 %v1253_v23, %v10803_v30 }
 0x170   :  { %v1255_v36 = vpop.f32.mrf.mxu0 }
 0x171   :  { %v1256_v23 = vadd.f32 %v1255_v36, %v10810_v46 }
 0x177   :  { %v1405_v22 = vpop.f32.mrf.mxu1 }
 0x178   :  { %v1406_v11 = vadd.f32 %v1405_v22, %v1254_v42 }
 0x179   :  { %v1407_v45 = vpop.f32.mrf.mxu1 }
 0x17a   :  { %v1408_v26 = vadd.f32 %v1407_v45, %v1256_v23 }
 0x180   :  { %v1510_v51 = vpop.f32.mrf.mxu0 }
 0x181   :  { %v1511_v32 = vadd.f32 %v1510_v51, %v1406_v11 }
 0x182   :  { %v1512_v56 = vpop.f32.mrf.mxu0 }
 0x183   :  { %v1513_v22 = vadd.f32 %v1512_v56, %v1408_v26 }
 0x189   :  { %v1600_v63 = vpop.f32.mrf.mxu1 }
 0x18a   :  { %v1601_v47 = vadd.f32 %v1600_v63, %v1511_v32 }
 0x18b   :  { %v1602_v42 = vpop.f32.mrf.mxu1 }
 0x18c   :  { %v1603_v11 = vadd.f32 %v1602_v42, %v1513_v22 }
 0x192   :  { %v1720_v19 = vpop.f32.mrf.mxu0 }
 0x193   :  { %v1721_v34 = vadd.f32 %v1720_v19, %v1601_v47 }
 0x194   :  { %v1722_v30 = vpop.f32.mrf.mxu0 }
 0x195   :  { %v1723_v37 = vadd.f32 %v1722_v30, %v1603_v11 }
 0x19b   :  { %v1808_v27 = vpop.f32.mrf.mxu1 }
 0x19c   :  { %v1809_v51 = vadd.f32 %v1808_v27, %v1721_v34 }
 0x19d   :  { %v1810_v33 = vpop.f32.mrf.mxu1 }
 0x19e   :  { %v1811_v32 = vadd.f32 %v1810_v33, %v1723_v37  ;;  %v9088_v62 = vmul.f32 -1.442695, %v1809_v51  ;;  %v12751_v37 = vld [vmem:[#allocation5_spill] sm:$0xff]  ;;  %v12752_v51 = vld [vmem:[#allocation8_spill] sm:$0xff]  ;;  %v12753_v33 = vld [vmem:[#allocation34_spill] sm:$0xff] }
 0x1a0   :  { %9307 = vtanh.f32 %v1811_v32  ;;  %v9089_v47 = vmul.f32 -1.442695, %v1811_v32  ;;  %v12754_v32 = vld [vmem:[#allocation17_spill] sm:$0xff] }
 0x1a1   :  { %9309 = vpow2.f32 %v9088_v62  ;;  %v12756_v62 = vld [vmem:[#allocation21_spill] sm:$0xff] }
 0x1ad   :  { %v9308_v58 = vpop.eup %9307 }
 0x1ae   :  { %1828 = vrot.lane.b32.xlu0 %v9308_v58, %s9429_s3  ;;  %v9310_v52 = vpop.eup %9309  ;;  %v12755_v58 = vld [vmem:[#allocation20_spill] sm:$0xff] }
 0x1af   :  { %v1819_v60 = vadd.f32 1.0, %v9310_v52  ;;  %v12757_v52 = vld [vmem:[#allocation33_spill] sm:$0xff] }
 0x1b1   :  { %9311 = vrcp.f32 %v1819_v60  ;;  %v12758_v60 = vld [vmem:[#allocation12_spill] sm:$0xff] }
 0x1be   :  { %v9312_v36 = vpop.eup %9311 }
 0x1bf   :  { %v1826_v45 = vmul.f32 0.0, %v9312_v36 }
 0x220   :  { %v1829_v43 = vpop.permute.xlu0 %1828 }
 0x221   :  { %v1831_v26 = vmul.f32 %v9312_v36, %v1829_v43  ;;  %v12759_v36 = vld [vmem:[#allocation37_spill] sm:$0xff]  ;;  %v12760_v43 = vld [vmem:[#allocation16_spill] sm:$0xff] }
 0x223   :  { %1833 = vrot.lane.b32.xlu0 %v1831_v26, %s9429_s3  ;;  %v12761_v26 = vld [vmem:[#allocation41_spill] sm:$0xff] }
 0x295   :  { %v1834_v30 = vpop.permute.xlu0 %1833 }
 0x296   :  { %v10815_v63 = vadd.f32 %v1834_v30, %v1826_v45  ;;  %v12762_v45 = vld [vmem:[#allocation18_spill] sm:$0xff] }
 0x297   :  { %v12763_v30 = vld [vmem:[#allocation6_spill] sm:$0xff] }
 0x298   :  { %9313 = vtanh.f32 %v10815_v63 }
 0x299   :  { %9315 = vpow2.f32 %v9089_v47  ;;  %v12765_v47 = vld [vmem:[#allocation26_spill] sm:$0xff] }
 0x2a5   :  { %v9314_v28 = vpop.eup %9313 }
 0x2a6   :  { %1839 = vrot.lane.b32.xlu1 %v9314_v28, %s9429_s3  ;;  %v9316_v8 = vpop.eup %9315  ;;  %v12764_v28 = vld [vmem:[#allocation23_spill] sm:$0xff] }
 0x2a7   :  { %v1820_v31 = vadd.f32 1.0, %v9316_v8  ;;  %v12766_v8 = vld [vmem:[#allocation35_spill] sm:$0xff] }
 0x2a9   :  { %9317 = vrcp.f32 %v1820_v31  ;;  %v12767_v31 = vld [vmem:[#allocation28_spill] sm:$0xff] }
 0x2b6   :  { %v9318_v50 = vpop.eup %9317 }
 0x318   :  { %v1840_v56 = vpop.permute.xlu1 %1839 }
 0x319   :  { %v10819_v19 = vmul.f32 %v9318_v50, %v1840_v56  ;;  %v12768_v50 = vld [vmem:[#allocation39_spill] sm:$0xff]  ;;  %v12769_v56 = vld [vmem:[#allocation24_spill] sm:$0xff] }
 0x31b   :  { %12750 = vst [vmem:[#allocation19_spill] sm:$0xff] %v10819_v19  ;;  %v1850_v34 = vsel %vm1162_vm1, %v10819_v19, 0  ;;  %v12776_v19 = vld [vmem:[#allocation36_spill] sm:$0xff] }
 0x31c   :  { %v10823_v23 = vand.u32 4294901760, %v1850_v34 }
 0x31e   :  { %v1934_v42 = vsub.f32 %v1850_v34, %v10823_v23  ;;  %2090 = vmatmul.mubr.f32.vlgmr.msra.gmra.mxu1 %v10823_v23  ;;  %v12770_v34 = vld [vmem:[#allocation7_spill] sm:$0xff] }
 0x31f   :  { %2220 = vmatpush1.msra.mxu1 %v10379_v1  ;;  %2281 = vmatprep.mubr.f32.mxu1 %v12741_v20 }
 0x320   :  { %2222 = vmatprep.subr.mxu1 %v10390_v5  ;;  %v1935_v22 = vand.u32 4294901760, %v1934_v42 }
 0x321   :  { %2224 = vmatpush1.msra.mxu1 %v10404_v9 }
 0x322   :  { %2226 = vmatprep.subr.mxu1 %v10418_v2  ;;  %v1936_v11 = vsub.f32 %v1934_v42, %v1935_v22 }
 0x323   :  { %2228 = vmatpush1.msra.mxu1 %v10423_v16 }
 0x324   :  { %2230 = vmatprep.subr.mxu1 %v10434_v17  ;;  %v1937_v27 = vand.u32 4294901760, %v1936_v11  ;;  %v12773_v11 = vld [vmem:[#allocation32_spill] sm:$0xff] }
 0x325   :  { %2232 = vmatpush1.msra.mxu1 %v10456_v41 }
 0x326   :  { %2234 = vmatprep.subr.mxu1 %v10466_v53  ;;  %1938 = vmatmul.mubr.f32.vlgmr.msra.gmra.mxu0 %v1937_v27  ;;  %v12774_v27 = vld [vmem:[#allocation10_spill] sm:$0xff] }
 0x327   :  { %2117 = vmatpush1.msra.mxu0 %v10413_v14  ;;  %2236 = vmatpush1.msra.mxu1 %v10479_v12 }
 0x328   :  { %2120 = vmatprep.subr.mxu0 %v10429_v55  ;;  %2238 = vmatprep.subr.mxu1 %v10493_v61 }
 0x329   :  { %2123 = vmatpush1.msra.mxu0 %v10452_v6  ;;  %2240 = vmatpush1.msra.mxu1 %v10506_v40 }
 0x32a   :  { %2126 = vmatprep.subr.mxu0 %v10462_v54  ;;  %2242 = vmatprep.subr.mxu1 %v10518_v0 }
 0x32b   :  { %2129 = vmatpush1.msra.mxu0 %v10475_v25  ;;  %2244 = vmatpush1.msra.mxu1 %v10531_v18 }
 0x32c   :  { %2132 = vmatprep.subr.mxu0 %v10485_v35  ;;  %2246 = vmatprep.subr.mxu1 %v10533_v4 }
 0x32d   :  { %2135 = vmatpush1.msra.mxu0 %v10512_v59  ;;  %2248 = vmatpush1.msra.mxu1 %v10556_v57 }
 0x32e   :  { %2138 = vmatprep.subr.mxu0 %v10527_v39  ;;  %2285 = vmatmul.mubr.f32.vlgmr.msra.gmra.mxu1 %v1935_v22  ;;  %v12772_v22 = vld [vmem:[#allocation9_spill] sm:$0xff] }
 0x32f   :  { %2428 = vmatprep.subr.mxu1 %v10377_v3  ;;  %2141 = vmatpush1.msra.mxu0 %v10539_v38 }
 0x330   :  { %2430 = vmatpush1.msra.mxu1 %v10379_v1  ;;  %2144 = vmatprep.subr.mxu0 %v10550_v10 }
 0x331   :  { %2432 = vmatprep.subr.mxu1 %v10390_v5  ;;  %2147 = vmatpush1.msra.mxu0 %v10562_v15 }
 0x332   :  { %2434 = vmatpush1.msra.mxu1 %v10404_v9  ;;  %2150 = vmatprep.subr.mxu0 %v10574_v7 }
 0x333   :  { %2436 = vmatprep.subr.mxu1 %v10418_v2  ;;  %2153 = vmatpush1.msra.mxu0 %v10584_v48 }
 0x334   :  { %2438 = vmatpush1.msra.mxu1 %v10423_v16  ;;  %2156 = vmatprep.subr.mxu0 %v10594_v49 }
 0x335   :  { %2440 = vmatprep.subr.mxu1 %v10434_v17  ;;  %2159 = vmatpush1.msra.mxu0 %v10606_v13 }
 0x336   :  { %2192 = vmatprep.mubr.f32.mxu0 %v12741_v20  ;;  %2442 = vmatpush1.msra.mxu1 %v10456_v41 }
 0x337   :  { %2195 = vmatmul.mubr.f32.vlgmr.msra.gmra.mxu0 %v1934_v42  ;;  %2310 = vmatprep.subr.mxu0 %v10443_v24  ;;  %v12771_v42 = vld [vmem:[#allocation30_spill] sm:$0xff] }
 0x338   :  { %2444 = vmatprep.subr.mxu1 %v10466_v53  ;;  %2314 = vmatpush1.msra.mxu0 %v10449_v21 }
 0x339   :  { %2446 = vmatpush1.msra.mxu1 %v10479_v12  ;;  %2318 = vmatprep.subr.mxu0 %v10469_v29 }
 0x33a   :  { %2448 = vmatprep.subr.mxu1 %v10493_v61  ;;  %2322 = vmatpush1.msra.mxu0 %v10496_v44 }
 0x33b   :  { %2450 = vmatpush1.msra.mxu1 %v10506_v40  ;;  %2326 = vmatprep.subr.mxu0 %v12751_v37 }
 0x33c   :  { %2452 = vmatprep.subr.mxu1 %v10518_v0  ;;  %2330 = vmatpush1.msra.mxu0 %v12752_v51 }
 0x33d   :  { %2454 = vmatpush1.msra.mxu1 %v10531_v18  ;;  %2334 = vmatprep.subr.mxu0 %v12753_v33 }
 0x33e   :  { %2456 = vmatprep.subr.mxu1 %v10533_v4  ;;  %2338 = vmatpush1.msra.mxu0 %v12754_v32 }
 0x33f   :  { %2458 = vmatpush1.msra.mxu1 %v10556_v57  ;;  %2491 = vmatprep.mubr.f32.mxu1 %v12741_v20 }
 0x340   :  { %2342 = vmatprep.subr.mxu0 %v12755_v58  ;;  %2493 = vmatmul.mubr.f32.vlgmr.msra.gmra.mxu1 %v10823_v23 }
 0x341   :  { %2346 = vmatpush1.msra.mxu0 %v12756_v62  ;;  %2403 = vmatprep.mubr.f32.mxu0 %v12741_v20 }
 0x342   :  { %2350 = vmatprep.subr.mxu0 %v12757_v52  ;;  %2649 = vmatprep.subr.mxu1 %v12758_v60 }
 0x343   :  { %2354 = vmatpush1.msra.mxu0 %v12759_v36  ;;  %2655 = vmatpush1.msra.mxu1 %v12760_v43 }
 0x344   :  { %2358 = vmatprep.subr.mxu0 %v12761_v26  ;;  %2661 = vmatprep.subr.mxu1 %v12762_v45 }
 0x345   :  { %2362 = vmatpush1.msra.mxu0 %v12763_v30  ;;  %2667 = vmatpush1.msra.mxu1 %v12764_v28  ;;  %v1846_v30 = vrot.slane %v10810_v46, 2 }
 0x346   :  { %2366 = vmatprep.subr.mxu0 %v12765_v47  ;;  %2673 = vmatprep.subr.mxu1 %v12766_v8 }
 0x347   :  { %2370 = vmatpush1.msra.mxu0 %v12767_v31  ;;  %2679 = vmatpush1.msra.mxu1 %v12768_v50 }
 0x348   :  { %2405 = vmatmul.mubr.f32.vlgmr.msra.gmra.mxu0 %v10823_v23  ;;  %2685 = vmatprep.subr.mxu1 %v12769_v56  ;;  %v12775_v23 = vld [vmem:[#allocation11_spill] sm:$0xff] }
 0x349   :  { %2691 = vmatpush1.msra.mxu1 %v12770_v34  ;;  %2553 = vmatprep.subr.mxu0 %v10377_v3 }
 0x34a   :  { %2697 = vmatprep.subr.mxu1 %v12771_v42  ;;  %2555 = vmatpush1.msra.mxu0 %v10379_v1  ;;  %v12777_v42 = vld [vmem:[#allocation38_spill] sm:$0xff] }
 0x34b   :  { %2703 = vmatpush1.msra.mxu1 %v12772_v22  ;;  %2557 = vmatprep.subr.mxu0 %v10390_v5  ;;  %v12778_v22 = vld [vmem:[#allocation13_spill] sm:$0xff] }
 0x34c   :  { %2709 = vmatprep.subr.mxu1 %v12773_v11  ;;  %2559 = vmatpush1.msra.mxu0 %v10404_v9 }
 0x34d   :  { %2715 = vmatpush1.msra.mxu1 %v12774_v27  ;;  %2561 = vmatprep.subr.mxu0 %v10418_v2 }
 0x34e   :  { %2721 = vmatprep.subr.mxu1 %v12775_v23  ;;  %2563 = vmatpush1.msra.mxu0 %v10423_v16 }
 0x34f   :  { %2727 = vmatpush1.msra.mxu1 %v12776_v19  ;;  %2565 = vmatprep.subr.mxu0 %v10434_v17 }
 0x350   :  { %2733 = vmatprep.subr.mxu1 %v12777_v42  ;;  %2567 = vmatpush1.msra.mxu0 %v10456_v41  ;;  %v12780_v42 = vld [vmem:[#allocation14_spill] sm:$0xff] }
 0x351   :  { %2739 = vmatpush1.msra.mxu1 %v12778_v22  ;;  %2569 = vmatprep.subr.mxu0 %v10466_v53  ;;  %v12779_v22 = vld [vmem:[#allocation22_spill] sm:$0xff]  ;;  %v1845_v19 = vrot.slane %v12780_v42, 2 }
 0x352   :  { %2772 = vmatprep.mubr.f32.mxu1 %v12741_v20  ;;  %2902 = vmatprep.subr.mxu1 %v10377_v3 }
 0x353   :  { %2571 = vmatpush1.msra.mxu0 %v10479_v12  ;;  %2616 = vmatprep.mubr.f32.mxu0 %v12741_v20 }
 0x354   :  { %2573 = vmatprep.subr.mxu0 %v10493_v61 }
 0x355   :  { %2575 = vmatpush1.msra.mxu0 %v10506_v40 }
 0x356   :  { %2577 = vmatprep.subr.mxu0 %v10518_v0 }
 0x357   :  { %2579 = vmatpush1.msra.mxu0 %v10531_v18 }
 0x358   :  { %2581 = vmatprep.subr.mxu0 %v10533_v4 }
 0x359   :  { %2583 = vmatpush1.msra.mxu0 %v10556_v57 }
 0x35a   :  { %2798 = vmatprep.subr.mxu0 %v12779_v22 }
 0x3de   :  { %v2091_v11 = vpop.f32.mrf.mxu1 }
 0x3e0   :  { %v2093_v50 = vpop.f32.mrf.mxu1 }
 0x3e6   :  { %v1939_v23 = vpop.f32.mrf.mxu0 }
 0x3e7   :  { %v1940_v27 = vadd.f32 %v1939_v23, %v1845_v19 }
 0x3e8   :  { %v1941_v56 = vpop.f32.mrf.mxu0 }
 0x3e9   :  { %v2092_v34 = vadd.f32 %v2091_v11, %v1940_v27  ;;  %v1942_v45 = vadd.f32 %v1941_v56, %v1846_v30 }
 0x3eb   :  { %v2094_v43 = vadd.f32 %v2093_v50, %v1942_v45 }
 0x3ee   :  { %v2286_v47 = vpop.f32.mrf.mxu1 }
 0x3f0   :  { %v2288_v60 = vpop.f32.mrf.mxu1 }
 0x3f7   :  { %v2196_v31 = vpop.f32.mrf.mxu0 }
 0x3f8   :  { %v2197_v8 = vadd.f32 %v2196_v31, %v2092_v34 }
 0x3f9   :  { %v2198_v26 = vpop.f32.mrf.mxu0 }
 0x3fa   :  { %v2287_v28 = vadd.f32 %v2286_v47, %v2197_v8  ;;  %v2199_v36 = vadd.f32 %v2198_v26, %v2094_v43 }
 0x3fc   :  { %v2289_v62 = vadd.f32 %v2288_v60, %v2199_v36 }
 0x400   :  { %v2494_v22 = vpop.f32.mrf.mxu1 }
 0x402   :  { %v2496_v27 = vpop.f32.mrf.mxu1 }
 0x408   :  { %v2406_v52 = vpop.f32.mrf.mxu0 }
 0x409   :  { %v2407_v42 = vadd.f32 %v2406_v52, %v2287_v28 }
 0x40a   :  { %v2408_v19 = vpop.f32.mrf.mxu0 }
 0x40b   :  { %v2495_v23 = vadd.f32 %v2494_v22, %v2407_v42  ;;  %v2409_v11 = vadd.f32 %v2408_v19, %v2289_v62 }
 0x40d   :  { %v2497_v58 = vadd.f32 %v2496_v27, %v2409_v11  ;;  %v9090_v47 = vmul.f32 -1.442695, %v2495_v23 }
 0x40f   :  { %9319 = vtanh.f32 %v2497_v58  ;;  %v9091_v28 = vmul.f32 -1.442695, %v2497_v58 }
 0x410   :  { %9321 = vpow2.f32 %v9090_v47  ;;  %v12783_v47 = vld [vmem:[#allocation21_spill] sm:$0xff] }
 0x41c   :  { %v9320_v31 = vpop.eup %9319 }
 0x41d   :  { %2514 = vrot.lane.b32.xlu1 %v9320_v31, %s9429_s3  ;;  %v9322_v30 = vpop.eup %9321  ;;  %v12782_v31 = vld [vmem:[#allocation20_spill] sm:$0xff] }
 0x41e   :  { %v2505_v8 = vadd.f32 1.0, %v9322_v30  ;;  %v12784_v30 = vld [vmem:[#allocation33_spill] sm:$0xff] }
 0x420   :  { %9323 = vrcp.f32 %v2505_v8  ;;  %v12785_v8 = vld [vmem:[#allocation12_spill] sm:$0xff] }
 0x42d   :  { %v9324_v43 = vpop.eup %9323 }
 0x42e   :  { %v2512_v52 = vmul.f32 %v9324_v43, %v10815_v63 }
 0x48f   :  { %v2515_v26 = vpop.permute.xlu1 %2514 }
 0x490   :  { %v2517_v45 = vmul.f32 %v9324_v43, %v2515_v26  ;;  %v12786_v43 = vld [vmem:[#allocation37_spill] sm:$0xff]  ;;  %v12787_v26 = vld [vmem:[#allocation16_spill] sm:$0xff] }
 0x492   :  { %2519 = vrot.lane.b32.xlu0 %v2517_v45, %s9429_s3  ;;  %v12788_v45 = vld [vmem:[#allocation41_spill] sm:$0xff] }
 0x504   :  { %v2520_v60 = vpop.permute.xlu0 %2519 }
 0x505   :  { %v10936_v62 = vadd.f32 %v2520_v60, %v2512_v52  ;;  %v12789_v52 = vld [vmem:[#allocation18_spill] sm:$0xff] }
 0x506   :  { %v12790_v60 = vld [vmem:[#allocation6_spill] sm:$0xff] }
 0x507   :  { %9325 = vtanh.f32 %v10936_v62 }
 0x508   :  { %9327 = vpow2.f32 %v9091_v28  ;;  %v12792_v28 = vld [vmem:[#allocation26_spill] sm:$0xff] }
 0x514   :  { %v9326_v36 = vpop.eup %9325 }
 0x515   :  { %2525 = vrot.lane.b32.xlu1 %v9326_v36, %s9429_s3  ;;  %v9328_v50 = vpop.eup %9327  ;;  %v12791_v36 = vld [vmem:[#allocation23_spill] sm:$0xff] }
 0x516   :  { %v2506_v56 = vadd.f32 1.0, %v9328_v50  ;;  %v12793_v50 = vld [vmem:[#allocation35_spill] sm:$0xff] }
 0x518   :  { %9329 = vrcp.f32 %v2506_v56  ;;  %v12794_v56 = vld [vmem:[#allocation28_spill] sm:$0xff] }
 0x525   :  { %v9330_v34 = vpop.eup %9329 }
 0x587   :  { %v2526_v42 = vpop.permute.xlu1 %2525 }
 0x588   :  { %v10940_v22 = vmul.f32 %v9330_v34, %v2526_v42  ;;  %v12795_v34 = vld [vmem:[#allocation39_spill] sm:$0xff]  ;;  %v12796_v42 = vld [vmem:[#allocation24_spill] sm:$0xff] }
 0x58a   :  { %12781 = vst [vmem:[#allocation45_spill] sm:$0xff] %v10940_v22  ;;  %v2534_v63 = vsel %vm1162_vm1, %v10940_v22, 0  ;;  %v12803_v22 = vld [vmem:[#allocation36_spill] sm:$0xff] }
 0x58b   :  { %v10944_v19 = vand.u32 4294901760, %v2534_v63 }
 0x58d   :  { %v2618_v23 = vsub.f32 %v2534_v63, %v10944_v19  ;;  %2774 = vmatmul.mubr.f32.vlgmr.msra.gmra.mxu1 %v10944_v19  ;;  %v12797_v63 = vld [vmem:[#allocation7_spill] sm:$0xff] }
 0x58e   :  { %2904 = vmatpush1.msra.mxu1 %v10379_v1  ;;  %2965 = vmatprep.mubr.f32.mxu1 %v12741_v20 }
 0x58f   :  { %2906 = vmatprep.subr.mxu1 %v10390_v5  ;;  %v2619_v58 = vand.u32 4294901760, %v2618_v23 }
 0x590   :  { %2908 = vmatpush1.msra.mxu1 %v10404_v9 }
 0x591   :  { %2910 = vmatprep.subr.mxu1 %v10418_v2  ;;  %v2620_v11 = vsub.f32 %v2618_v23, %v2619_v58 }
 0x592   :  { %2912 = vmatpush1.msra.mxu1 %v10423_v16 }
 0x593   :  { %2914 = vmatprep.subr.mxu1 %v10434_v17  ;;  %v2621_v27 = vand.u32 4294901760, %v2620_v11  ;;  %v12800_v11 = vld [vmem:[#allocation32_spill] sm:$0xff] }
 0x594   :  { %2916 = vmatpush1.msra.mxu1 %v10456_v41 }
 0x595   :  { %2918 = vmatprep.subr.mxu1 %v10466_v53  ;;  %2622 = vmatmul.mubr.f32.vlgmr.msra.gmra.mxu0 %v2621_v27  ;;  %v12801_v27 = vld [vmem:[#allocation10_spill] sm:$0xff] }
 0x596   :  { %2801 = vmatpush1.msra.mxu0 %v10413_v14  ;;  %2920 = vmatpush1.msra.mxu1 %v10479_v12 }
 0x597   :  { %2804 = vmatprep.subr.mxu0 %v10429_v55  ;;  %2922 = vmatprep.subr.mxu1 %v10493_v61 }
 0x598   :  { %2807 = vmatpush1.msra.mxu0 %v10452_v6  ;;  %2924 = vmatpush1.msra.mxu1 %v10506_v40 }
 0x599   :  { %2810 = vmatprep.subr.mxu0 %v10462_v54  ;;  %2926 = vmatprep.subr.mxu1 %v10518_v0 }
 0x59a   :  { %2813 = vmatpush1.msra.mxu0 %v10475_v25  ;;  %2928 = vmatpush1.msra.mxu1 %v10531_v18 }
 0x59b   :  { %2816 = vmatprep.subr.mxu0 %v10485_v35  ;;  %2930 = vmatprep.subr.mxu1 %v10533_v4 }
 0x59c   :  { %2819 = vmatpush1.msra.mxu0 %v10512_v59  ;;  %2932 = vmatpush1.msra.mxu1 %v10556_v57 }
 0x59d   :  { %2822 = vmatprep.subr.mxu0 %v10527_v39  ;;  %2969 = vmatmul.mubr.f32.vlgmr.msra.gmra.mxu1 %v2619_v58  ;;  %v12799_v58 = vld [vmem:[#allocation9_spill] sm:$0xff] }
 0x59e   :  { %3112 = vmatprep.subr.mxu1 %v10377_v3  ;;  %2825 = vmatpush1.msra.mxu0 %v10539_v38 }
 0x59f   :  { %3114 = vmatpush1.msra.mxu1 %v10379_v1  ;;  %2828 = vmatprep.subr.mxu0 %v10550_v10 }
 0x5a0   :  { %3116 = vmatprep.subr.mxu1 %v10390_v5  ;;  %2831 = vmatpush1.msra.mxu0 %v10562_v15 }
 0x5a1   :  { %3118 = vmatpush1.msra.mxu1 %v10404_v9  ;;  %2834 = vmatprep.subr.mxu0 %v10574_v7 }
 0x5a2   :  { %3120 = vmatprep.subr.mxu1 %v10418_v2  ;;  %2837 = vmatpush1.msra.mxu0 %v10584_v48 }
 0x5a3   :  { %3122 = vmatpush1.msra.mxu1 %v10423_v16  ;;  %2840 = vmatprep.subr.mxu0 %v10594_v49 }
 0x5a4   :  { %3124 = vmatprep.subr.mxu1 %v10434_v17  ;;  %2843 = vmatpush1.msra.mxu0 %v10606_v13 }
 0x5a5   :  { %2876 = vmatprep.mubr.f32.mxu0 %v12741_v20  ;;  %3126 = vmatpush1.msra.mxu1 %v10456_v41 }
 0x5a6   :  { %2879 = vmatmul.mubr.f32.vlgmr.msra.gmra.mxu0 %v2618_v23  ;;  %2994 = vmatprep.subr.mxu0 %v10443_v24  ;;  %v12798_v23 = vld [vmem:[#allocation30_spill] sm:$0xff] }
 0x5a7   :  { %3128 = vmatprep.subr.mxu1 %v10466_v53  ;;  %2998 = vmatpush1.msra.mxu0 %v10449_v21 }
 0x5a8   :  { %3130 = vmatpush1.msra.mxu1 %v10479_v12  ;;  %3002 = vmatprep.subr.mxu0 %v10469_v29 }
 0x5a9   :  { %3132 = vmatprep.subr.mxu1 %v10493_v61  ;;  %3006 = vmatpush1.msra.mxu0 %v10496_v44 }
 0x5aa   :  { %3134 = vmatpush1.msra.mxu1 %v10506_v40  ;;  %3010 = vmatprep.subr.mxu0 %v12751_v37 }
 0x5ab   :  { %3136 = vmatprep.subr.mxu1 %v10518_v0  ;;  %3014 = vmatpush1.msra.mxu0 %v12752_v51 }
 0x5ac   :  { %3138 = vmatpush1.msra.mxu1 %v10531_v18  ;;  %3018 = vmatprep.subr.mxu0 %v12753_v33 }
 0x5ad   :  { %3140 = vmatprep.subr.mxu1 %v10533_v4  ;;  %3022 = vmatpush1.msra.mxu0 %v12754_v32 }
 0x5ae   :  { %3142 = vmatpush1.msra.mxu1 %v10556_v57  ;;  %3175 = vmatprep.mubr.f32.mxu1 %v12741_v20 }
 0x5af   :  { %3026 = vmatprep.subr.mxu0 %v12782_v31  ;;  %3177 = vmatmul.mubr.f32.vlgmr.msra.gmra.mxu1 %v10944_v19 }
 0x5b0   :  { %3030 = vmatpush1.msra.mxu0 %v12783_v47  ;;  %3087 = vmatprep.mubr.f32.mxu0 %v12741_v20 }
 0x5b1   :  { %3034 = vmatprep.subr.mxu0 %v12784_v30  ;;  %3333 = vmatprep.subr.mxu1 %v12785_v8 }
 0x5b2   :  { %3038 = vmatpush1.msra.mxu0 %v12786_v43  ;;  %3339 = vmatpush1.msra.mxu1 %v12787_v26 }
 0x5b3   :  { %3042 = vmatprep.subr.mxu0 %v12788_v45  ;;  %3345 = vmatprep.subr.mxu1 %v12789_v52 }
 0x5b4   :  { %3046 = vmatpush1.msra.mxu0 %v12790_v60  ;;  %3351 = vmatpush1.msra.mxu1 %v12791_v36  ;;  %v2530_v60 = vrot.slane %v10810_v46, 4 }
 0x5b5   :  { %3050 = vmatprep.subr.mxu0 %v12792_v28  ;;  %3357 = vmatprep.subr.mxu1 %v12793_v50 }
 0x5b6   :  { %3054 = vmatpush1.msra.mxu0 %v12794_v56  ;;  %3363 = vmatpush1.msra.mxu1 %v12795_v34 }
 0x5b7   :  { %3089 = vmatmul.mubr.f32.vlgmr.msra.gmra.mxu0 %v10944_v19  ;;  %3369 = vmatprep.subr.mxu1 %v12796_v42  ;;  %v12802_v19 = vld [vmem:[#allocation11_spill] sm:$0xff] }
 0x5b8   :  { %3375 = vmatpush1.msra.mxu1 %v12797_v63  ;;  %3237 = vmatprep.subr.mxu0 %v10377_v3 }
 0x5b9   :  { %3381 = vmatprep.subr.mxu1 %v12798_v23  ;;  %3239 = vmatpush1.msra.mxu0 %v10379_v1  ;;  %v12804_v23 = vld [vmem:[#allocation38_spill] sm:$0xff] }
 0x5ba   :  { %3387 = vmatpush1.msra.mxu1 %v12799_v58  ;;  %3241 = vmatprep.subr.mxu0 %v10390_v5  ;;  %v12805_v58 = vld [vmem:[#allocation13_spill] sm:$0xff] }
 0x5bb   :  { %3393 = vmatprep.subr.mxu1 %v12800_v11  ;;  %3243 = vmatpush1.msra.mxu0 %v10404_v9 }
 0x5bc   :  { %3399 = vmatpush1.msra.mxu1 %v12801_v27  ;;  %3245 = vmatprep.subr.mxu0 %v10418_v2 }
 0x5bd   :  { %3405 = vmatprep.subr.mxu1 %v12802_v19  ;;  %3247 = vmatpush1.msra.mxu0 %v10423_v16 }
 0x5be   :  { %3411 = vmatpush1.msra.mxu1 %v12803_v22  ;;  %3249 = vmatprep.subr.mxu0 %v10434_v17 }
 0x5bf   :  { %3417 = vmatprep.subr.mxu1 %v12804_v23  ;;  %3251 = vmatpush1.msra.mxu0 %v10456_v41  ;;  %v12807_v23 = vld [vmem:[#allocation14_spill] sm:$0xff] }
 0x5c0   :  { %3423 = vmatpush1.msra.mxu1 %v12805_v58  ;;  %3253 = vmatprep.subr.mxu0 %v10466_v53  ;;  %v12806_v58 = vld [vmem:[#allocation22_spill] sm:$0xff]  ;;  %v2529_v22 = vrot.slane %v12807_v23, 4 }
 0x5c1   :  { %3456 = vmatprep.mubr.f32.mxu1 %v12741_v20  ;;  %3586 = vmatprep.subr.mxu1 %v10377_v3 }
 0x5c2   :  { %3255 = vmatpush1.msra.mxu0 %v10479_v12  ;;  %3300 = vmatprep.mubr.f32.mxu0 %v12741_v20 }
 0x5c3   :  { %3257 = vmatprep.subr.mxu0 %v10493_v61 }
 0x5c4   :  { %3259 = vmatpush1.msra.mxu0 %v10506_v40 }
 0x5c5   :  { %3261 = vmatprep.subr.mxu0 %v10518_v0 }
 0x5c6   :  { %3263 = vmatpush1.msra.mxu0 %v10531_v18 }
 0x5c7   :  { %3265 = vmatprep.subr.mxu0 %v10533_v4 }
 0x5c8   :  { %3267 = vmatpush1.msra.mxu0 %v10556_v57 }
 0x5c9   :  { %3482 = vmatprep.subr.mxu0 %v12806_v58 }
 0x64d   :  { %v2775_v11 = vpop.f32.mrf.mxu1 }
 0x64f   :  { %v2777_v34 = vpop.f32.mrf.mxu1 }
 0x655   :  { %v2623_v19 = vpop.f32.mrf.mxu0 }
 0x656   :  { %v2624_v27 = vadd.f32 %v2623_v19, %v2529_v22 }
 0x657   :  { %v2625_v42 = vpop.f32.mrf.mxu0 }
 0x658   :  { %v2776_v63 = vadd.f32 %v2775_v11, %v2624_v27  ;;  %v2626_v52 = vadd.f32 %v2625_v42, %v2530_v60 }
 0x65a   :  { %v2778_v26 = vadd.f32 %v2777_v34, %v2626_v52 }
 0x65d   :  { %v2970_v28 = vpop.f32.mrf.mxu1 }
 0x65f   :  { %v2972_v8 = vpop.f32.mrf.mxu1 }
 0x666   :  { %v2880_v56 = vpop.f32.mrf.mxu0 }
 0x667   :  { %v2881_v50 = vadd.f32 %v2880_v56, %v2776_v63 }
 0x668   :  { %v2882_v45 = vpop.f32.mrf.mxu0 }
 0x669   :  { %v2971_v36 = vadd.f32 %v2970_v28, %v2881_v50  ;;  %v2883_v43 = vadd.f32 %v2882_v45, %v2778_v26 }
 0x66b   :  { %v2973_v47 = vadd.f32 %v2972_v8, %v2883_v43 }
 0x66f   :  { %v3178_v58 = vpop.f32.mrf.mxu1 }
 0x671   :  { %v3180_v27 = vpop.f32.mrf.mxu1 }
 0x677   :  { %v3090_v30 = vpop.f32.mrf.mxu0 }
 0x678   :  { %v3091_v23 = vadd.f32 %v3090_v30, %v2971_v36 }
 0x679   :  { %v3092_v22 = vpop.f32.mrf.mxu0 }
 0x67a   :  { %v3179_v19 = vadd.f32 %v3178_v58, %v3091_v23  ;;  %v3093_v11 = vadd.f32 %v3092_v22, %v2973_v47 }
 0x67c   :  { %v3181_v31 = vadd.f32 %v3180_v27, %v3093_v11  ;;  %v9092_v28 = vmul.f32 -1.442695, %v3179_v19 }
 0x67e   :  { %9331 = vtanh.f32 %v3181_v31  ;;  %v9093_v36 = vmul.f32 -1.442695, %v3181_v31 }
 0x67f   :  { %9333 = vpow2.f32 %v9092_v28  ;;  %v12810_v28 = vld [vmem:[#allocation21_spill] sm:$0xff] }
 0x68b   :  { %v9332_v56 = vpop.eup %9331 }
 0x68c   :  { %3198 = vrot.lane.b32.xlu0 %v9332_v56, %s9429_s3  ;;  %v9334_v60 = vpop.eup %9333  ;;  %v12809_v56 = vld [vmem:[#allocation20_spill] sm:$0xff] }
 0x68d   :  { %v3189_v50 = vadd.f32 1.0, %v9334_v60  ;;  %v12811_v60 = vld [vmem:[#allocation33_spill] sm:$0xff] }
 0x68f   :  { %9335 = vrcp.f32 %v3189_v50  ;;  %v12812_v50 = vld [vmem:[#allocation12_spill] sm:$0xff] }
 0x69c   :  { %v9336_v26 = vpop.eup %9335 }
 0x69d   :  { %v3196_v30 = vmul.f32 %v9336_v26, %v10936_v62 }
 0x6fe   :  { %v3199_v45 = vpop.permute.xlu0 %3198 }
 0x6ff   :  { %v3201_v52 = vmul.f32 %v9336_v26, %v3199_v45  ;;  %v12813_v26 = vld [vmem:[#allocation37_spill] sm:$0xff]  ;;  %v12814_v45 = vld [vmem:[#allocation16_spill] sm:$0xff] }
 0x701   :  { %3203 = vrot.lane.b32.xlu1 %v3201_v52, %s9429_s3  ;;  %v12815_v52 = vld [vmem:[#allocation41_spill] sm:$0xff] }
 0x773   :  { %v3204_v8 = vpop.permute.xlu1 %3203 }
 0x774   :  { %v11057_v47 = vadd.f32 %v3204_v8, %v3196_v30  ;;  %v12816_v30 = vld [vmem:[#allocation18_spill] sm:$0xff] }
 0x775   :  { %v12817_v8 = vld [vmem:[#allocation6_spill] sm:$0xff] }
 0x776   :  { %9337 = vtanh.f32 %v11057_v47 }
 0x777   :  { %9339 = vpow2.f32 %v9093_v36  ;;  %v12819_v36 = vld [vmem:[#allocation26_spill] sm:$0xff] }
 0x783   :  { %v9338_v43 = vpop.eup %9337 }
 0x784   :  { %3209 = vrot.lane.b32.xlu0 %v9338_v43, %s9429_s3  ;;  %v9340_v34 = vpop.eup %9339  ;;  %v12818_v43 = vld [vmem:[#allocation23_spill] sm:$0xff] }
 0x785   :  { %v3190_v42 = vadd.f32 1.0, %v9340_v34  ;;  %v12820_v34 = vld [vmem:[#allocation35_spill] sm:$0xff] }
 0x787   :  { %9341 = vrcp.f32 %v3190_v42  ;;  %v12821_v42 = vld [vmem:[#allocation28_spill] sm:$0xff] }
 0x794   :  { %v9342_v63 = vpop.eup %9341 }
 0x7f6   :  { %v3210_v23 = vpop.permute.xlu0 %3209 }
 0x7f7   :  { %v11061_v58 = vmul.f32 %v9342_v63, %v3210_v23  ;;  %v12822_v63 = vld [vmem:[#allocation39_spill] sm:$0xff]  ;;  %v12823_v23 = vld [vmem:[#allocation24_spill] sm:$0xff] }
 0x7f9   :  { %12808 = vst [vmem:[#allocation25_spill] sm:$0xff] %v11061_v58  ;;  %v3218_v62 = vsel %vm1162_vm1, %v11061_v58, 0  ;;  %v12830_v58 = vld [vmem:[#allocation36_spill] sm:$0xff] }
 0x7fa   :  { %v11065_v22 = vand.u32 4294901760, %v3218_v62 }
 0x7fc   :  { %v3302_v19 = vsub.f32 %v3218_v62, %v11065_v22  ;;  %3458 = vmatmul.mubr.f32.vlgmr.msra.gmra.mxu1 %v11065_v22  ;;  %v12824_v62 = vld [vmem:[#allocation7_spill] sm:$0xff] }
 0x7fd   :  { %3588 = vmatpush1.msra.mxu1 %v10379_v1  ;;  %3649 = vmatprep.mubr.f32.mxu1 %v12741_v20 }
 0x7fe   :  { %3590 = vmatprep.subr.mxu1 %v10390_v5  ;;  %v3303_v31 = vand.u32 4294901760, %v3302_v19 }
 0x7ff   :  { %3592 = vmatpush1.msra.mxu1 %v10404_v9 }
 0x800   :  { %3594 = vmatprep.subr.mxu1 %v10418_v2  ;;  %v3304_v11 = vsub.f32 %v3302_v19, %v3303_v31 }
 0x801   :  { %3596 = vmatpush1.msra.mxu1 %v10423_v16 }
 0x802   :  { %3598 = vmatprep.subr.mxu1 %v10434_v17  ;;  %v3305_v27 = vand.u32 4294901760, %v3304_v11  ;;  %v12827_v11 = vld [vmem:[#allocation32_spill] sm:$0xff] }
 0x803   :  { %3600 = vmatpush1.msra.mxu1 %v10456_v41 }
 0x804   :  { %3602 = vmatprep.subr.mxu1 %v10466_v53  ;;  %3306 = vmatmul.mubr.f32.vlgmr.msra.gmra.mxu0 %v3305_v27  ;;  %v12828_v27 = vld [vmem:[#allocation10_spill] sm:$0xff] }
 0x805   :  { %3485 = vmatpush1.msra.mxu0 %v10413_v14  ;;  %3604 = vmatpush1.msra.mxu1 %v10479_v12 }
 0x806   :  { %3488 = vmatprep.subr.mxu0 %v10429_v55  ;;  %3606 = vmatprep.subr.mxu1 %v10493_v61 }
 0x807   :  { %3491 = vmatpush1.msra.mxu0 %v10452_v6  ;;  %3608 = vmatpush1.msra.mxu1 %v10506_v40 }
 0x808   :  { %3494 = vmatprep.subr.mxu0 %v10462_v54  ;;  %3610 = vmatprep.subr.mxu1 %v10518_v0 }
 0x809   :  { %3497 = vmatpush1.msra.mxu0 %v10475_v25  ;;  %3612 = vmatpush1.msra.mxu1 %v10531_v18 }
 0x80a   :  { %3500 = vmatprep.subr.mxu0 %v10485_v35  ;;  %3614 = vmatprep.subr.mxu1 %v10533_v4 }
 0x80b   :  { %3503 = vmatpush1.msra.mxu0 %v10512_v59  ;;  %3616 = vmatpush1.msra.mxu1 %v10556_v57 }
 0x80c   :  { %3506 = vmatprep.subr.mxu0 %v10527_v39  ;;  %3653 = vmatmul.mubr.f32.vlgmr.msra.gmra.mxu1 %v3303_v31  ;;  %v12826_v31 = vld [vmem:[#allocation9_spill] sm:$0xff] }
 0x80d   :  { %3796 = vmatprep.subr.mxu1 %v10377_v3  ;;  %3509 = vmatpush1.msra.mxu0 %v10539_v38 }
 0x80e   :  { %3798 = vmatpush1.msra.mxu1 %v10379_v1  ;;  %3512 = vmatprep.subr.mxu0 %v10550_v10 }
 0x80f   :  { %3800 = vmatprep.subr.mxu1 %v10390_v5  ;;  %3515 = vmatpush1.msra.mxu0 %v10562_v15 }
 0x810   :  { %3802 = vmatpush1.msra.mxu1 %v10404_v9  ;;  %3518 = vmatprep.subr.mxu0 %v10574_v7 }
 0x811   :  { %3804 = vmatprep.subr.mxu1 %v10418_v2  ;;  %3521 = vmatpush1.msra.mxu0 %v10584_v48 }
 0x812   :  { %3806 = vmatpush1.msra.mxu1 %v10423_v16  ;;  %3524 = vmatprep.subr.mxu0 %v10594_v49 }
 0x813   :  { %3808 = vmatprep.subr.mxu1 %v10434_v17  ;;  %3527 = vmatpush1.msra.mxu0 %v10606_v13 }
 0x814   :  { %3560 = vmatprep.mubr.f32.mxu0 %v12741_v20  ;;  %3810 = vmatpush1.msra.mxu1 %v10456_v41 }
 0x815   :  { %3563 = vmatmul.mubr.f32.vlgmr.msra.gmra.mxu0 %v3302_v19  ;;  %3678 = vmatprep.subr.mxu0 %v10443_v24  ;;  %v12825_v19 = vld [vmem:[#allocation30_spill] sm:$0xff] }
 0x816   :  { %3812 = vmatprep.subr.mxu1 %v10466_v53  ;;  %3682 = vmatpush1.msra.mxu0 %v10449_v21 }
 0x817   :  { %3814 = vmatpush1.msra.mxu1 %v10479_v12  ;;  %3686 = vmatprep.subr.mxu0 %v10469_v29 }
 0x818   :  { %3816 = vmatprep.subr.mxu1 %v10493_v61  ;;  %3690 = vmatpush1.msra.mxu0 %v10496_v44 }
 0x819   :  { %3818 = vmatpush1.msra.mxu1 %v10506_v40  ;;  %3694 = vmatprep.subr.mxu0 %v12751_v37 }
 0x81a   :  { %3820 = vmatprep.subr.mxu1 %v10518_v0  ;;  %3698 = vmatpush1.msra.mxu0 %v12752_v51 }
 0x81b   :  { %3822 = vmatpush1.msra.mxu1 %v10531_v18  ;;  %3702 = vmatprep.subr.mxu0 %v12753_v33 }
 0x81c   :  { %3824 = vmatprep.subr.mxu1 %v10533_v4  ;;  %3706 = vmatpush1.msra.mxu0 %v12754_v32 }
 0x81d   :  { %3826 = vmatpush1.msra.mxu1 %v10556_v57  ;;  %3859 = vmatprep.mubr.f32.mxu1 %v12741_v20 }
 0x81e   :  { %3710 = vmatprep.subr.mxu0 %v12809_v56  ;;  %3861 = vmatmul.mubr.f32.vlgmr.msra.gmra.mxu1 %v11065_v22 }
 0x81f   :  { %3714 = vmatpush1.msra.mxu0 %v12810_v28  ;;  %3771 = vmatprep.mubr.f32.mxu0 %v12741_v20 }
 0x820   :  { %3718 = vmatprep.subr.mxu0 %v12811_v60  ;;  %4013 = vmatprep.subr.mxu1 %v12812_v50 }
 0x821   :  { %3722 = vmatpush1.msra.mxu0 %v12813_v26  ;;  %4019 = vmatpush1.msra.mxu1 %v12814_v45 }
 0x822   :  { %3726 = vmatprep.subr.mxu0 %v12815_v52  ;;  %4025 = vmatprep.subr.mxu1 %v12816_v30 }
 0x823   :  { %3730 = vmatpush1.msra.mxu0 %v12817_v8  ;;  %4031 = vmatpush1.msra.mxu1 %v12818_v43  ;;  %v3214_v8 = vrot.slane %v10810_v46, 6 }
 0x824   :  { %3734 = vmatprep.subr.mxu0 %v12819_v36  ;;  %4037 = vmatprep.subr.mxu1 %v12820_v34 }
 0x825   :  { %3738 = vmatpush1.msra.mxu0 %v12821_v42  ;;  %4043 = vmatpush1.msra.mxu1 %v12822_v63 }
 0x826   :  { %3773 = vmatmul.mubr.f32.vlgmr.msra.gmra.mxu0 %v11065_v22  ;;  %4049 = vmatprep.subr.mxu1 %v12823_v23  ;;  %v12829_v22 = vld [vmem:[#allocation11_spill] sm:$0xff] }
 0x827   :  { %4055 = vmatpush1.msra.mxu1 %v12824_v62  ;;  %3917 = vmatprep.subr.mxu0 %v10377_v3 }
 0x828   :  { %4061 = vmatprep.subr.mxu1 %v12825_v19  ;;  %3919 = vmatpush1.msra.mxu0 %v10379_v1  ;;  %v12831_v19 = vld [vmem:[#allocation38_spill] sm:$0xff] }
 0x829   :  { %4067 = vmatpush1.msra.mxu1 %v12826_v31  ;;  %3921 = vmatprep.subr.mxu0 %v10390_v5  ;;  %v12832_v31 = vld [vmem:[#allocation13_spill] sm:$0xff] }
 0x82a   :  { %4073 = vmatprep.subr.mxu1 %v12827_v11  ;;  %3923 = vmatpush1.msra.mxu0 %v10404_v9 }
 0x82b   :  { %4079 = vmatpush1.msra.mxu1 %v12828_v27  ;;  %3925 = vmatprep.subr.mxu0 %v10418_v2 }
 0x82c   :  { %4085 = vmatprep.subr.mxu1 %v12829_v22  ;;  %3927 = vmatpush1.msra.mxu0 %v10423_v16 }
 0x82d   :  { %4091 = vmatpush1.msra.mxu1 %v12830_v58  ;;  %3929 = vmatprep.subr.mxu0 %v10434_v17 }
 0x82e   :  { %4097 = vmatprep.subr.mxu1 %v12831_v19  ;;  %3931 = vmatpush1.msra.mxu0 %v10456_v41  ;;  %v12834_v19 = vld [vmem:[#allocation14_spill] sm:$0xff] }
 0x82f   :  { %4103 = vmatpush1.msra.mxu1 %v12832_v31  ;;  %3933 = vmatprep.subr.mxu0 %v10466_v53  ;;  %v12833_v31 = vld [vmem:[#allocation22_spill] sm:$0xff]  ;;  %v3213_v58 = vrot.slane %v12834_v19, 6 }
 0x830   :  { %4136 = vmatprep.mubr.f32.mxu1 %v12741_v20  ;;  %4266 = vmatprep.subr.mxu1 %v10377_v3 }
 0x831   :  { %3935 = vmatpush1.msra.mxu0 %v10479_v12  ;;  %3980 = vmatprep.mubr.f32.mxu0 %v12741_v20 }
 0x832   :  { %3937 = vmatprep.subr.mxu0 %v10493_v61 }
 0x833   :  { %3939 = vmatpush1.msra.mxu0 %v10506_v40 }
 0x834   :  { %3941 = vmatprep.subr.mxu0 %v10518_v0 }
 0x835   :  { %3943 = vmatpush1.msra.mxu0 %v10531_v18 }
 0x836   :  { %3945 = vmatprep.subr.mxu0 %v10533_v4 }
 0x837   :  { %3947 = vmatpush1.msra.mxu0 %v10556_v57 }
 0x838   :  { %4162 = vmatprep.subr.mxu0 %v12833_v31 }
 0x8bc   :  { %v3459_v11 = vpop.f32.mrf.mxu1 }
 0x8be   :  { %v3461_v63 = vpop.f32.mrf.mxu1 }
 0x8c4   :  { %v3307_v22 = vpop.f32.mrf.mxu0 }
 0x8c5   :  { %v3308_v27 = vadd.f32 %v3307_v22, %v3213_v58 }
 0x8c6   :  { %v3309_v23 = vpop.f32.mrf.mxu0 }
 0x8c7   :  { %v3460_v62 = vadd.f32 %v3459_v11, %v3308_v27  ;;  %v3310_v30 = vadd.f32 %v3309_v23, %v3214_v8 }
 0x8c9   :  { %v3462_v45 = vadd.f32 %v3461_v63, %v3310_v30 }
 0x8cc   :  { %v3654_v36 = vpop.f32.mrf.mxu1 }
 0x8ce   :  { %v3656_v50 = vpop.f32.mrf.mxu1 }
 0x8d5   :  { %v3564_v42 = vpop.f32.mrf.mxu0 }
 0x8d6   :  { %v3565_v34 = vadd.f32 %v3564_v42, %v3460_v62 }
 0x8d7   :  { %v3566_v52 = vpop.f32.mrf.mxu0 }
 0x8d8   :  { %v3655_v43 = vadd.f32 %v3654_v36, %v3565_v34  ;;  %v3567_v26 = vadd.f32 %v3566_v52, %v3462_v45 }
 0x8da   :  { %v3657_v28 = vadd.f32 %v3656_v50, %v3567_v26 }
 0x8de   :  { %v3862_v31 = vpop.f32.mrf.mxu1 }
 0x8e0   :  { %v3864_v27 = vpop.f32.mrf.mxu1 }
 0x8e6   :  { %v3774_v60 = vpop.f32.mrf.mxu0 }
 0x8e7   :  { %v3775_v19 = vadd.f32 %v3774_v60, %v3655_v43 }
 0x8e8   :  { %v3776_v58 = vpop.f32.mrf.mxu0 }
 0x8e9   :  { %v3863_v22 = vadd.f32 %v3862_v31, %v3775_v19  ;;  %v3777_v11 = vadd.f32 %v3776_v58, %v3657_v28 }
 0x8eb   :  { %v3865_v56 = vadd.f32 %v3864_v27, %v3777_v11  ;;  %v9094_v36 = vmul.f32 -1.442695, %v3863_v22  ;;  %v12836_v27 = vld [vmem:[#allocation20_spill] sm:$0xff] }
 0x8ed   :  { %9343 = vtanh.f32 %v3865_v56  ;;  %v9095_v43 = vmul.f32 -1.442695, %v3865_v56 }
 0x8ee   :  { %9345 = vpow2.f32 %v9094_v36  ;;  %v12838_v36 = vld [vmem:[#allocation33_spill] sm:$0xff] }
 0x8fa   :  { %v9344_v42 = vpop.eup %9343 }
 0x8fb   :  { %3882 = vrot.lane.b32.xlu1 %v9344_v42, %s9429_s3  ;;  %v9346_v46 = vpop.eup %9345  ;;  %v12837_v42 = vld [vmem:[#allocation21_spill] sm:$0xff] }
 0x8fc   :  { %v3873_v8 = vadd.f32 1.0, %v9346_v46  ;;  %v12839_v46 = vld [vmem:[#allocation12_spill] sm:$0xff] }
 0x8fe   :  { %9347 = vrcp.f32 %v3873_v8  ;;  %v12840_v8 = vld [vmem:[#allocation37_spill] sm:$0xff] }
 0x90b   :  { %v9348_v45 = vpop.eup %9347 }
 0x90c   :  { %v3880_v60 = vmul.f32 %v9348_v45, %v11057_v47 }
 0x96d   :  { %v3883_v52 = vpop.permute.xlu1 %3882 }
 0x96e   :  { %v3885_v30 = vmul.f32 %v9348_v45, %v3883_v52  ;;  %v12841_v45 = vld [vmem:[#allocation16_spill] sm:$0xff]  ;;  %v12842_v52 = vld [vmem:[#allocation41_spill] sm:$0xff] }
 0x970   :  { %3887 = vrot.lane.b32.xlu0 %v3885_v30, %s9429_s3  ;;  %v12843_v30 = vld [vmem:[#allocation18_spill] sm:$0xff] }
 0x9e2   :  { %v3888_v50 = vpop.permute.xlu0 %3887 }
 0x9e3   :  { %v11178_v28 = vadd.f32 %v3888_v50, %v3880_v60  ;;  %v12844_v60 = vld [vmem:[#allocation6_spill] sm:$0xff]  ;;  %v12845_v50 = vld [vmem:[#allocation23_spill] sm:$0xff] }
 0x9e5   :  { %9349 = vtanh.f32 %v11178_v28 }
 0x9e6   :  { %9351 = vpow2.f32 %v9095_v43  ;;  %v12847_v43 = vld [vmem:[#allocation35_spill] sm:$0xff] }
 0x9f2   :  { %v9350_v26 = vpop.eup %9349 }
 0x9f3   :  { %3893 = vrot.lane.b32.xlu1 %v9350_v26, %s9429_s3  ;;  %v9352_v34 = vpop.eup %9351  ;;  %v12846_v26 = vld [vmem:[#allocation26_spill] sm:$0xff] }
 0x9f4   :  { %v3874_v63 = vadd.f32 1.0, %v9352_v34  ;;  %v12848_v34 = vld [vmem:[#allocation28_spill] sm:$0xff] }
 0x9f6   :  { %9353 = vrcp.f32 %v3874_v63  ;;  %v12849_v63 = vld [vmem:[#allocation39_spill] sm:$0xff] }
 0xa03   :  { %v9354_v23 = vpop.eup %9353 }
 0xa65   :  { %v3894_v62 = vpop.permute.xlu1 %3893 }
 0xa66   :  { %v11182_v31 = vmul.f32 %v9354_v23, %v3894_v62  ;;  %v12850_v23 = vld [vmem:[#allocation24_spill] sm:$0xff]  ;;  %v12851_v62 = vld [vmem:[#allocation7_spill] sm:$0xff] }
 0xa68   :  { %12835 = vst [vmem:[#allocation27_spill] sm:$0xff] %v11182_v31  ;;  %v3898_v47 = vsel %vm1162_vm1, %v11182_v31, 0  ;;  %v12858_v31 = vld [vmem:[#allocation38_spill] sm:$0xff] }
 0xa69   :  { %v11186_v19 = vand.u32 4294901760, %v3898_v47 }
 0xa6b   :  { %v3982_v58 = vsub.f32 %v3898_v47, %v11186_v19  ;;  %4138 = vmatmul.mubr.f32.vlgmr.msra.gmra.mxu1 %v11186_v19  ;;  %v12852_v47 = vld [vmem:[#allocation30_spill] sm:$0xff] }
 0xa6c   :  { %4268 = vmatpush1.msra.mxu1 %v10379_v1  ;;  %4329 = vmatprep.mubr.f32.mxu1 %v12741_v20 }
 0xa6d   :  { %4270 = vmatprep.subr.mxu1 %v10390_v5  ;;  %v3983_v56 = vand.u32 4294901760, %v3982_v58 }
 0xa6e   :  { %4272 = vmatpush1.msra.mxu1 %v10404_v9 }
 0xa6f   :  { %4274 = vmatprep.subr.mxu1 %v10418_v2  ;;  %v3984_v22 = vsub.f32 %v3982_v58, %v3983_v56 }
 0xa70   :  { %4276 = vmatpush1.msra.mxu1 %v10423_v16 }
 0xa71   :  { %4278 = vmatprep.subr.mxu1 %v10434_v17  ;;  %v3985_v11 = vand.u32 4294901760, %v3984_v22  ;;  %v12855_v22 = vld [vmem:[#allocation10_spill] sm:$0xff] }
 0xa72   :  { %4280 = vmatpush1.msra.mxu1 %v10456_v41 }
 0xa73   :  { %4282 = vmatprep.subr.mxu1 %v10466_v53  ;;  %3986 = vmatmul.mubr.f32.vlgmr.msra.gmra.mxu0 %v3985_v11  ;;  %v12857_v11 = vld [vmem:[#allocation36_spill] sm:$0xff] }
 0xa74   :  { %4165 = vmatpush1.msra.mxu0 %v10413_v14  ;;  %4284 = vmatpush1.msra.mxu1 %v10479_v12 }
 0xa75   :  { %4168 = vmatprep.subr.mxu0 %v10429_v55  ;;  %4286 = vmatprep.subr.mxu1 %v10493_v61 }
 0xa76   :  { %4171 = vmatpush1.msra.mxu0 %v10452_v6  ;;  %4288 = vmatpush1.msra.mxu1 %v10506_v40 }
 0xa77   :  { %4174 = vmatprep.subr.mxu0 %v10462_v54  ;;  %4290 = vmatprep.subr.mxu1 %v10518_v0 }
 0xa78   :  { %4177 = vmatpush1.msra.mxu0 %v10475_v25  ;;  %4292 = vmatpush1.msra.mxu1 %v10531_v18 }
 0xa79   :  { %4180 = vmatprep.subr.mxu0 %v10485_v35  ;;  %4294 = vmatprep.subr.mxu1 %v10533_v4 }
 0xa7a   :  { %4183 = vmatpush1.msra.mxu0 %v10512_v59  ;;  %4296 = vmatpush1.msra.mxu1 %v10556_v57 }
 0xa7b   :  { %4186 = vmatprep.subr.mxu0 %v10527_v39  ;;  %4333 = vmatmul.mubr.f32.vlgmr.msra.gmra.mxu1 %v3983_v56  ;;  %v12854_v56 = vld [vmem:[#allocation32_spill] sm:$0xff] }
 0xa7c   :  { %4476 = vmatprep.subr.mxu1 %v10377_v3  ;;  %4189 = vmatpush1.msra.mxu0 %v10539_v38 }
 0xa7d   :  { %4478 = vmatpush1.msra.mxu1 %v10379_v1  ;;  %4192 = vmatprep.subr.mxu0 %v10550_v10 }
 0xa7e   :  { %4480 = vmatprep.subr.mxu1 %v10390_v5  ;;  %4195 = vmatpush1.msra.mxu0 %v10562_v15 }
 0xa7f   :  { %4482 = vmatpush1.msra.mxu1 %v10404_v9  ;;  %4198 = vmatprep.subr.mxu0 %v10574_v7 }
 0xa80   :  { %4484 = vmatprep.subr.mxu1 %v10418_v2  ;;  %4201 = vmatpush1.msra.mxu0 %v10584_v48 }
 0xa81   :  { %4486 = vmatpush1.msra.mxu1 %v10423_v16  ;;  %4204 = vmatprep.subr.mxu0 %v10594_v49 }
 0xa82   :  { %4488 = vmatprep.subr.mxu1 %v10434_v17  ;;  %4207 = vmatpush1.msra.mxu0 %v10606_v13 }
 0xa83   :  { %4240 = vmatprep.mubr.f32.mxu0 %v12741_v20  ;;  %4490 = vmatpush1.msra.mxu1 %v10456_v41 }
 0xa84   :  { %4243 = vmatmul.mubr.f32.vlgmr.msra.gmra.mxu0 %v3982_v58  ;;  %4358 = vmatprep.subr.mxu0 %v10443_v24  ;;  %v12853_v58 = vld [vmem:[#allocation9_spill] sm:$0xff] }
 0xa85   :  { %4492 = vmatprep.subr.mxu1 %v10466_v53  ;;  %4362 = vmatpush1.msra.mxu0 %v10449_v21 }
 0xa86   :  { %4494 = vmatpush1.msra.mxu1 %v10479_v12  ;;  %4366 = vmatprep.subr.mxu0 %v10469_v29 }
 0xa87   :  { %4496 = vmatprep.subr.mxu1 %v10493_v61  ;;  %4370 = vmatpush1.msra.mxu0 %v10496_v44 }
 0xa88   :  { %4498 = vmatpush1.msra.mxu1 %v10506_v40  ;;  %4374 = vmatprep.subr.mxu0 %v12751_v37 }
 0xa89   :  { %4500 = vmatprep.subr.mxu1 %v10518_v0  ;;  %4378 = vmatpush1.msra.mxu0 %v12752_v51 }
 0xa8a   :  { %4502 = vmatpush1.msra.mxu1 %v10531_v18  ;;  %4382 = vmatprep.subr.mxu0 %v12753_v33 }
 0xa8b   :  { %4504 = vmatprep.subr.mxu1 %v10533_v4  ;;  %4386 = vmatpush1.msra.mxu0 %v12754_v32 }
 0xa8c   :  { %4506 = vmatpush1.msra.mxu1 %v10556_v57  ;;  %4539 = vmatprep.mubr.f32.mxu1 %v12741_v20 }
 0xa8d   :  { %4390 = vmatprep.subr.mxu0 %v12836_v27  ;;  %4541 = vmatmul.mubr.f32.vlgmr.msra.gmra.mxu1 %v11186_v19 }
 0xa8e   :  { %4394 = vmatpush1.msra.mxu0 %v12837_v42  ;;  %4451 = vmatprep.mubr.f32.mxu0 %v12741_v20 }
 0xa8f   :  { %4398 = vmatprep.subr.mxu0 %v12838_v36  ;;  %4699 = vmatprep.subr.mxu1 %v12839_v46 }
 0xa90   :  { %4402 = vmatpush1.msra.mxu0 %v12840_v8  ;;  %4705 = vmatpush1.msra.mxu1 %v12841_v45 }
 0xa91   :  { %4406 = vmatprep.subr.mxu0 %v12842_v52  ;;  %4711 = vmatprep.subr.mxu1 %v12843_v30 }
 0xa92   :  { %4410 = vmatpush1.msra.mxu0 %v12844_v60  ;;  %4717 = vmatpush1.msra.mxu1 %v12845_v50 }
 0xa93   :  { %4414 = vmatprep.subr.mxu0 %v12846_v26  ;;  %4723 = vmatprep.subr.mxu1 %v12847_v43  ;;  %v12862_v26 = vld [vmem:[#allocation42_spill] sm:$0xff] }
 0xa94   :  { %4418 = vmatpush1.msra.mxu0 %v12848_v34  ;;  %4729 = vmatpush1.msra.mxu1 %v12849_v63 }
 0xa95   :  { %4453 = vmatmul.mubr.f32.vlgmr.msra.gmra.mxu0 %v11186_v19  ;;  %4735 = vmatprep.subr.mxu1 %v12850_v23  ;;  %v12856_v19 = vld [vmem:[#allocation11_spill] sm:$0xff] }
 0xa96   :  { %4741 = vmatpush1.msra.mxu1 %v12851_v62  ;;  %4603 = vmatprep.subr.mxu0 %v10377_v3 }
 0xa97   :  { %4747 = vmatprep.subr.mxu1 %v12852_v47  ;;  %4605 = vmatpush1.msra.mxu0 %v10379_v1 }
 0xa98   :  { %4753 = vmatpush1.msra.mxu1 %v12853_v58  ;;  %4607 = vmatprep.subr.mxu0 %v10390_v5  ;;  %v12859_v58 = vld [vmem:[#allocation13_spill] sm:$0xff] }
 0xa99   :  { %4759 = vmatprep.subr.mxu1 %v12854_v56  ;;  %4609 = vmatpush1.msra.mxu0 %v10404_v9 }
 0xa9a   :  { %4765 = vmatpush1.msra.mxu1 %v12855_v22  ;;  %4611 = vmatprep.subr.mxu0 %v10418_v2 }
 0xa9b   :  { %4771 = vmatprep.subr.mxu1 %v12856_v19  ;;  %4613 = vmatpush1.msra.mxu0 %v10423_v16 }
 0xa9c   :  { %4777 = vmatpush1.msra.mxu1 %v12857_v11  ;;  %4615 = vmatprep.subr.mxu0 %v10434_v17  ;;  %v12861_v11 = vld [vmem:[#allocation15_spill] sm:$0xff] }
 0xa9d   :  { %4783 = vmatprep.subr.mxu1 %v12858_v31  ;;  %4617 = vmatpush1.msra.mxu0 %v10456_v41 }
 0xa9e   :  { %4789 = vmatpush1.msra.mxu1 %v12859_v58  ;;  %4619 = vmatprep.subr.mxu0 %v10466_v53  ;;  %v12860_v58 = vld [vmem:[#allocation22_spill] sm:$0xff] }
 0xa9f   :  { %4822 = vmatprep.mubr.f32.mxu1 %v12741_v20  ;;  %4952 = vmatprep.subr.mxu1 %v10377_v3 }
 0xaa0   :  { %4621 = vmatpush1.msra.mxu0 %v10479_v12  ;;  %4666 = vmatprep.mubr.f32.mxu0 %v12741_v20 }
 0xaa1   :  { %4623 = vmatprep.subr.mxu0 %v10493_v61 }
 0xaa2   :  { %4625 = vmatpush1.msra.mxu0 %v10506_v40 }
 0xaa3   :  { %4627 = vmatprep.subr.mxu0 %v10518_v0 }
 0xaa4   :  { %4629 = vmatpush1.msra.mxu0 %v10531_v18 }
 0xaa5   :  { %4631 = vmatprep.subr.mxu0 %v10533_v4 }
 0xaa6   :  { %4633 = vmatpush1.msra.mxu0 %v10556_v57 }
 0xaa7   :  { %4848 = vmatprep.subr.mxu0 %v12860_v58 }
 0xb2b   :  { %v4139_v22 = vpop.f32.mrf.mxu1 }
 0xb2d   :  { %v4141_v62 = vpop.f32.mrf.mxu1 }
 0xb33   :  { %v3987_v31 = vpop.f32.mrf.mxu0 }
 0xb34   :  { %v3988_v19 = vadd.f32 %v3987_v31, %v12861_v11 }
 0xb35   :  { %v3989_v47 = vpop.f32.mrf.mxu0 }
 0xb36   :  { %v4140_v56 = vadd.f32 %v4139_v22, %v3988_v19  ;;  %v3990_v50 = vadd.f32 %v3989_v47, %v12862_v26 }
 0xb38   :  { %v4142_v30 = vadd.f32 %v4141_v62, %v3990_v50 }
 0xb3b   :  { %v4334_v34 = vpop.f32.mrf.mxu1 }
 0xb3d   :  { %v4336_v45 = vpop.f32.mrf.mxu1 }
 0xb44   :  { %v4244_v23 = vpop.f32.mrf.mxu0 }
 0xb45   :  { %v4245_v63 = vadd.f32 %v4244_v23, %v4140_v56 }
 0xb46   :  { %v4246_v60 = vpop.f32.mrf.mxu0 }
 0xb47   :  { %v4335_v43 = vadd.f32 %v4334_v34, %v4245_v63  ;;  %v4247_v52 = vadd.f32 %v4246_v60, %v4142_v30 }
 0xb49   :  { %v4337_v36 = vadd.f32 %v4336_v45, %v4247_v52 }
 0xb4d   :  { %v4542_v8 = vpop.f32.mrf.mxu1 }
 0xb4f   :  { %v4544_v22 = vpop.f32.mrf.mxu1 }
 0xb55   :  { %v4454_v46 = vpop.f32.mrf.mxu0 }
 0xb56   :  { %v4455_v58 = vadd.f32 %v4454_v46, %v4335_v43 }
 0xb57   :  { %v4456_v42 = vpop.f32.mrf.mxu0 }
 0xb58   :  { %v4543_v31 = vadd.f32 %v4542_v8, %v4455_v58  ;;  %v4457_v11 = vadd.f32 %v4456_v42, %v4337_v36 }
 0xb5a   :  { %v4545_v19 = vadd.f32 %v4544_v22, %v4457_v11  ;;  %v9096_v34 = vmul.f32 -1.442695, %v4543_v31 }
 0xb5c   :  { %9355 = vtanh.f32 %v4545_v19 }
 0xb5d   :  { %9357 = vpow2.f32 %v9096_v34  ;;  %v12865_v34 = vld [vmem:[#allocation21_spill] sm:$0xff] }
 0xb69   :  { %v9356_v27 = vpop.eup %9355 }
 0xb6a   :  { %4562 = vrot.lane.b32.xlu0 %v9356_v27, %s9429_s3  ;;  %v9358_v63 = vpop.eup %9357  ;;  %v9097_v27 = vmul.f32 -1.442695, %v4545_v19  ;;  %v12864_v19 = vld [vmem:[#allocation20_spill] sm:$0xff] }
 0xb6b   :  { %v4553_v23 = vadd.f32 1.0, %v9358_v63  ;;  %v12866_v63 = vld [vmem:[#allocation33_spill] sm:$0xff] }
 0xb6d   :  { %9359 = vrcp.f32 %v4553_v23  ;;  %v12867_v23 = vld [vmem:[#allocation12_spill] sm:$0xff] }
 0xb7a   :  { %v9360_v30 = vpop.eup %9359 }
 0xb7b   :  { %v4560_v46 = vmul.f32 %v9360_v30, %v11178_v28 }
 0xbdc   :  { %v4563_v60 = vpop.permute.xlu0 %4562 }
 0xbdd   :  { %v4565_v50 = vmul.f32 %v9360_v30, %v4563_v60  ;;  %v12868_v30 = vld [vmem:[#allocation37_spill] sm:$0xff]  ;;  %v12869_v60 = vld [vmem:[#allocation16_spill] sm:$0xff] }
 0xbdf   :  { %4567 = vrot.lane.b32.xlu1 %v4565_v50, %s9429_s3  ;;  %v12870_v50 = vld [vmem:[#allocation41_spill] sm:$0xff] }
 0xc51   :  { %v4568_v8 = vpop.permute.xlu1 %4567 }
 0xc52   :  { %v11299_v42 = vadd.f32 %v4568_v8, %v4560_v46  ;;  %v12871_v46 = vld [vmem:[#allocation18_spill] sm:$0xff] }
 0xc53   :  { %v12872_v8 = vld [vmem:[#allocation6_spill] sm:$0xff] }
 0xc54   :  { %9361 = vtanh.f32 %v11299_v42 }
 0xc55   :  { %9363 = vpow2.f32 %v9097_v27  ;;  %v12874_v27 = vld [vmem:[#allocation26_spill] sm:$0xff] }
 0xc61   :  { %v9362_v36 = vpop.eup %9361 }
 0xc62   :  { %4573 = vrot.lane.b32.xlu0 %v9362_v36, %s9429_s3  ;;  %v9364_v45 = vpop.eup %9363  ;;  %v12873_v36 = vld [vmem:[#allocation23_spill] sm:$0xff] }
 0xc63   :  { %v4554_v52 = vadd.f32 1.0, %v9364_v45  ;;  %v12875_v45 = vld [vmem:[#allocation35_spill] sm:$0xff] }
 0xc65   :  { %9365 = vrcp.f32 %v4554_v52  ;;  %v12876_v52 = vld [vmem:[#allocation28_spill] sm:$0xff] }
 0xc72   :  { %v9366_v43 = vpop.eup %9365 }
 0xcd4   :  { %v4574_v62 = vpop.permute.xlu0 %4573 }
 0xcd5   :  { %v11303_v47 = vmul.f32 %v9366_v43, %v4574_v62  ;;  %v12877_v43 = vld [vmem:[#allocation39_spill] sm:$0xff]  ;;  %v12878_v62 = vld [vmem:[#allocation24_spill] sm:$0xff] }
 0xcd7   :  { %12863 = vst [vmem:[#allocation46_spill] sm:$0xff] %v11303_v47  ;;  %v4584_v28 = vsel %vm1162_vm1, %v11303_v47, 0  ;;  %v12885_v47 = vld [vmem:[#allocation36_spill] sm:$0xff] }
 0xcd8   :  { %v11307_v58 = vand.u32 4294901760, %v4584_v28 }
 0xcda   :  { %v4668_v56 = vsub.f32 %v4584_v28, %v11307_v58  ;;  %4824 = vmatmul.mubr.f32.vlgmr.msra.gmra.mxu1 %v11307_v58  ;;  %v12879_v28 = vld [vmem:[#allocation7_spill] sm:$0xff] }
 0xcdb   :  { %4954 = vmatpush1.msra.mxu1 %v10379_v1  ;;  %5015 = vmatprep.mubr.f32.mxu1 %v12741_v20 }
 0xcdc   :  { %4956 = vmatprep.subr.mxu1 %v10390_v5  ;;  %v4669_v11 = vand.u32 4294901760, %v4668_v56 }
 0xcdd   :  { %4958 = vmatpush1.msra.mxu1 %v10404_v9 }
 0xcde   :  { %4960 = vmatprep.subr.mxu1 %v10418_v2  ;;  %v4670_v31 = vsub.f32 %v4668_v56, %v4669_v11 }
 0xcdf   :  { %4962 = vmatpush1.msra.mxu1 %v10423_v16 }
 0xce0   :  { %4964 = vmatprep.subr.mxu1 %v10434_v17  ;;  %v4671_v22 = vand.u32 4294901760, %v4670_v31  ;;  %v12882_v31 = vld [vmem:[#allocation32_spill] sm:$0xff] }
 0xce1   :  { %4966 = vmatpush1.msra.mxu1 %v10456_v41 }
 0xce2   :  { %4968 = vmatprep.subr.mxu1 %v10466_v53  ;;  %4672 = vmatmul.mubr.f32.vlgmr.msra.gmra.mxu0 %v4671_v22  ;;  %v12883_v22 = vld [vmem:[#allocation10_spill] sm:$0xff] }
 0xce3   :  { %4851 = vmatpush1.msra.mxu0 %v10413_v14  ;;  %4970 = vmatpush1.msra.mxu1 %v10479_v12 }
 0xce4   :  { %4854 = vmatprep.subr.mxu0 %v10429_v55  ;;  %4972 = vmatprep.subr.mxu1 %v10493_v61 }
 0xce5   :  { %4857 = vmatpush1.msra.mxu0 %v10452_v6  ;;  %4974 = vmatpush1.msra.mxu1 %v10506_v40 }
 0xce6   :  { %4860 = vmatprep.subr.mxu0 %v10462_v54  ;;  %4976 = vmatprep.subr.mxu1 %v10518_v0 }
 0xce7   :  { %4863 = vmatpush1.msra.mxu0 %v10475_v25  ;;  %4978 = vmatpush1.msra.mxu1 %v10531_v18 }
 0xce8   :  { %4866 = vmatprep.subr.mxu0 %v10485_v35  ;;  %4980 = vmatprep.subr.mxu1 %v10533_v4 }
 0xce9   :  { %4869 = vmatpush1.msra.mxu0 %v10512_v59  ;;  %4982 = vmatpush1.msra.mxu1 %v10556_v57 }
 0xcea   :  { %4872 = vmatprep.subr.mxu0 %v10527_v39  ;;  %5019 = vmatmul.mubr.f32.vlgmr.msra.gmra.mxu1 %v4669_v11  ;;  %v12881_v11 = vld [vmem:[#allocation9_spill] sm:$0xff] }
 0xceb   :  { %5162 = vmatprep.subr.mxu1 %v10377_v3  ;;  %4875 = vmatpush1.msra.mxu0 %v10539_v38 }
 0xcec   :  { %5164 = vmatpush1.msra.mxu1 %v10379_v1  ;;  %4878 = vmatprep.subr.mxu0 %v10550_v10 }
 0xced   :  { %5166 = vmatprep.subr.mxu1 %v10390_v5  ;;  %4881 = vmatpush1.msra.mxu0 %v10562_v15 }
 0xcee   :  { %5168 = vmatpush1.msra.mxu1 %v10404_v9  ;;  %4884 = vmatprep.subr.mxu0 %v10574_v7 }
 0xcef   :  { %5170 = vmatprep.subr.mxu1 %v10418_v2  ;;  %4887 = vmatpush1.msra.mxu0 %v10584_v48 }
 0xcf0   :  { %5172 = vmatpush1.msra.mxu1 %v10423_v16  ;;  %4890 = vmatprep.subr.mxu0 %v10594_v49 }
 0xcf1   :  { %5174 = vmatprep.subr.mxu1 %v10434_v17  ;;  %4893 = vmatpush1.msra.mxu0 %v10606_v13 }
 0xcf2   :  { %4926 = vmatprep.mubr.f32.mxu0 %v12741_v20  ;;  %5176 = vmatpush1.msra.mxu1 %v10456_v41 }
 0xcf3   :  { %4929 = vmatmul.mubr.f32.vlgmr.msra.gmra.mxu0 %v4668_v56  ;;  %5044 = vmatprep.subr.mxu0 %v10443_v24  ;;  %v12880_v56 = vld [vmem:[#allocation30_spill] sm:$0xff] }
 0xcf4   :  { %5178 = vmatprep.subr.mxu1 %v10466_v53  ;;  %5048 = vmatpush1.msra.mxu0 %v10449_v21 }
 0xcf5   :  { %5180 = vmatpush1.msra.mxu1 %v10479_v12  ;;  %5052 = vmatprep.subr.mxu0 %v10469_v29 }
 0xcf6   :  { %5182 = vmatprep.subr.mxu1 %v10493_v61  ;;  %5056 = vmatpush1.msra.mxu0 %v10496_v44 }
 0xcf7   :  { %5184 = vmatpush1.msra.mxu1 %v10506_v40  ;;  %5060 = vmatprep.subr.mxu0 %v12751_v37 }
 0xcf8   :  { %5186 = vmatprep.subr.mxu1 %v10518_v0  ;;  %5064 = vmatpush1.msra.mxu0 %v12752_v51 }
 0xcf9   :  { %5188 = vmatpush1.msra.mxu1 %v10531_v18  ;;  %5068 = vmatprep.subr.mxu0 %v12753_v33 }
 0xcfa   :  { %5190 = vmatprep.subr.mxu1 %v10533_v4  ;;  %5072 = vmatpush1.msra.mxu0 %v12754_v32 }
 0xcfb   :  { %5192 = vmatpush1.msra.mxu1 %v10556_v57  ;;  %5225 = vmatprep.mubr.f32.mxu1 %v12741_v20 }
 0xcfc   :  { %5076 = vmatprep.subr.mxu0 %v12864_v19  ;;  %5227 = vmatmul.mubr.f32.vlgmr.msra.gmra.mxu1 %v11307_v58 }
 0xcfd   :  { %5080 = vmatpush1.msra.mxu0 %v12865_v34  ;;  %5137 = vmatprep.mubr.f32.mxu0 %v12741_v20 }
 0xcfe   :  { %5084 = vmatprep.subr.mxu0 %v12866_v63  ;;  %5383 = vmatprep.subr.mxu1 %v12867_v23 }
 0xcff   :  { %5088 = vmatpush1.msra.mxu0 %v12868_v30  ;;  %5389 = vmatpush1.msra.mxu1 %v12869_v60 }
 0xd00   :  { %5092 = vmatprep.subr.mxu0 %v12870_v50  ;;  %5395 = vmatprep.subr.mxu1 %v12871_v46 }
 0xd01   :  { %5096 = vmatpush1.msra.mxu0 %v12872_v8  ;;  %5401 = vmatpush1.msra.mxu1 %v12873_v36  ;;  %v4580_v8 = vrot.slane %v12862_v26, 2 }
 0xd02   :  { %5100 = vmatprep.subr.mxu0 %v12874_v27  ;;  %5407 = vmatprep.subr.mxu1 %v12875_v45 }
 0xd03   :  { %5104 = vmatpush1.msra.mxu0 %v12876_v52  ;;  %5413 = vmatpush1.msra.mxu1 %v12877_v43 }
 0xd04   :  { %5139 = vmatmul.mubr.f32.vlgmr.msra.gmra.mxu0 %v11307_v58  ;;  %5419 = vmatprep.subr.mxu1 %v12878_v62  ;;  %v12884_v58 = vld [vmem:[#allocation11_spill] sm:$0xff] }
 0xd05   :  { %5425 = vmatpush1.msra.mxu1 %v12879_v28  ;;  %5287 = vmatprep.subr.mxu0 %v10377_v3 }
 0xd06   :  { %5431 = vmatprep.subr.mxu1 %v12880_v56  ;;  %5289 = vmatpush1.msra.mxu0 %v10379_v1  ;;  %v12886_v56 = vld [vmem:[#allocation38_spill] sm:$0xff] }
 0xd07   :  { %5437 = vmatpush1.msra.mxu1 %v12881_v11  ;;  %5291 = vmatprep.subr.mxu0 %v10390_v5  ;;  %v12887_v11 = vld [vmem:[#allocation13_spill] sm:$0xff] }
 0xd08   :  { %5443 = vmatprep.subr.mxu1 %v12882_v31  ;;  %5293 = vmatpush1.msra.mxu0 %v10404_v9 }
 0xd09   :  { %5449 = vmatpush1.msra.mxu1 %v12883_v22  ;;  %5295 = vmatprep.subr.mxu0 %v10418_v2 }
 0xd0a   :  { %5455 = vmatprep.subr.mxu1 %v12884_v58  ;;  %5297 = vmatpush1.msra.mxu0 %v10423_v16 }
 0xd0b   :  { %5461 = vmatpush1.msra.mxu1 %v12885_v47  ;;  %5299 = vmatprep.subr.mxu0 %v10434_v17 }
 0xd0c   :  { %5467 = vmatprep.subr.mxu1 %v12886_v56  ;;  %5301 = vmatpush1.msra.mxu0 %v10456_v41  ;;  %v12889_v56 = vld [vmem:[#allocation15_spill] sm:$0xff] }
 0xd0d   :  { %5473 = vmatpush1.msra.mxu1 %v12887_v11  ;;  %5303 = vmatprep.subr.mxu0 %v10466_v53  ;;  %v12888_v11 = vld [vmem:[#allocation22_spill] sm:$0xff]  ;;  %v4579_v47 = vrot.slane %v12889_v56, 2 }
 0xd0e   :  { %5506 = vmatprep.mubr.f32.mxu1 %v12741_v20  ;;  %5636 = vmatprep.subr.mxu1 %v10377_v3 }
 0xd0f   :  { %5305 = vmatpush1.msra.mxu0 %v10479_v12  ;;  %5350 = vmatprep.mubr.f32.mxu0 %v12741_v20 }
 0xd10   :  { %5307 = vmatprep.subr.mxu0 %v10493_v61 }
 0xd11   :  { %5309 = vmatpush1.msra.mxu0 %v10506_v40 }
 0xd12   :  { %5311 = vmatprep.subr.mxu0 %v10518_v0 }
 0xd13   :  { %5313 = vmatpush1.msra.mxu0 %v10531_v18 }
 0xd14   :  { %5315 = vmatprep.subr.mxu0 %v10533_v4 }
 0xd15   :  { %5317 = vmatpush1.msra.mxu0 %v10556_v57 }
 0xd16   :  { %5532 = vmatprep.subr.mxu0 %v12888_v11 }
 0xd9a   :  { %v4825_v31 = vpop.f32.mrf.mxu1 }
 0xd9c   :  { %v4827_v43 = vpop.f32.mrf.mxu1 }
 0xda2   :  { %v4673_v58 = vpop.f32.mrf.mxu0 }
 0xda3   :  { %v4674_v22 = vadd.f32 %v4673_v58, %v4579_v47 }
 0xda4   :  { %v4675_v62 = vpop.f32.mrf.mxu0 }
 0xda5   :  { %v4826_v28 = vadd.f32 %v4825_v31, %v4674_v22  ;;  %v4676_v46 = vadd.f32 %v4675_v62, %v4580_v8 }
 0xda7   :  { %v4828_v60 = vadd.f32 %v4827_v43, %v4676_v46 }
 0xdaa   :  { %v5020_v27 = vpop.f32.mrf.mxu1 }
 0xdac   :  { %v5022_v23 = vpop.f32.mrf.mxu1 }
 0xdb3   :  { %v4930_v52 = vpop.f32.mrf.mxu0 }
 0xdb4   :  { %v4931_v45 = vadd.f32 %v4930_v52, %v4826_v28 }
 0xdb5   :  { %v4932_v50 = vpop.f32.mrf.mxu0 }
 0xdb6   :  { %v5021_v36 = vadd.f32 %v5020_v27, %v4931_v45  ;;  %v4933_v30 = vadd.f32 %v4932_v50, %v4828_v60 }
 0xdb8   :  { %v5023_v34 = vadd.f32 %v5022_v23, %v4933_v30 }
 0xdbc   :  { %v5228_v11 = vpop.f32.mrf.mxu1 }
 0xdbe   :  { %v5230_v22 = vpop.f32.mrf.mxu1 }
 0xdc4   :  { %v5140_v63 = vpop.f32.mrf.mxu0 }
 0xdc5   :  { %v5141_v56 = vadd.f32 %v5140_v63, %v5021_v36 }
 0xdc6   :  { %v5142_v47 = vpop.f32.mrf.mxu0 }
 0xdc7   :  { %v5229_v58 = vadd.f32 %v5228_v11, %v5141_v56  ;;  %v5143_v31 = vadd.f32 %v5142_v47, %v5023_v34 }
 0xdc9   :  { %v5231_v19 = vadd.f32 %v5230_v22, %v5143_v31  ;;  %v9098_v27 = vmul.f32 -1.442695, %v5229_v58 }
 0xdcb   :  { %9367 = vtanh.f32 %v5231_v19  ;;  %v9099_v36 = vmul.f32 -1.442695, %v5231_v19 }
 0xdcc   :  { %9369 = vpow2.f32 %v9098_v27  ;;  %v12892_v27 = vld [vmem:[#allocation21_spill] sm:$0xff] }
 0xdd8   :  { %v9368_v52 = vpop.eup %9367 }
 0xdd9   :  { %5248 = vrot.lane.b32.xlu1 %v9368_v52, %s9429_s3  ;;  %v9370_v8 = vpop.eup %9369  ;;  %v12891_v52 = vld [vmem:[#allocation20_spill] sm:$0xff] }
 0xdda   :  { %v5239_v45 = vadd.f32 1.0, %v9370_v8  ;;  %v12893_v8 = vld [vmem:[#allocation33_spill] sm:$0xff] }
 0xddc   :  { %9371 = vrcp.f32 %v5239_v45  ;;  %v12894_v45 = vld [vmem:[#allocation12_spill] sm:$0xff] }
 0xde9   :  { %v9372_v60 = vpop.eup %9371 }
 0xdea   :  { %v5246_v63 = vmul.f32 %v9372_v60, %v11299_v42 }
 0xe4b   :  { %v5249_v50 = vpop.permute.xlu1 %5248 }
 0xe4c   :  { %v5251_v46 = vmul.f32 %v9372_v60, %v5249_v50  ;;  %v12895_v60 = vld [vmem:[#allocation37_spill] sm:$0xff]  ;;  %v12896_v50 = vld [vmem:[#allocation16_spill] sm:$0xff] }
 0xe4e   :  { %5253 = vrot.lane.b32.xlu0 %v5251_v46, %s9429_s3  ;;  %v12897_v46 = vld [vmem:[#allocation41_spill] sm:$0xff] }
 0xec0   :  { %v5254_v23 = vpop.permute.xlu0 %5253 }
 0xec1   :  { %v11420_v34 = vadd.f32 %v5254_v23, %v5246_v63  ;;  %v12898_v63 = vld [vmem:[#allocation18_spill] sm:$0xff] }
 0xec2   :  { %v12899_v23 = vld [vmem:[#allocation6_spill] sm:$0xff] }
 0xec3   :  { %9373 = vtanh.f32 %v11420_v34 }
 0xec4   :  { %9375 = vpow2.f32 %v9099_v36  ;;  %v12901_v36 = vld [vmem:[#allocation26_spill] sm:$0xff] }
 0xed0   :  { %v9374_v30 = vpop.eup %9373 }
 0xed1   :  { %5259 = vrot.lane.b32.xlu1 %v9374_v30, %s9429_s3  ;;  %v9376_v43 = vpop.eup %9375  ;;  %v12900_v30 = vld [vmem:[#allocation23_spill] sm:$0xff] }
 0xed2   :  { %v5240_v62 = vadd.f32 1.0, %v9376_v43  ;;  %v12902_v43 = vld [vmem:[#allocation35_spill] sm:$0xff] }
 0xed4   :  { %9377 = vrcp.f32 %v5240_v62  ;;  %v12903_v62 = vld [vmem:[#allocation28_spill] sm:$0xff] }
 0xee1   :  { %v9378_v28 = vpop.eup %9377 }
 0xf43   :  { %v5260_v56 = vpop.permute.xlu1 %5259 }
 0xf44   :  { %v11424_v11 = vmul.f32 %v9378_v28, %v5260_v56  ;;  %v12904_v28 = vld [vmem:[#allocation39_spill] sm:$0xff]  ;;  %v12905_v56 = vld [vmem:[#allocation24_spill] sm:$0xff] }
 0xf46   :  { %12890 = vst [vmem:[#allocation43_spill] sm:$0xff] %v11424_v11  ;;  %v5268_v42 = vsel %vm1162_vm1, %v11424_v11, 0  ;;  %v5264_v11 = vrot.slane %v12862_v26, 4 }
 0xf47   :  { %v11428_v47 = vand.u32 4294901760, %v5268_v42 }
 0xf49   :  { %v5352_v58 = vsub.f32 %v5268_v42, %v11428_v47  ;;  %5508 = vmatmul.mubr.f32.vlgmr.msra.gmra.mxu1 %v11428_v47  ;;  %v12906_v42 = vld [vmem:[#allocation7_spill] sm:$0xff] }
 0xf4a   :  { %5638 = vmatpush1.msra.mxu1 %v10379_v1  ;;  %5699 = vmatprep.mubr.f32.mxu1 %v12741_v20 }
 0xf4b   :  { %5640 = vmatprep.subr.mxu1 %v10390_v5  ;;  %v5353_v19 = vand.u32 4294901760, %v5352_v58 }
 0xf4c   :  { %5642 = vmatpush1.msra.mxu1 %v10404_v9 }
 0xf4d   :  { %5644 = vmatprep.subr.mxu1 %v10418_v2  ;;  %v5354_v31 = vsub.f32 %v5352_v58, %v5353_v19 }
 0xf4e   :  { %5646 = vmatpush1.msra.mxu1 %v10423_v16 }
 0xf4f   :  { %5648 = vmatprep.subr.mxu1 %v10434_v17  ;;  %v5355_v22 = vand.u32 4294901760, %v5354_v31  ;;  %v12909_v31 = vld [vmem:[#allocation32_spill] sm:$0xff] }
 0xf50   :  { %5650 = vmatpush1.msra.mxu1 %v10456_v41 }
 0xf51   :  { %5652 = vmatprep.subr.mxu1 %v10466_v53  ;;  %5356 = vmatmul.mubr.f32.vlgmr.msra.gmra.mxu0 %v5355_v22  ;;  %v12910_v22 = vld [vmem:[#allocation10_spill] sm:$0xff] }
 0xf52   :  { %5535 = vmatpush1.msra.mxu0 %v10413_v14  ;;  %5654 = vmatpush1.msra.mxu1 %v10479_v12 }
 0xf53   :  { %5538 = vmatprep.subr.mxu0 %v10429_v55  ;;  %5656 = vmatprep.subr.mxu1 %v10493_v61 }
 0xf54   :  { %5541 = vmatpush1.msra.mxu0 %v10452_v6  ;;  %5658 = vmatpush1.msra.mxu1 %v10506_v40 }
 0xf55   :  { %5544 = vmatprep.subr.mxu0 %v10462_v54  ;;  %5660 = vmatprep.subr.mxu1 %v10518_v0 }
 0xf56   :  { %5547 = vmatpush1.msra.mxu0 %v10475_v25  ;;  %5662 = vmatpush1.msra.mxu1 %v10531_v18 }
 0xf57   :  { %5550 = vmatprep.subr.mxu0 %v10485_v35  ;;  %5664 = vmatprep.subr.mxu1 %v10533_v4 }
 0xf58   :  { %5553 = vmatpush1.msra.mxu0 %v10512_v59  ;;  %5666 = vmatpush1.msra.mxu1 %v10556_v57 }
 0xf59   :  { %5556 = vmatprep.subr.mxu0 %v10527_v39  ;;  %5703 = vmatmul.mubr.f32.vlgmr.msra.gmra.mxu1 %v5353_v19  ;;  %v12908_v19 = vld [vmem:[#allocation9_spill] sm:$0xff] }
 0xf5a   :  { %5846 = vmatprep.subr.mxu1 %v10377_v3  ;;  %5559 = vmatpush1.msra.mxu0 %v10539_v38 }
 0xf5b   :  { %5848 = vmatpush1.msra.mxu1 %v10379_v1  ;;  %5562 = vmatprep.subr.mxu0 %v10550_v10 }
 0xf5c   :  { %5850 = vmatprep.subr.mxu1 %v10390_v5  ;;  %5565 = vmatpush1.msra.mxu0 %v10562_v15 }
 0xf5d   :  { %5852 = vmatpush1.msra.mxu1 %v10404_v9  ;;  %5568 = vmatprep.subr.mxu0 %v10574_v7 }
 0xf5e   :  { %5854 = vmatprep.subr.mxu1 %v10418_v2  ;;  %5571 = vmatpush1.msra.mxu0 %v10584_v48 }
 0xf5f   :  { %5856 = vmatpush1.msra.mxu1 %v10423_v16  ;;  %5574 = vmatprep.subr.mxu0 %v10594_v49 }
 0xf60   :  { %5858 = vmatprep.subr.mxu1 %v10434_v17  ;;  %5577 = vmatpush1.msra.mxu0 %v10606_v13 }
 0xf61   :  { %5610 = vmatprep.mubr.f32.mxu0 %v12741_v20  ;;  %5860 = vmatpush1.msra.mxu1 %v10456_v41 }
 0xf62   :  { %5613 = vmatmul.mubr.f32.vlgmr.msra.gmra.mxu0 %v5352_v58  ;;  %5728 = vmatprep.subr.mxu0 %v10443_v24  ;;  %v12907_v58 = vld [vmem:[#allocation30_spill] sm:$0xff] }
 0xf63   :  { %5862 = vmatprep.subr.mxu1 %v10466_v53  ;;  %5732 = vmatpush1.msra.mxu0 %v10449_v21 }
 0xf64   :  { %5864 = vmatpush1.msra.mxu1 %v10479_v12  ;;  %5736 = vmatprep.subr.mxu0 %v10469_v29 }
 0xf65   :  { %5866 = vmatprep.subr.mxu1 %v10493_v61  ;;  %5740 = vmatpush1.msra.mxu0 %v10496_v44 }
 0xf66   :  { %5868 = vmatpush1.msra.mxu1 %v10506_v40  ;;  %5744 = vmatprep.subr.mxu0 %v12751_v37 }
 0xf67   :  { %5870 = vmatprep.subr.mxu1 %v10518_v0  ;;  %5748 = vmatpush1.msra.mxu0 %v12752_v51 }
 0xf68   :  { %5872 = vmatpush1.msra.mxu1 %v10531_v18  ;;  %5752 = vmatprep.subr.mxu0 %v12753_v33 }
 0xf69   :  { %5874 = vmatprep.subr.mxu1 %v10533_v4  ;;  %5756 = vmatpush1.msra.mxu0 %v12754_v32 }
 0xf6a   :  { %5876 = vmatpush1.msra.mxu1 %v10556_v57  ;;  %5909 = vmatprep.mubr.f32.mxu1 %v12741_v20 }
 0xf6b   :  { %5760 = vmatprep.subr.mxu0 %v12891_v52  ;;  %5911 = vmatmul.mubr.f32.vlgmr.msra.gmra.mxu1 %v11428_v47 }
 0xf6c   :  { %5764 = vmatpush1.msra.mxu0 %v12892_v27  ;;  %5821 = vmatprep.mubr.f32.mxu0 %v12741_v20 }
 0xf6d   :  { %5768 = vmatprep.subr.mxu0 %v12893_v8  ;;  %6067 = vmatprep.subr.mxu1 %v12894_v45  ;;  %v12912_v45 = vld [vmem:[#allocation36_spill] sm:$0xff] }
 0xf6e   :  { %5772 = vmatpush1.msra.mxu0 %v12895_v60  ;;  %6073 = vmatpush1.msra.mxu1 %v12896_v50  ;;  %v12913_v50 = vld [vmem:[#allocation38_spill] sm:$0xff] }
 0xf6f   :  { %5776 = vmatprep.subr.mxu0 %v12897_v46  ;;  %6079 = vmatprep.subr.mxu1 %v12898_v63  ;;  %v12914_v63 = vld [vmem:[#allocation13_spill] sm:$0xff] }
 0xf70   :  { %5780 = vmatpush1.msra.mxu0 %v12899_v23  ;;  %6085 = vmatpush1.msra.mxu1 %v12900_v30  ;;  %v12915_v30 = vld [vmem:[#allocation22_spill] sm:$0xff] }
 0xf71   :  { %5784 = vmatprep.subr.mxu0 %v12901_v36  ;;  %6091 = vmatprep.subr.mxu1 %v12902_v43  ;;  %v12916_v43 = vld [vmem:[#allocation15_spill] sm:$0xff] }
 0xf72   :  { %5788 = vmatpush1.msra.mxu0 %v12903_v62  ;;  %6097 = vmatpush1.msra.mxu1 %v12904_v28  ;;  %v5263_v28 = vrot.slane %v12916_v43, 4 }
 0xf73   :  { %5823 = vmatmul.mubr.f32.vlgmr.msra.gmra.mxu0 %v11428_v47  ;;  %6103 = vmatprep.subr.mxu1 %v12905_v56  ;;  %v12911_v47 = vld [vmem:[#allocation11_spill] sm:$0xff] }
 0xf74   :  { %6109 = vmatpush1.msra.mxu1 %v12906_v42  ;;  %5971 = vmatprep.subr.mxu0 %v10377_v3 }
 0xf75   :  { %6115 = vmatprep.subr.mxu1 %v12907_v58  ;;  %5973 = vmatpush1.msra.mxu0 %v10379_v1 }
 0xf76   :  { %6121 = vmatpush1.msra.mxu1 %v12908_v19  ;;  %5975 = vmatprep.subr.mxu0 %v10390_v5 }
 0xf77   :  { %6127 = vmatprep.subr.mxu1 %v12909_v31  ;;  %5977 = vmatpush1.msra.mxu0 %v10404_v9 }
 0xf78   :  { %6133 = vmatpush1.msra.mxu1 %v12910_v22  ;;  %5979 = vmatprep.subr.mxu0 %v10418_v2 }
 0xf79   :  { %6139 = vmatprep.subr.mxu1 %v12911_v47  ;;  %5981 = vmatpush1.msra.mxu0 %v10423_v16 }
 0xf7a   :  { %6145 = vmatpush1.msra.mxu1 %v12912_v45  ;;  %5983 = vmatprep.subr.mxu0 %v10434_v17 }
 0xf7b   :  { %6151 = vmatprep.subr.mxu1 %v12913_v50  ;;  %5985 = vmatpush1.msra.mxu0 %v10456_v41 }
 0xf7c   :  { %6157 = vmatpush1.msra.mxu1 %v12914_v63  ;;  %5987 = vmatprep.subr.mxu0 %v10466_v53 }
 0xf7d   :  { %6190 = vmatprep.mubr.f32.mxu1 %v12741_v20  ;;  %6320 = vmatprep.subr.mxu1 %v10377_v3 }
 0xf7e   :  { %5989 = vmatpush1.msra.mxu0 %v10479_v12  ;;  %6034 = vmatprep.mubr.f32.mxu0 %v12741_v20 }
 0xf7f   :  { %5991 = vmatprep.subr.mxu0 %v10493_v61 }
 0xf80   :  { %5993 = vmatpush1.msra.mxu0 %v10506_v40 }
 0xf81   :  { %5995 = vmatprep.subr.mxu0 %v10518_v0 }
 0xf82   :  { %5997 = vmatpush1.msra.mxu0 %v10531_v18 }
 0xf83   :  { %5999 = vmatprep.subr.mxu0 %v10533_v4 }
 0xf84   :  { %6001 = vmatpush1.msra.mxu0 %v10556_v57 }
 0xf85   :  { %6216 = vmatprep.subr.mxu0 %v12915_v30 }
0x1009   :  { %v5509_v58 = vpop.f32.mrf.mxu1 }
0x100b   :  { %v5511_v22 = vpop.f32.mrf.mxu1 }
0x1011   :  { %v5357_v56 = vpop.f32.mrf.mxu0 }
0x1012   :  { %v5358_v42 = vadd.f32 %v5357_v56, %v5263_v28 }
0x1013   :  { %v5359_v31 = vpop.f32.mrf.mxu0 }
0x1014   :  { %v5510_v19 = vadd.f32 %v5509_v58, %v5358_v42  ;;  %v5360_v62 = vadd.f32 %v5359_v31, %v5264_v11 }
0x1016   :  { %v5512_v23 = vadd.f32 %v5511_v22, %v5360_v62 }
0x1019   :  { %v5704_v50 = vpop.f32.mrf.mxu1 }
0x101b   :  { %v5706_v60 = vpop.f32.mrf.mxu1 }
0x1022   :  { %v5614_v47 = vpop.f32.mrf.mxu0 }
0x1023   :  { %v5615_v45 = vadd.f32 %v5614_v47, %v5510_v19 }
0x1024   :  { %v5616_v36 = vpop.f32.mrf.mxu0 }
0x1025   :  { %v5705_v63 = vadd.f32 %v5704_v50, %v5615_v45  ;;  %v5617_v46 = vadd.f32 %v5616_v36, %v5512_v23 }
0x1027   :  { %v5707_v27 = vadd.f32 %v5706_v60, %v5617_v46 }
0x102b   :  { %v5912_v30 = vpop.f32.mrf.mxu1 }
0x102d   :  { %v5914_v58 = vpop.f32.mrf.mxu1 }
0x1033   :  { %v5824_v8 = vpop.f32.mrf.mxu0 }
0x1034   :  { %v5825_v43 = vadd.f32 %v5824_v8, %v5705_v63 }
0x1035   :  { %v5826_v28 = vpop.f32.mrf.mxu0 }
0x1036   :  { %v5913_v56 = vadd.f32 %v5912_v30, %v5825_v43  ;;  %v5827_v42 = vadd.f32 %v5826_v28, %v5707_v27 }
0x1038   :  { %v5915_v52 = vadd.f32 %v5914_v58, %v5827_v42  ;;  %v9100_v47 = vmul.f32 -1.442695, %v5913_v56 }
0x103a   :  { %9379 = vtanh.f32 %v5915_v52  ;;  %v9101_v43 = vmul.f32 -1.442695, %v5915_v52 }
0x103b   :  { %9381 = vpow2.f32 %v9100_v47 }
0x1047   :  { %v9380_v19 = vpop.eup %9379 }
0x1048   :  { %5932 = vrot.lane.b32.xlu0 %v9380_v19, %s9429_s3  ;;  %v9382_v11 = vpop.eup %9381 }
0x1049   :  { %v5923_v31 = vadd.f32 1.0, %v9382_v11  ;;  %v6646_v11 = vld [vmem:[#allocation2 + $0x78] sm:$0xff] }
0x104b   :  { %9383 = vrcp.f32 %v5923_v31  ;;  %v6645_v31 = vld [vmem:[#allocation2 + $0x70] sm:$0xff] }
0x1058   :  { %v9384_v23 = vpop.eup %9383 }
0x1059   :  { %v5930_v8 = vmul.f32 %v9384_v23, %v11420_v34 }
0x10ba   :  { %v5933_v36 = vpop.permute.xlu0 %5932 }
0x10bb   :  { %v5935_v62 = vmul.f32 %v9384_v23, %v5933_v36  ;;  %v6644_v23 = vld [vmem:[#allocation2 + $0x68] sm:$0xff]  ;;  %v11630_v36 = vand.u32 4294901760, %v6646_v11 }
0x10bd   :  { %5937 = vrot.lane.b32.xlu1 %v5935_v62, %s9429_s3  ;;  %v11632_v62 = vand.u32 4294901760, %v6645_v31 }
0x112f   :  { %v5938_v60 = vpop.permute.xlu1 %5937 }
0x1130   :  { %v11541_v27 = vadd.f32 %v5938_v60, %v5930_v8  ;;  %v11634_v8 = vand.u32 4294901760, %v6644_v23  ;;  %v6643_v60 = vld [vmem:[#allocation2 + $0x60] sm:$0xff] }
0x1132   :  { %9385 = vtanh.f32 %v11541_v27 }
0x1133   :  { %9387 = vpow2.f32 %v9101_v43  ;;  %v11639_v43 = vsub.f32 %v6646_v11, %v11630_v36 }
0x1135   :  { %12926 = vst [vmem:[#allocation29_spill] sm:$0xff] %v11639_v43 }
0x113f   :  { %v9386_v46 = vpop.eup %9385 }
0x1140   :  { %5943 = vrot.lane.b32.xlu0 %v9386_v46, %s9429_s3  ;;  %v9388_v22 = vpop.eup %9387  ;;  %v11636_v46 = vand.u32 4294901760, %v6643_v60 }
0x1141   :  { %v5924_v45 = vadd.f32 1.0, %v9388_v22  ;;  %v11642_v22 = vsub.f32 %v6645_v31, %v11632_v62 }
0x1143   :  { %9389 = vrcp.f32 %v5924_v45  ;;  %v11645_v45 = vsub.f32 %v6644_v23, %v11634_v8  ;;  %v6632_v23 = vld [vmem:[#allocation2 + $0x8] sm:$0xff] }
0x1150   :  { %v9390_v50 = vpop.eup %9389 }
0x11b2   :  { %v5944_v63 = vpop.permute.xlu0 %5943 }
0x11b3   :  { %v11545_v30 = vmul.f32 %v9390_v50, %v5944_v63  ;;  %v11649_v50 = vsub.f32 %v6643_v60, %v11636_v46  ;;  %v11653_v63 = vand.u32 4294901760, %v11639_v43 }
0x11b5   :  { %v5952_v34 = vsel %vm1162_vm1, %v11545_v30, 0 }
0x11b6   :  { %v11549_v28 = vand.u32 4294901760, %v5952_v34 }
0x11b8   :  { %v6036_v56 = vsub.f32 %v5952_v34, %v11549_v28  ;;  %6192 = vmatmul.mubr.f32.vlgmr.msra.gmra.mxu1 %v11549_v28  ;;  %v11656_v34 = vand.u32 4294901760, %v11642_v22 }
0x11b9   :  { %6322 = vmatpush1.msra.mxu1 %v10379_v1  ;;  %6383 = vmatprep.mubr.f32.mxu1 %v12741_v20 }
0x11ba   :  { %6324 = vmatprep.subr.mxu1 %v10390_v5  ;;  %v6037_v52 = vand.u32 4294901760, %v6036_v56 }
0x11bb   :  { %6326 = vmatpush1.msra.mxu1 %v10404_v9 }
0x11bc   :  { %6328 = vmatprep.subr.mxu1 %v10418_v2  ;;  %v6038_v42 = vsub.f32 %v6036_v56, %v6037_v52 }
0x11bd   :  { %6330 = vmatpush1.msra.mxu1 %v10423_v16 }
0x11be   :  { %6332 = vmatprep.subr.mxu1 %v10434_v17  ;;  %v6039_v58 = vand.u32 4294901760, %v6038_v42  ;;  %v6828_v42 = vsub.f32 %v11642_v22, %v11656_v34 }
0x11bf   :  { %6334 = vmatpush1.msra.mxu1 %v10456_v41 }
0x11c0   :  { %6336 = vmatprep.subr.mxu1 %v10466_v53  ;;  %6040 = vmatmul.mubr.f32.vlgmr.msra.gmra.mxu0 %v6039_v58 }
0x11c1   :  { %6219 = vmatpush1.msra.mxu0 %v10413_v14  ;;  %6338 = vmatpush1.msra.mxu1 %v10479_v12  ;;  %v12921_v14 = vld [vmem:[#allocation41_spill] sm:$0xff] }
0x11c2   :  { %6222 = vmatprep.subr.mxu0 %v10429_v55  ;;  %6340 = vmatprep.subr.mxu1 %v10493_v61  ;;  %v12924_v55 = vld [vmem:[#allocation28_spill] sm:$0xff] }
0x11c3   :  { %6225 = vmatpush1.msra.mxu0 %v10452_v6  ;;  %6342 = vmatpush1.msra.mxu1 %v10506_v40 }
0x11c4   :  { %6228 = vmatprep.subr.mxu0 %v10462_v54  ;;  %6344 = vmatprep.subr.mxu1 %v10518_v0 }
0x11c5   :  { %6231 = vmatpush1.msra.mxu0 %v10475_v25  ;;  %6346 = vmatpush1.msra.mxu1 %v10531_v18 }
0x11c6   :  { %6234 = vmatprep.subr.mxu0 %v10485_v35  ;;  %6348 = vmatprep.subr.mxu1 %v10533_v4 }
0x11c7   :  { %6237 = vmatpush1.msra.mxu0 %v10512_v59  ;;  %6350 = vmatpush1.msra.mxu1 %v10556_v57 }
0x11c8   :  { %6240 = vmatprep.subr.mxu0 %v10527_v39  ;;  %6387 = vmatmul.mubr.f32.vlgmr.msra.gmra.mxu1 %v6037_v52  ;;  %v6822_v52 = vsub.f32 %v11639_v43, %v11653_v63 }
0x11c9   :  { %6530 = vmatprep.subr.mxu1 %v10377_v3  ;;  %6243 = vmatpush1.msra.mxu0 %v10539_v38  ;;  %v12917_v3 = vld [vmem:[#allocation20_spill] sm:$0xff] }
0x11ca   :  { %6532 = vmatpush1.msra.mxu1 %v10379_v1  ;;  %6246 = vmatprep.subr.mxu0 %v10550_v10  ;;  %v12918_v1 = vld [vmem:[#allocation21_spill] sm:$0xff] }
0x11cb   :  { %6534 = vmatprep.subr.mxu1 %v10390_v5  ;;  %6249 = vmatpush1.msra.mxu0 %v10562_v15  ;;  %v12919_v5 = vld [vmem:[#allocation33_spill] sm:$0xff] }
0x11cc   :  { %6536 = vmatpush1.msra.mxu1 %v10404_v9  ;;  %6252 = vmatprep.subr.mxu0 %v10574_v7  ;;  %v12920_v9 = vld [vmem:[#allocation37_spill] sm:$0xff] }
0x11cd   :  { %6538 = vmatprep.subr.mxu1 %v10418_v2  ;;  %6255 = vmatpush1.msra.mxu0 %v10584_v48  ;;  %v12922_v2 = vld [vmem:[#allocation6_spill] sm:$0xff] }
0x11ce   :  { %6540 = vmatpush1.msra.mxu1 %v10423_v16  ;;  %6258 = vmatprep.subr.mxu0 %v10594_v49  ;;  %v12923_v16 = vld [vmem:[#allocation26_spill] sm:$0xff] }
0x11cf   :  { %6542 = vmatprep.subr.mxu1 %v10434_v17  ;;  %6261 = vmatpush1.msra.mxu0 %v10606_v13  ;;  %v12925_v17 = vld [vmem:[#allocation15_spill] sm:$0xff] }
0x11d0   :  { %6294 = vmatprep.mubr.f32.mxu0 %v12741_v20  ;;  %6544 = vmatpush1.msra.mxu1 %v10456_v41 }
0x11d1   :  { %6297 = vmatmul.mubr.f32.vlgmr.msra.gmra.mxu0 %v6036_v56  ;;  %6412 = vmatprep.subr.mxu0 %v10443_v24  ;;  %v5947_v24 = vrot.slane %v12925_v17, 6  ;;  %v11663_v56 = vand.u32 4294901760, %v11649_v50 }
0x11d2   :  { %6546 = vmatprep.subr.mxu1 %v10466_v53  ;;  %6416 = vmatpush1.msra.mxu0 %v10449_v21 }
0x11d3   :  { %6548 = vmatpush1.msra.mxu1 %v10479_v12  ;;  %6420 = vmatprep.subr.mxu0 %v10469_v29 }
0x11d4   :  { %6550 = vmatprep.subr.mxu1 %v10493_v61  ;;  %6424 = vmatpush1.msra.mxu0 %v10496_v44  ;;  %v5948_v44 = vrot.slane %v12862_v26, 6 }
0x11d5   :  { %6552 = vmatpush1.msra.mxu1 %v10506_v40  ;;  %6428 = vmatprep.subr.mxu0 %v12751_v37 }
0x11d6   :  { %6554 = vmatprep.subr.mxu1 %v10518_v0  ;;  %6432 = vmatpush1.msra.mxu0 %v12752_v51 }
0x11d7   :  { %6556 = vmatpush1.msra.mxu1 %v10531_v18  ;;  %6436 = vmatprep.subr.mxu0 %v12753_v33 }
0x11d8   :  { %6558 = vmatprep.subr.mxu1 %v10533_v4  ;;  %6440 = vmatpush1.msra.mxu0 %v12754_v32 }
0x11d9   :  { %6560 = vmatpush1.msra.mxu1 %v10556_v57  ;;  %6593 = vmatprep.mubr.f32.mxu1 %v12741_v20 }
0x11da   :  { %6444 = vmatprep.subr.mxu0 %v12917_v3  ;;  %6595 = vmatmul.mubr.f32.vlgmr.msra.gmra.mxu1 %v11549_v28  ;;  %v6840_v3 = vsub.f32 %v11649_v50, %v11663_v56 }
0x11db   :  { %6448 = vmatpush1.msra.mxu0 %v12918_v1  ;;  %6505 = vmatprep.mubr.f32.mxu0 %v12741_v20  ;;  %v11674_v1 = vand.u32 4294901760, %v6822_v52 }
0x11dc   :  { %6452 = vmatprep.subr.mxu0 %v12919_v5  ;;  %6947 = vmatprep.mubr.f32.mxu1 %v12741_v20  ;;  %v11676_v5 = vand.u32 4294901760, %v6828_v42 }
0x11dd   :  { %6456 = vmatpush1.msra.mxu0 %v12920_v9  ;;  %12927 = vst [vmem:[#allocation44_spill] sm:$0xff] %v11674_v1  ;;  %6824 = vmatprep.subr.mxu1 %v11674_v1 }
0x11de   :  { %6460 = vmatprep.subr.mxu0 %v12921_v14  ;;  %12928 = vst [vmem:[#allocation31_spill] sm:$0xff] %v11676_v5  ;;  %v11680_v14 = vand.u32 4294901760, %v6840_v3  ;;  %6830 = vmatpush1.msra.mxu1 %v11676_v5  ;;  %v6631_v3 = vld [vmem:[#allocation2] sm:$0xff] }
0x11df   :  { %6464 = vmatpush1.msra.mxu0 %v12922_v2  ;;  %v6642_v2 = vld [vmem:[#allocation2 + $0x58] sm:$0xff] }
0x11e0   :  { %6468 = vmatprep.subr.mxu0 %v12923_v16  ;;  %12930 = vst [vmem:[#allocation8_spill] sm:$0xff] %v11680_v14  ;;  %v11686_v16 = vand.u32 4294901760, %v6642_v2 }
0x11e1   :  { %6472 = vmatpush1.msra.mxu0 %v12924_v55  ;;  %v6641_v55 = vld [vmem:[#allocation2 + $0x50] sm:$0xff] }
0x11e2   :  { %6507 = vmatmul.mubr.f32.vlgmr.msra.gmra.mxu0 %v11549_v28  ;;  %6728 = vmatprep.subr.mxu0 %v11630_v36  ;;  %v11659_v28 = vand.u32 4294901760, %v11645_v45  ;;  %v11688_v17 = vand.u32 4294901760, %v6641_v55 }
0x11e3   :  { %6791 = vmatprep.mubr.f32.mxu0 %v12741_v20  ;;  %6730 = vmatpush1.msra.mxu0 %v11632_v62 }
0x11e4   :  { %6732 = vmatprep.subr.mxu0 %v11634_v8  ;;  %v6834_v58 = vsub.f32 %v11645_v45, %v11659_v28 }
0x11e5   :  { %6734 = vmatpush1.msra.mxu0 %v11636_v46 }
0x11e6   :  { %v11678_v9 = vand.u32 4294901760, %v6834_v58  ;;  %6736 = vmatprep.subr.mxu0 %v11686_v16 }
0x11e7   :  { %6738 = vmatpush1.msra.mxu0 %v11688_v17 }
0x11e8   :  { %12929 = vst [vmem:[#allocation5_spill] sm:$0xff] %v11678_v9  ;;  %6836 = vmatprep.subr.mxu1 %v11678_v9  ;;  %v12956_v9 = vld [vmem:[#allocation25_spill] sm:$0xff] }
0x11e9   :  { %6842 = vmatpush1.msra.mxu1 %v11680_v14 }
0x1278   :  { %v6193_v41 = vpop.f32.mrf.mxu1 }
0x127a   :  { %v6195_v29 = vpop.f32.mrf.mxu1 }
0x1280   :  { %v6041_v21 = vpop.f32.mrf.mxu0 }
0x1281   :  { %v6042_v6 = vadd.f32 %v6041_v21, %v5947_v24  ;;  %v6640_v24 = vld [vmem:[#allocation2 + $0x48] sm:$0xff]  ;;  %v11691_v21 = vsub.f32 %v6642_v2, %v11686_v16 }
0x1282   :  { %v6043_v53 = vpop.f32.mrf.mxu0 }
0x1283   :  { %v6194_v54 = vadd.f32 %v6193_v41, %v6042_v6  ;;  %v6044_v40 = vadd.f32 %v6043_v53, %v5948_v44  ;;  %v11693_v6 = vand.u32 4294901760, %v6640_v24  ;;  %v6639_v41 = vld [vmem:[#allocation2 + $0x40] sm:$0xff] }
0x1284   :  { %v11699_v53 = vand.u32 4294901760, %v6639_v41 }
0x1285   :  { %v6196_v0 = vadd.f32 %v6195_v29, %v6044_v40  ;;  %v6638_v29 = vld [vmem:[#allocation2 + $0x38] sm:$0xff]  ;;  %6740 = vmatprep.subr.mxu0 %v11693_v6 }
0x1286   :  { %6742 = vmatpush1.msra.mxu0 %v11699_v53 }
0x1288   :  { %v6388_v35 = vpop.f32.mrf.mxu1 }
0x128a   :  { %v6390_v18 = vpop.f32.mrf.mxu1 }
0x1291   :  { %v6298_v25 = vpop.f32.mrf.mxu0 }
0x1292   :  { %v6299_v12 = vadd.f32 %v6298_v25, %v6194_v54  ;;  %v11697_v54 = vsub.f32 %v6641_v55, %v11688_v17  ;;  %v11703_v25 = vand.u32 4294901760, %v11691_v21 }
0x1293   :  { %v6300_v59 = vpop.f32.mrf.mxu0 }
0x1294   :  { %v6389_v61 = vadd.f32 %v6388_v35, %v6299_v12  ;;  %v6301_v39 = vadd.f32 %v6300_v59, %v6196_v0  ;;  %v11706_v12 = vsub.f32 %v6640_v24, %v11693_v6  ;;  %v11708_v35 = vand.u32 4294901760, %v6638_v29 }
0x1295   :  { %v11713_v40 = vand.u32 4294901760, %v11697_v54  ;;  %v11716_v59 = vsub.f32 %v6639_v41, %v11699_v53 }
0x1296   :  { %v6391_v57 = vadd.f32 %v6390_v18, %v6301_v39  ;;  %v6636_v39 = vld [vmem:[#allocation2 + $0x28] sm:$0xff]  ;;  %6744 = vmatprep.subr.mxu0 %v11708_v35 }
0x129a   :  { %v6596_v4 = vpop.f32.mrf.mxu1 }
0x129c   :  { %v6598_v49 = vpop.f32.mrf.mxu1 }
0x12a2   :  { %v6508_v38 = vpop.f32.mrf.mxu0 }
0x12a3   :  { %v6509_v10 = vadd.f32 %v6508_v38, %v6389_v61  ;;  %v6637_v61 = vld [vmem:[#allocation2 + $0x30] sm:$0xff]  ;;  %v11724_v38 = vand.u32 4294901760, %v11706_v12 }
0x12a4   :  { %v6510_v15 = vpop.f32.mrf.mxu0  ;;  %v11718_v0 = vand.u32 4294901760, %v6637_v61 }
0x12a5   :  { %v6597_v7 = vadd.f32 %v6596_v4, %v6509_v10  ;;  %v6511_v48 = vadd.f32 %v6510_v15, %v6391_v57  ;;  %v6846_v4 = vsub.f32 %v11691_v21, %v11703_v25  ;;  %v11729_v10 = vand.u32 4294901760, %v6636_v39 }
0x12a6   :  { %v6852_v15 = vsub.f32 %v11697_v54, %v11713_v40  ;;  %6746 = vmatpush1.msra.mxu0 %v11718_v0 }
0x12a7   :  { %v11625_v13 = vadd.f32 %v6598_v49, %v6511_v48  ;;  %v9102_v51 = vmul.f32 -1.442695, %v6597_v7  ;;  %v11735_v7 = vand.u32 4294901760, %v11716_v59  ;;  %v11738_v48 = vsub.f32 %v6637_v61, %v11718_v0  ;;  %v6635_v49 = vld [vmem:[#allocation2 + $0x20] sm:$0xff]  ;;  %6748 = vmatprep.subr.mxu0 %v11729_v10 }
0x12a8   :  { %v11767_v58 = vand.u32 4294901760, %v6635_v49 }
0x12a9   :  { %9391 = vtanh.f32 %v11625_v13  ;;  %12931 = vst [vmem:[#allocation34_spill] sm:$0xff] %v11735_v7  ;;  %v6864_v11 = vsub.f32 %v11716_v59, %v11735_v7  ;;  %v11757_v31 = vand.u32 4294901760, %v11738_v48 }
0x12aa   :  { %9393 = vpow2.f32 %v9102_v51  ;;  %v6858_v51 = vsub.f32 %v11706_v12, %v11724_v38  ;;  %6750 = vmatpush1.msra.mxu0 %v11767_v58 }
0x12ab   :  { %12935 = vst [vmem:[#allocation12_spill] sm:$0xff] %v11757_v31  ;;  %v11770_v2 = vand.u32 4294901760, %v6864_v11  ;;  %v6876_v55 = vsub.f32 %v11738_v48, %v11757_v31 }
0x12ac   :  { %v11760_v60 = vand.u32 4294901760, %v6858_v51 }
0x12ad   :  { %12938 = vst [vmem:[#allocation23_spill] sm:$0xff] %v11770_v2 }
0x12ae   :  { %12936 = vst [vmem:[#allocation16_spill] sm:$0xff] %v11760_v60 }
0x12b6   :  { %v9392_v37 = vpop.eup %9391 }
0x12b7   :  { %6616 = vrot.lane.b32.xlu1 %v9392_v37, %s9429_s3  ;;  %v9394_v33 = vpop.eup %9393  ;;  %v11741_v37 = vand.u32 4294901760, %v6846_v4 }
0x12b8   :  { %v6607_v32 = vadd.f32 1.0, %v9394_v33 }
0x12b9   :  { %12932 = vst [vmem:[#allocation17_spill] sm:$0xff] %v11741_v37  ;;  %6848 = vmatprep.subr.mxu1 %v11741_v37 }
0x12ba   :  { %9395 = vrcp.f32 %v6607_v32  ;;  %v11749_v32 = vsub.f32 %v6636_v39, %v11729_v10  ;;  %v11786_v39 = vand.u32 4294901760, %v6632_v23 }
0x12bc   :  { %v11765_v42 = vand.u32 4294901760, %v11749_v32  ;;  %v11808_v11 = vsub.f32 %v6632_v23, %v11786_v39 }
0x12be   :  { %12937 = vst [vmem:[#allocation18_spill] sm:$0xff] %v11765_v42  ;;  %v6882_v61 = vsub.f32 %v11749_v32, %v11765_v42 }
0x12c7   :  { %v9396_v26 = vpop.eup %9395 }
0x12c8   :  { %v6614_v44 = vmul.f32 %v9396_v26, %v11541_v27  ;;  %v11727_v27 = vsub.f32 %v6638_v29, %v11708_v35 }
0x12ca   :  { %v11746_v33 = vand.u32 4294901760, %v11727_v27 }
0x12cc   :  { %12933 = vst [vmem:[#allocation14_spill] sm:$0xff] %v11746_v33  ;;  %v6870_v52 = vsub.f32 %v11727_v27, %v11746_v33 }
0x12ce   :  { %v11779_v29 = vand.u32 4294901760, %v6870_v52 }
0x12d0   :  { %12939 = vst [vmem:[#allocation35_spill] sm:$0xff] %v11779_v29 }
0x1329   :  { %v6617_v19 = vpop.permute.xlu1 %6616 }
0x132a   :  { %v6619_v47 = vmul.f32 %v9396_v26, %v6617_v19  ;;  %v6634_v26 = vld [vmem:[#allocation2 + $0x18] sm:$0xff]  ;;  %v6633_v19 = vld [vmem:[#allocation2 + $0x10] sm:$0xff] }
0x132b   :  { %v11774_v24 = vand.u32 4294901760, %v6634_v26  ;;  %v11776_v41 = vand.u32 4294901760, %v6633_v19 }
0x132c   :  { %6621 = vrot.lane.b32.xlu0 %v6619_v47, %s9429_s3  ;;  %v11752_v47 = vand.u32 4294901760, %v6852_v15  ;;  %v11798_v15 = vand.u32 4294901760, %v6631_v3 }
0x132d   :  { %v11793_v4 = vsub.f32 %v6634_v26, %v11774_v24  ;;  %6752 = vmatprep.subr.mxu0 %v11774_v24 }
0x132e   :  { %12934 = vst [vmem:[#allocation42_spill] sm:$0xff] %v11752_v47  ;;  %6854 = vmatpush1.msra.mxu1 %v11752_v47  ;;  %6754 = vmatpush1.msra.mxu0 %v11776_v41  ;;  %v11819_v52 = vsub.f32 %v6631_v3, %v11798_v15 }
0x132f   :  { %6860 = vmatprep.subr.mxu1 %v11760_v60  ;;  %v11813_v26 = vand.u32 4294901760, %v11793_v4  ;;  %6756 = vmatprep.subr.mxu0 %v11786_v39 }
0x1330   :  { %6866 = vmatpush1.msra.mxu1 %v11770_v2  ;;  %6758 = vmatpush1.msra.mxu0 %v11798_v15  ;;  %v11834_v3 = vand.u32 4294901760, %v11819_v52 }
0x1331   :  { %6872 = vmatprep.subr.mxu1 %v11779_v29  ;;  %12943 = vst [vmem:[#allocation30_spill] sm:$0xff] %v11813_v26  ;;  %6973 = vmatprep.subr.mxu0 %v11639_v43  ;;  %v12955_v43 = vld [vmem:[#allocation43_spill] sm:$0xff] }
0x1332   :  { %12946 = vst [vmem:[#allocation10_spill] sm:$0xff] %v11834_v3  ;;  %v6912_v47 = vsub.f32 %v11819_v52, %v11834_v3 }
0x1334   :  { %v11851_v14 = vand.u32 4294901760, %v6912_v47  ;;  %v12953_v47 = vld [vmem:[#allocation27_spill] sm:$0xff] }
0x1336   :  { %12951 = vst [vmem:[#allocation22_spill] sm:$0xff] %v11851_v14 }
0x139e   :  { %v6622_v18 = vpop.permute.xlu0 %6621 }
0x139f   :  { %v6624_v57 = vadd.f32 %v6622_v18, %v6614_v44  ;;  %v11784_v44 = vsub.f32 %v6635_v49, %v11767_v58  ;;  %v11790_v18 = vand.u32 4294901760, %v6876_v55  ;;  %v11802_v49 = vand.u32 4294901760, %v6882_v61 }
0x13a0   :  { %v11826_v55 = vand.u32 4294901760, %v11808_v11  ;;  %v6894_v61 = vsub.f32 %v11793_v4, %v11813_v26 }
0x13a1   :  { %9397 = vtanh.f32 %v6624_v57  ;;  %12940 = vst [vmem:[#allocation39_spill] sm:$0xff] %v11790_v18  ;;  %v11796_v57 = vsub.f32 %v6633_v19, %v11776_v41  ;;  %12941 = vst [vmem:[#allocation24_spill] sm:$0xff] %v11802_v49  ;;  %v11805_v51 = vand.u32 4294901760, %v11784_v44  ;;  %6878 = vmatpush1.msra.mxu1 %v11790_v18 }
0x13a2   :  { %6884 = vmatprep.subr.mxu1 %v11802_v49  ;;  %12945 = vst [vmem:[#allocation32_spill] sm:$0xff] %v11826_v55  ;;  %v6906_v29 = vsub.f32 %v11808_v11, %v11826_v55  ;;  %v11841_v2 = vand.u32 4294901760, %v6894_v61 }
0x13a3   :  { %12942 = vst [vmem:[#allocation7_spill] sm:$0xff] %v11805_v51  ;;  %v11816_v19 = vand.u32 4294901760, %v11796_v57  ;;  %v6888_v23 = vsub.f32 %v11784_v44, %v11805_v51 }
0x13a4   :  { %12948 = vst [vmem:[#allocation36_spill] sm:$0xff] %v11841_v2  ;;  %v11848_v37 = vand.u32 4294901760, %v6906_v29 }
0x13a5   :  { %12944 = vst [vmem:[#allocation9_spill] sm:$0xff] %v11816_v19  ;;  %v6900_v18 = vsub.f32 %v11796_v57, %v11816_v19  ;;  %v11837_v49 = vand.u32 4294901760, %v6888_v23  ;;  %v12957_v19 = vld [vmem:[#allocation19_spill] sm:$0xff] }
0x13a6   :  { %12950 = vst [vmem:[#allocation13_spill] sm:$0xff] %v11848_v37 }
0x13a7   :  { %12947 = vst [vmem:[#allocation11_spill] sm:$0xff] %v11837_v49  ;;  %v11843_v60 = vand.u32 4294901760, %v6900_v18  ;;  %6890 = vmatpush1.msra.mxu1 %v11837_v49  ;;  %v9103_v18 = vmul.f32 -1.442695, %v11625_v13  ;;  %v6656_v13 = vsel %vm105_vm0, %v12956_v9, %v12955_v43 }
0x13a8   :  { %6896 = vmatprep.subr.mxu1 %v11841_v2  ;;  %v12952_v2 = vld [vmem:[#allocation46_spill] sm:$0xff] }
0x13a9   :  { %12949 = vst [vmem:[#allocation38_spill] sm:$0xff] %v11843_v60  ;;  %6902 = vmatpush1.msra.mxu1 %v11843_v60  ;;  %9399 = vpow2.f32 %v9103_v18  ;;  %v6657_v49 = vsel %vm105_vm0, %v12953_v47, %v12952_v2 }
0x13aa   :  { %6908 = vmatprep.subr.mxu1 %v11848_v37  ;;  %v12954_v37 = vld [vmem:[#allocation45_spill] sm:$0xff]  ;;  %v7888_v1 = vrot.slane %v6657_v49, 6 }
0x13ab   :  { %6914 = vmatpush1.msra.mxu1 %v11851_v14  ;;  %v6655_v14 = vsel %vm105_vm0, %v12954_v37, %v11545_v30  ;;  %v6660_v51 = vsel %vm105_vm0, %v11545_v30, %v12954_v37 }
0x13ac   :  { %7077 = vmatprep.subr.mxu1 %v11630_v36  ;;  %v6663_v55 = vrot.slane %v6655_v14, 7  ;;  %v6678_v33 = vrot.slane %v6660_v51, 2 }
0x13ae   :  { %v9398_v23 = vpop.eup %9397 }
0x13af   :  { %6627 = vrot.lane.b32.xlu1 %v9398_v23, %s9429_s3  ;;  %v6658_v23 = vsel %vm105_vm0, %v12952_v2, %v12953_v47  ;;  %v6659_v2 = vsel %vm105_vm0, %v12955_v43, %v12956_v9  ;;  %v6666_v47 = vrot.slane %v6656_v13, 6 }
0x13b0   :  { %v7890_v3 = vrot.slane %v6658_v23, 5  ;;  %v6675_v9 = vrot.slane %v6659_v2, 3 }
0x13b6   :  { %v9400_v29 = vpop.eup %9399 }
0x13b7   :  { %v6608_v61 = vadd.f32 1.0, %v9400_v29  ;;  %v6669_v29 = vrot.slane %v6657_v49, 5 }
0x13b9   :  { %9401 = vrcp.f32 %v6608_v61  ;;  %v6672_v61 = vrot.slane %v6658_v23, 4  ;;  %v7886_v23 = vrot.slane %v6656_v13, 7 }
0x13c6   :  { %v9402_v60 = vpop.eup %9401 }
0x1421   :  { %v6628_v18 = vpop.permute.xlu1 %6627 }
0x1422   :  { %v6630_v5 = vmul.f32 %v9402_v60, %v6628_v18 }
0x1424   :  { %v6654_v26 = vsel %vm105_vm0, %v12957_v19, %v6630_v5  ;;  %v6661_v18 = vsel %vm105_vm0, %v6630_v5, %v12957_v19  ;;  %v7894_v19 = vrot.slane %v6660_v51, 3 }
0x1425   :  { %v6684_v60 = vsel %vm6683_vm2, %v6654_v26, %v6663_v55  ;;  %v7884_v49 = vrot.slane %v6654_v26, 1  ;;  %v7892_v26 = vrot.slane %v6659_v2, 4  ;;  %v6681_v55 = vrot.slane %v6661_v18, 1  ;;  %v12958_v2 = vld [vmem:[#allocation14_spill] sm:$0xff] }
0x1426   :  { %v6686_v43 = vsel %vm6685_vm3, %v6684_v60, %v6666_v47 }
0x1427   :  { %v6688_v42 = vsel %vm6687_vm4, %v6686_v43, %v6669_v29  ;;  %v7898_v31 = vsel %vm6683_vm2, %v7884_v49, %v6655_v14  ;;  %v7896_v29 = vrot.slane %v6661_v18, 2  ;;  %v12960_v18 = vld [vmem:[#allocation18_spill] sm:$0xff] }
0x1428   :  { %v6690_v30 = vsel %vm6689_vm5, %v6688_v42, %v6672_v61  ;;  %v7899_v37 = vsel %vm6685_vm3, %v7898_v31, %v7886_v23  ;;  %v12959_v23 = vld [vmem:[#allocation12_spill] sm:$0xff] }
0x1429   :  { %v7900_v13 = vsel %vm6687_vm4, %v7899_v37, %v7888_v1  ;;  %v6692_v5 = vsel %vm6691_vm6, %v6690_v30, %v6675_v9  ;;  %v12961_v9 = vld [vmem:[#allocation7_spill] sm:$0xff]  ;;  %v12962_v30 = vld [vmem:[#allocation30_spill] sm:$0xff]  ;;  %v12963_v37 = vld [vmem:[#allocation9_spill] sm:$0xff] }
0x142a   :  { %v7901_v47 = vsel %vm6689_vm5, %v7900_v13, %v7890_v3  ;;  %v6694_v60 = vsel %vm6693_vm7, %v6692_v5, %v6678_v33  ;;  %v7370_v13 = vld [vmem:[%s12318_s8] sm:$0xff]  ;;  %v9430_v5 = vmov 0  }
0x142b   :  { %v7902_v14 = vsel %vm6691_vm6, %v7901_v47, %v7892_v26  ;;  %v6696_v49 = vsel %vm6695_vm8, %v6694_v60, %v6681_v55  ;;  %v12964_v26 = vld [vmem:[#allocation32_spill] sm:$0xff]  ;;  %v12965_v55 = vld [vmem:[#allocation10_spill] sm:$0xff]  ;;  %9306 = vset.pattern.permute.xlu0 %v9430_v5  ;;  %v6647_v47 = vld [vmem:[%s12315_s5] sm:$0x3] }
0x142c   :  { %v7903_v43 = vsel %vm6693_vm7, %v7902_v14, %v7894_v19  ;;  %v6709_v42 = vsel %vm1162_vm1, %v6696_v49, 0  ;;  %7373 = vperm.xlu0 %9306, %v7370_v13   ;;  %v9104_v19 = vld [vmem:[%s12318_s8 + $0x8] sm:$0xff] }
0x142d   :  { %v11894_v31 = vsel %vm6695_vm8, %v7903_v43, %v7896_v29  ;;  %v11896_v61 = vand.u32 4294901760, %v6709_v42  ;;  %v12966_v29 = vld [vmem:[#allocation40_spill] sm:$0xff] }
0x142e   :  { %v12967_v14 = vsub.s32 0, %v12966_v29  ;;  %v12968_v43 = vsub.s32 1, %v12966_v29 }
0x142f   :  { %v6793_v1 = vsub.f32 %v6709_v42, %v11896_v61  ;;  %6949 = vmatmul.mubr.f32.vlgmr.msra.gmra.mxu1 %v11896_v61 }
0x1430   :  { %7079 = vmatpush1.msra.mxu1 %v11632_v62  ;;  %7140 = vmatprep.mubr.f32.mxu1 %v12741_v20  ;;  %v11981_v49 = vrot.slane %v6647_v47, %v12967_v14  ;;  %v11985_v42 = vrot.slane %v6647_v47, %v12968_v43 }
0x1431   :  { %7081 = vmatprep.subr.mxu1 %v11634_v8  ;;  %v6794_v33 = vand.u32 4294901760, %v6793_v1  ;;  %8571 = vperm.xlu0 %9306, %v9104_v19  }
0x1432   :  { %7083 = vmatpush1.msra.mxu1 %v11636_v46  ;;  %12969 = vst [vmem:[#allocation20_spill] sm:$0xff] %v11985_v42 }
0x1433   :  { %7085 = vmatprep.subr.mxu1 %v11686_v16  ;;  %v6795_v51 = vsub.f32 %v6793_v1, %v6794_v33 }
0x1434   :  { %7087 = vmatpush1.msra.mxu1 %v11688_v17 }
0x1435   :  { %7089 = vmatprep.subr.mxu1 %v11693_v6  ;;  %v6796_v3 = vand.u32 4294901760, %v6795_v51 }
0x1436   :  { %7091 = vmatpush1.msra.mxu1 %v11699_v53 }
0x1437   :  { %7093 = vmatprep.subr.mxu1 %v11708_v35  ;;  %6797 = vmatmul.mubr.f32.vlgmr.msra.gmra.mxu0 %v6796_v3 }
0x1438   :  { %6976 = vmatpush1.msra.mxu0 %v11642_v22  ;;  %7095 = vmatpush1.msra.mxu1 %v11718_v0 }
0x1439   :  { %6979 = vmatprep.subr.mxu0 %v11645_v45  ;;  %7097 = vmatprep.subr.mxu1 %v11729_v10 }
0x143a   :  { %6982 = vmatpush1.msra.mxu0 %v11649_v50  ;;  %7099 = vmatpush1.msra.mxu1 %v11767_v58 }
0x143b   :  { %6985 = vmatprep.subr.mxu0 %v11691_v21  ;;  %7101 = vmatprep.subr.mxu1 %v11774_v24 }
0x143c   :  { %6988 = vmatpush1.msra.mxu0 %v11697_v54  ;;  %7103 = vmatpush1.msra.mxu1 %v11776_v41 }
0x143d   :  { %6991 = vmatprep.subr.mxu0 %v11706_v12  ;;  %7105 = vmatprep.subr.mxu1 %v11786_v39 }
0x143e   :  { %6994 = vmatpush1.msra.mxu0 %v11716_v59  ;;  %7107 = vmatpush1.msra.mxu1 %v11798_v15 }
0x143f   :  { %6997 = vmatprep.subr.mxu0 %v11727_v27  ;;  %7144 = vmatmul.mubr.f32.vlgmr.msra.gmra.mxu1 %v6794_v33 }
0x1440   :  { %7287 = vmatprep.subr.mxu1 %v11630_v36  ;;  %7000 = vmatpush1.msra.mxu0 %v11738_v48 }
0x1441   :  { %7289 = vmatpush1.msra.mxu1 %v11632_v62  ;;  %7003 = vmatprep.subr.mxu0 %v11749_v32 }
0x1442   :  { %7291 = vmatprep.subr.mxu1 %v11634_v8  ;;  %7006 = vmatpush1.msra.mxu0 %v11784_v44 }
0x1443   :  { %7293 = vmatpush1.msra.mxu1 %v11636_v46  ;;  %7009 = vmatprep.subr.mxu0 %v11793_v4 }
0x1444   :  { %7295 = vmatprep.subr.mxu1 %v11686_v16  ;;  %7012 = vmatpush1.msra.mxu0 %v11796_v57 }
0x1445   :  { %7297 = vmatpush1.msra.mxu1 %v11688_v17  ;;  %7015 = vmatprep.subr.mxu0 %v11808_v11 }
0x1446   :  { %7299 = vmatprep.subr.mxu1 %v11693_v6  ;;  %7018 = vmatpush1.msra.mxu0 %v11819_v52 }
0x1447   :  { %7051 = vmatprep.mubr.f32.mxu0 %v12741_v20  ;;  %7301 = vmatpush1.msra.mxu1 %v11699_v53 }
0x1448   :  { %7054 = vmatmul.mubr.f32.vlgmr.msra.gmra.mxu0 %v6793_v1  ;;  %7169 = vmatprep.subr.mxu0 %v11653_v63 }
0x1449   :  { %7303 = vmatprep.subr.mxu1 %v11708_v35  ;;  %7173 = vmatpush1.msra.mxu0 %v11656_v34 }
0x144a   :  { %7305 = vmatpush1.msra.mxu1 %v11718_v0  ;;  %7177 = vmatprep.subr.mxu0 %v11659_v28 }
0x144b   :  { %7307 = vmatprep.subr.mxu1 %v11729_v10  ;;  %7181 = vmatpush1.msra.mxu0 %v11663_v56 }
0x144c   :  { %7309 = vmatpush1.msra.mxu1 %v11767_v58  ;;  %7185 = vmatprep.subr.mxu0 %v11703_v25 }
0x144d   :  { %7311 = vmatprep.subr.mxu1 %v11774_v24  ;;  %7189 = vmatpush1.msra.mxu0 %v11713_v40 }
0x144e   :  { %7313 = vmatpush1.msra.mxu1 %v11776_v41  ;;  %7193 = vmatprep.subr.mxu0 %v11724_v38 }
0x144f   :  { %7315 = vmatprep.subr.mxu1 %v11786_v39  ;;  %7197 = vmatpush1.msra.mxu0 %v11735_v7 }
0x1450   :  { %7317 = vmatpush1.msra.mxu1 %v11798_v15  ;;  %7350 = vmatprep.mubr.f32.mxu1 %v12741_v20 }
0x1451   :  { %7201 = vmatprep.subr.mxu0 %v12958_v2  ;;  %7352 = vmatmul.mubr.f32.vlgmr.msra.gmra.mxu1 %v11896_v61 }
0x1452   :  { %7205 = vmatpush1.msra.mxu0 %v12959_v23  ;;  %7262 = vmatprep.mubr.f32.mxu0 %v12741_v20 }
0x1453   :  { %7209 = vmatprep.subr.mxu0 %v12960_v18  ;;  %9178 = vmatprep.subr.mxu1 %v12741_v20 }
0x1454   :  { %7213 = vmatpush1.msra.mxu0 %v12961_v9  ;;  %9186 = vmatprep.mubr.msk.f32.mxu1 %vm9431_vm9, %v12741_v20 }
0x1455   :  { %7217 = vmatprep.subr.mxu0 %v12962_v30 }
0x1456   :  { %7221 = vmatpush1.msra.mxu0 %v12963_v37 }
0x1457   :  { %7225 = vmatprep.subr.mxu0 %v12964_v26 }
0x1458   :  { %7229 = vmatpush1.msra.mxu0 %v12965_v55 }
0x1459   :  { %7264 = vmatmul.mubr.f32.vlgmr.msra.gmra.mxu0 %v11896_v61  ;;  %9167 = vmatprep.subr.mxu0 %v12741_v20 }
0x145a   :  { %9175 = vmatprep.mubr.msk.f32.mxu0 %vm9431_vm9, %v12741_v20 }
0x14ef   :  { %v6950_v61 = vpop.f32.mrf.mxu1 }
0x14f1   :  { %v6952_v13 = vpop.f32.mrf.mxu1 }
0x14f7   :  { %v6798_v60 = vpop.f32.mrf.mxu0 }
0x14f8   :  { %v6799_v51 = vadd.f32 %v6798_v60, %v11981_v49  ;;  %v11992_v60 = vld [vmem:[%s12316_s6 + $0x8] sm:$0xff] }
0x14f9   :  { %v6800_v1 = vpop.f32.mrf.mxu0  ;;  %12970 = vst [vmem:[#allocation21_spill] sm:$0xff] %v11992_v60 }
0x14fa   :  { %v6801_v3 = vadd.f32 %v6800_v1, %v11985_v42  ;;  %v6951_v55 = vadd.f32 %v6950_v61, %v6799_v51 }
0x14fc   :  { %v6953_v26 = vadd.f32 %v6952_v13, %v6801_v3 }
0x14ff   :  { %v7145_v5 = vpop.f32.mrf.mxu1 }
0x1501   :  { %v7147_v14 = vpop.f32.mrf.mxu1 }
0x1508   :  { %v7055_v33 = vpop.f32.mrf.mxu0 }
0x1509   :  { %v7056_v37 = vadd.f32 %v7055_v33, %v6951_v55 }
0x150a   :  { %v7057_v19 = vpop.f32.mrf.mxu0 }
0x150b   :  { %v7058_v30 = vadd.f32 %v7057_v19, %v6953_v26  ;;  %v7146_v29 = vadd.f32 %v7145_v5, %v7056_v37  ;;  %v11998_v26 = vld [vmem:[%s12316_s6] sm:$0xff]  ;;  %v12020_v37 = vld [vmem:[%s12317_s7 + $0x8] sm:$0xff] }
0x150c   :  { %12971 = vst [vmem:[#allocation33_spill] sm:$0xff] %v11998_v26  ;;  %12974 = vst [vmem:[#allocation6_spill] sm:$0xff] %v12020_v37 }
0x150d   :  { %v7148_v47 = vadd.f32 %v7147_v14, %v7058_v30  ;;  %v12015_v30 = vld [vmem:[%s12317_s7 + $0x10] sm:$0xff] }
0x150e   :  { %12973 = vst [vmem:[#allocation41_spill] sm:$0xff] %v12015_v30 }
0x1511   :  { %v7353_v9 = vpop.f32.mrf.mxu1 }
0x1513   :  { %v7355_v7 = vpop.f32.mrf.mxu1 }
0x1519   :  { %v7265_v18 = vpop.f32.mrf.mxu0 }
0x151a   :  { %v7266_v23 = vadd.f32 %v7265_v18, %v7146_v29 }
0x151b   :  { %v7267_v43 = vpop.f32.mrf.mxu0 }
0x151c   :  { %v7268_v2 = vadd.f32 %v7267_v43, %v7148_v47  ;;  %v7354_v42 = vadd.f32 %v7353_v9, %v7266_v23  ;;  %v7374_v23 = vpop.permute.xlu0 %7373  ;;  %v12010_v9 = vld [vmem:[%s12317_s7 + $0x18] sm:$0xff] }
0x151d   :  { %12972 = vst [vmem:[#allocation37_spill] sm:$0xff] %v12010_v9 }
0x151e   :  { %v7356_v1 = vadd.f32 %v7355_v7, %v7268_v2  ;;  %v7358_v18 = vmul.f32 %v7354_v42, %v11998_v26  ;;  %v12025_v42 = vld [vmem:[%s12317_s7] sm:$0xff] }
0x151f   :  { %12975 = vst [vmem:[#allocation26_spill] sm:$0xff] %v12025_v42 }
0x1520   :  { %v7359_v61 = vmul.f32 %v7356_v1, %v11992_v60 }
0x1522   :  { %7366 = vrot.lane.b32.xlu1 %v7359_v61, %s9429_s3 }
0x1526   :  { %7361 = vrot.lane.b32.xlu1 %v7358_v18, %s9429_s3 }
0x1594   :  { %v7367_v7 = vpop.permute.xlu1 %7366 }
0x1595   :  { %v7369_v2 = vadd.f32 %v7367_v7, %v7359_v61 }
0x1597   :  { %v7376_v55 = vmul.f32 %v7374_v23, %v7369_v2 }
0x1598   :  { %v7362_v33 = vpop.permute.xlu1 %7361 }
0x1599   :  { %v7364_v51 = vadd.f32 %v7362_v33, %v7358_v18  ;;  %v7380_v3 = vmul.f32 %v7376_v55, %v12010_v9  ;;  %v7379_v13 = vmul.f32 %v7376_v55, %v12015_v30  ;;  %v7378_v5 = vmul.f32 %v7376_v55, %v12020_v37 }
0x159a   :  { %v7377_v19 = vmul.f32 %v7376_v55, %v12025_v42 }
0x159b   :  { %v7383_v14 = vsel %vm1162_vm1, %v7364_v51, 0  ;;  %v7395_v29 = vsel %vm1162_vm1, %v7380_v3, 0  ;;  %v7392_v47 = vsel %vm1162_vm1, %v7379_v13, 0  ;;  %v7389_v43 = vsel %vm1162_vm1, %v7378_v5, 0 }
0x159c   :  { %v12035_v1 = vand.u32 4294901760, %v7383_v14  ;;  %v12037_v61 = vand.u32 4294901760, %v7395_v29  ;;  %v12039_v18 = vand.u32 4294901760, %v7392_v47  ;;  %v12041_v7 = vand.u32 4294901760, %v7389_v43 }
0x159d   :  { %v7386_v2 = vsel %vm1162_vm1, %v7377_v19, 0 }
0x159e   :  { %9168 = vmatpush3.xpose.msra.mxu0 %v12037_v61  ;;  %v7502_v23 = vsub.f32 %v7395_v29, %v12037_v61  ;;  %v7509_v55 = vsub.f32 %v7392_v47, %v12039_v18  ;;  %v7467_v33 = vsub.f32 %v7383_v14, %v12035_v1  ;;  %v7516_v51 = vsub.f32 %v7389_v43, %v12041_v7 }
0x159f   :  { %9169 = vmatprep.subr.mxu0 %v12741_v20  ;;  %v12050_v13 = vand.u32 4294901760, %v7386_v2 }
0x15a0   :  { %v7503_v3 = vand.u32 4294901760, %v7502_v23  ;;  %v7510_v5 = vand.u32 4294901760, %v7509_v55  ;;  %v7468_v19 = vand.u32 4294901760, %v7467_v33  ;;  %v7517_v30 = vand.u32 4294901760, %v7516_v51 }
0x15a1   :  { %v7523_v29 = vsub.f32 %v7386_v2, %v12050_v13 }
0x15a2   :  { %9170 = vmatpush3.xpose.msra.mxu0 %v12039_v18  ;;  %v7504_v42 = vsub.f32 %v7502_v23, %v7503_v3  ;;  %v7511_v47 = vsub.f32 %v7509_v55, %v7510_v5  ;;  %v7469_v14 = vsub.f32 %v7467_v33, %v7468_v19  ;;  %v7518_v9 = vsub.f32 %v7516_v51, %v7517_v30 }
0x15a3   :  { %9171 = vmatprep.subr.mxu0 %v12741_v20  ;;  %v7524_v60 = vand.u32 4294901760, %v7523_v29 }
0x15a4   :  { %v7505_v37 = vand.u32 4294901760, %v7504_v42  ;;  %v7512_v43 = vand.u32 4294901760, %v7511_v47  ;;  %v7470_v26 = vand.u32 4294901760, %v7469_v14  ;;  %v7519_v42 = vand.u32 4294901760, %v7518_v9  ;;  %v12988_v47 = vld [vmem:[#allocation11_spill] sm:$0xff]  ;;  %v12989_v14 = vld [vmem:[#allocation36_spill] sm:$0xff] }
0x15a5   :  { %v7525_v2 = vsub.f32 %v7523_v29, %v7524_v60 }
0x15a6   :  { %9172 = vmatpush3.xpose.msra.mxu0 %v12041_v7  ;;  %9179 = vmatpush3.xpose.msra.mxu1 %v7505_v37 }
0x15a7   :  { %9173 = vmatprep.subr.mxu0 %v12741_v20  ;;  %9180 = vmatprep.subr.mxu1 %v12741_v20  ;;  %v7526_v37 = vand.u32 4294901760, %v7525_v2 }
0x15aa   :  { %9174 = vmatpush3.xpose.msra.mxu0 %v12050_v13  ;;  %9181 = vmatpush3.xpose.msra.mxu1 %v7512_v43  ;;  %v12990_v43 = vld [vmem:[#allocation38_spill] sm:$0xff] }
0x15ab   :  { %9182 = vmatprep.subr.mxu1 %v12741_v20  ;;  %9189 = vmatprep.subr.mxu0 %v12741_v20 }
0x15ad   :  { %9176 = vmatmul.mubr.f32.vlgmr.msra.gmra.mxu0 %v7470_v26  ;;  %v7906_v26 = vsel %vm1162_vm1, %v11894_v31, 0 }
0x15ae   :  { %9183 = vmatpush3.xpose.msra.mxu1 %v7519_v42  ;;  %9190 = vmatpush3.xpose.msra.mxu0 %v7502_v23  ;;  %v12092_v9 = vand.u32 4294901760, %v7906_v26  ;;  %v12979_v23 = vld [vmem:[#allocation8_spill] sm:$0xff]  ;;  %v12991_v42 = vld [vmem:[#allocation13_spill] sm:$0xff] }
0x15af   :  { %9184 = vmatprep.subr.mxu1 %v12741_v20  ;;  %9191 = vmatprep.subr.mxu0 %v12741_v20 }
0x15b0   :  { %9197 = vmatprep.mubr.msk.f32.mxu0 %vm9431_vm9, %v12741_v20  ;;  %v12102_v31 = vsub.f32 %v7906_v26, %v12092_v9 }
0x15b2   :  { %9185 = vmatpush3.xpose.msra.mxu1 %v7526_v37  ;;  %9192 = vmatpush3.xpose.msra.mxu0 %v7509_v55  ;;  %v12981_v55 = vld [vmem:[#allocation42_spill] sm:$0xff] }
0x15b3   :  { %9193 = vmatprep.subr.mxu0 %v12741_v20  ;;  %9200 = vmatprep.subr.mxu1 %v12741_v20 }
0x15b5   :  { %9187 = vmatmul.mubr.f32.vlgmr.msra.gmra.mxu1 %v12035_v1 }
0x15b6   :  { %9194 = vmatpush3.xpose.msra.mxu0 %v7516_v51  ;;  %9201 = vmatpush3.xpose.msra.mxu1 %v12037_v61 }
0x15b7   :  { %9195 = vmatprep.subr.mxu0 %v12741_v20  ;;  %9202 = vmatprep.subr.mxu1 %v12741_v20 }
0x15b8   :  { %9208 = vmatprep.mubr.msk.f32.mxu1 %vm9431_vm9, %v12741_v20 }
0x15ba   :  { %9196 = vmatpush3.xpose.msra.mxu0 %v7523_v29  ;;  %9203 = vmatpush3.xpose.msra.mxu1 %v12039_v18  ;;  %v12987_v29 = vld [vmem:[#allocation24_spill] sm:$0xff] }
0x15bb   :  { %9204 = vmatprep.subr.mxu1 %v12741_v20  ;;  %9211 = vmatprep.subr.mxu0 %v12741_v20 }
0x15bd   :  { %9198 = vmatmul.mubr.f32.vlgmr.msra.gmra.mxu0 %v7467_v33  ;;  %v12982_v33 = vld [vmem:[#allocation16_spill] sm:$0xff] }
0x15be   :  { %9205 = vmatpush3.xpose.msra.mxu1 %v12041_v7  ;;  %9212 = vmatpush3.xpose.msra.mxu0 %v7503_v3  ;;  %v12983_v3 = vld [vmem:[#allocation23_spill] sm:$0xff] }
0x15bf   :  { %9206 = vmatprep.subr.mxu1 %v12741_v20  ;;  %9213 = vmatprep.subr.mxu0 %v12741_v20 }
0x15c0   :  { %9219 = vmatprep.mubr.msk.f32.mxu0 %vm9431_vm9, %v12741_v20 }
0x15c2   :  { %9207 = vmatpush3.xpose.msra.mxu1 %v12050_v13  ;;  %9214 = vmatpush3.xpose.msra.mxu0 %v7510_v5  ;;  %v12985_v5 = vld [vmem:[#allocation29_spill] sm:$0xff] }
0x15c3   :  { %9215 = vmatprep.subr.mxu0 %v12741_v20  ;;  %9222 = vmatprep.subr.mxu1 %v12741_v20 }
0x15c5   :  { %9209 = vmatmul.mubr.f32.vlgmr.msra.gmra.mxu1 %v7468_v19  ;;  %v12986_v19 = vld [vmem:[#allocation39_spill] sm:$0xff] }
0x15c6   :  { %9216 = vmatpush3.xpose.msra.mxu0 %v7517_v30  ;;  %9223 = vmatpush3.xpose.msra.mxu1 %v12037_v61  ;;  %v7991_v30 = vand.u32 4294901760, %v12102_v31  ;;  %v12977_v61 = vld [vmem:[#allocation31_spill] sm:$0xff] }
0x15c7   :  { %9217 = vmatprep.subr.mxu0 %v12741_v20  ;;  %9224 = vmatprep.subr.mxu1 %v12741_v20 }
0x15c8   :  { %9230 = vmatprep.mubr.msk.f32.mxu1 %vm9431_vm9, %v12741_v20 }
0x15ca   :  { %9218 = vmatpush3.xpose.msra.mxu0 %v7524_v60  ;;  %9225 = vmatpush3.xpose.msra.mxu1 %v12039_v18  ;;  %v12976_v60 = vld [vmem:[#allocation44_spill] sm:$0xff]  ;;  %v12978_v18 = vld [vmem:[#allocation5_spill] sm:$0xff] }
0x15cb   :  { %9226 = vmatprep.subr.mxu1 %v12741_v20  ;;  %7925 = vmatprep.subr.mxu0 %v11630_v36 }
0x15cd   :  { %9220 = vmatmul.mubr.f32.vlgmr.msra.gmra.mxu0 %v12035_v1 }
0x15ce   :  { %9227 = vmatpush3.xpose.msra.mxu1 %v12041_v7  ;;  %7927 = vmatpush1.msra.mxu0 %v11632_v62  ;;  %v7992_v7 = vsub.f32 %v12102_v31, %v7991_v30 }
0x15cf   :  { %7929 = vmatprep.subr.mxu0 %v11634_v8  ;;  %9228 = vmatprep.subr.mxu1 %v12741_v20 }
0x15d0   :  { %7931 = vmatpush1.msra.mxu0 %v11636_v46  ;;  %7988 = vmatprep.mubr.f32.mxu0 %v12741_v20  ;;  %v7993_v51 = vand.u32 4294901760, %v7992_v7 }
0x15d1   :  { %7933 = vmatprep.subr.mxu0 %v11686_v16 }
0x15d2   :  { %9229 = vmatpush3.xpose.msra.mxu1 %v12050_v13  ;;  %7935 = vmatpush1.msra.mxu0 %v11688_v17  ;;  %v12984_v13 = vld [vmem:[#allocation35_spill] sm:$0xff] }
0x15d3   :  { %7937 = vmatprep.subr.mxu0 %v11693_v6  ;;  %8021 = vmatprep.subr.mxu1 %v12976_v60 }
0x15d4   :  { %7939 = vmatpush1.msra.mxu0 %v11699_v53 }
0x15d5   :  { %9231 = vmatmul.mubr.f32.vlgmr.msra.gmra.mxu1 %v12035_v1  ;;  %7941 = vmatprep.subr.mxu0 %v11708_v35  ;;  %v12980_v1 = vld [vmem:[#allocation17_spill] sm:$0xff] }
0x15d6   :  { %7943 = vmatpush1.msra.mxu0 %v11718_v0  ;;  %8027 = vmatpush1.msra.mxu1 %v12977_v61 }
0x15d7   :  { %7945 = vmatprep.subr.mxu0 %v11729_v10  ;;  %8033 = vmatprep.subr.mxu1 %v12978_v18 }
0x15d8   :  { %7947 = vmatpush1.msra.mxu0 %v11767_v58  ;;  %8039 = vmatpush1.msra.mxu1 %v12979_v23 }
0x15d9   :  { %7949 = vmatprep.subr.mxu0 %v11774_v24  ;;  %8045 = vmatprep.subr.mxu1 %v12980_v1 }
0x15da   :  { %7951 = vmatpush1.msra.mxu0 %v11776_v41  ;;  %8051 = vmatpush1.msra.mxu1 %v12981_v55 }
0x15db   :  { %7953 = vmatprep.subr.mxu0 %v11786_v39  ;;  %8057 = vmatprep.subr.mxu1 %v12982_v33 }
0x15dc   :  { %7955 = vmatpush1.msra.mxu0 %v11798_v15  ;;  %8063 = vmatpush1.msra.mxu1 %v12983_v3  ;;  %v13003_v3 = vld [vmem:[#allocation33_spill] sm:$0xff] }
0x15dd   :  { %7994 = vmatmul.mubr.f32.vlgmr.msra.gmra.mxu0 %v7993_v51  ;;  %8069 = vmatprep.subr.mxu1 %v12984_v13 }
0x15de   :  { %8170 = vmatprep.subr.mxu0 %v12985_v5  ;;  %8075 = vmatpush1.msra.mxu1 %v12986_v19  ;;  %v13004_v5 = vld [vmem:[#allocation21_spill] sm:$0xff] }
0x15df   :  { %8173 = vmatpush1.msra.mxu0 %v11642_v22  ;;  %8081 = vmatprep.subr.mxu1 %v12987_v29  ;;  %v12992_v22 = vld [vmem:[#allocation22_spill] sm:$0xff]  ;;  %v8572_v29 = vpop.permute.xlu0 %8571 }
0x15e0   :  { %8176 = vmatprep.subr.mxu0 %v11645_v45  ;;  %8087 = vmatpush1.msra.mxu1 %v12988_v47  ;;  %v12993_v45 = vld [vmem:[#allocation34_spill] sm:$0xff] }
0x15e1   :  { %8179 = vmatpush1.msra.mxu0 %v11649_v50  ;;  %8093 = vmatprep.subr.mxu1 %v12989_v14  ;;  %v12994_v50 = vld [vmem:[#allocation14_spill] sm:$0xff] }
0x15e2   :  { %8182 = vmatprep.subr.mxu0 %v11691_v21  ;;  %8099 = vmatpush1.msra.mxu1 %v12990_v43  ;;  %v12999_v21 = vld [vmem:[#allocation9_spill] sm:$0xff] }
0x15e3   :  { %8185 = vmatpush1.msra.mxu0 %v11697_v54  ;;  %8105 = vmatprep.subr.mxu1 %v12991_v42 }
0x15e4   :  { %8188 = vmatprep.subr.mxu0 %v11706_v12  ;;  %8111 = vmatpush1.msra.mxu1 %v12992_v22  ;;  %v7381_v12 = vld [vmem:[%s12319_s9] sm:$0xff] }
0x15e5   :  { %8144 = vmatprep.mubr.f32.mxu1 %v12741_v20  ;;  %8191 = vmatpush1.msra.mxu0 %v11716_v59 }
0x15e6   :  { %8146 = vmatmul.mubr.f32.vlgmr.msra.gmra.mxu1 %v12092_v9  ;;  %8194 = vmatprep.subr.mxu0 %v11727_v27 }
0x15e7   :  { %8274 = vmatprep.subr.mxu1 %v11630_v36  ;;  %8197 = vmatpush1.msra.mxu0 %v11738_v48 }
0x15e8   :  { %8276 = vmatpush1.msra.mxu1 %v11632_v62  ;;  %8200 = vmatprep.subr.mxu0 %v11749_v32 }
0x15e9   :  { %8278 = vmatprep.subr.mxu1 %v11634_v8  ;;  %8203 = vmatpush1.msra.mxu0 %v11784_v44 }
0x15ea   :  { %8280 = vmatpush1.msra.mxu1 %v11636_v46  ;;  %8206 = vmatprep.subr.mxu0 %v11793_v4 }
0x15eb   :  { %8282 = vmatprep.subr.mxu1 %v11686_v16  ;;  %8209 = vmatpush1.msra.mxu0 %v11796_v57 }
0x15ec   :  { %8284 = vmatpush1.msra.mxu1 %v11688_v17  ;;  %8212 = vmatprep.subr.mxu0 %v11808_v11 }
0x15ed   :  { %8286 = vmatprep.subr.mxu1 %v11693_v6  ;;  %8215 = vmatpush1.msra.mxu0 %v11819_v52  ;;  %v13002_v52 = vld [vmem:[#allocation20_spill] sm:$0xff] }
0x15ee   :  { %8248 = vmatprep.mubr.f32.mxu0 %v12741_v20  ;;  %8288 = vmatpush1.msra.mxu1 %v11699_v53 }
0x15ef   :  { %8251 = vmatmul.mubr.f32.vlgmr.msra.gmra.mxu0 %v12102_v31  ;;  %8290 = vmatprep.subr.mxu1 %v11708_v35 }
0x15f0   :  { %8366 = vmatprep.subr.mxu0 %v11653_v63  ;;  %8292 = vmatpush1.msra.mxu1 %v11718_v0  ;;  %v12995_v63 = vld [vmem:[#allocation12_spill] sm:$0xff] }
0x15f1   :  { %8370 = vmatpush1.msra.mxu0 %v11656_v34  ;;  %8294 = vmatprep.subr.mxu1 %v11729_v10  ;;  %v12996_v34 = vld [vmem:[#allocation18_spill] sm:$0xff] }
0x15f2   :  { %8374 = vmatprep.subr.mxu0 %v11659_v28  ;;  %8296 = vmatpush1.msra.mxu1 %v11767_v58  ;;  %v12997_v28 = vld [vmem:[#allocation7_spill] sm:$0xff] }
0x15f3   :  { %8378 = vmatpush1.msra.mxu0 %v11663_v56  ;;  %8298 = vmatprep.subr.mxu1 %v11774_v24  ;;  %v12998_v56 = vld [vmem:[#allocation30_spill] sm:$0xff] }
0x15f4   :  { %8382 = vmatprep.subr.mxu0 %v11703_v25  ;;  %8300 = vmatpush1.msra.mxu1 %v11776_v41 }
0x15f5   :  { %8386 = vmatpush1.msra.mxu0 %v11713_v40  ;;  %8302 = vmatprep.subr.mxu1 %v11786_v39 }
0x15f6   :  { %8390 = vmatprep.subr.mxu0 %v11724_v38  ;;  %8304 = vmatpush1.msra.mxu1 %v11798_v15 }
0x15f7   :  { %8337 = vmatprep.mubr.f32.mxu1 %v12741_v20  ;;  %8394 = vmatpush1.msra.mxu0 %v12993_v45 }
0x15f8   :  { %8341 = vmatmul.mubr.f32.vlgmr.msra.gmra.mxu1 %v7991_v30  ;;  %8398 = vmatprep.subr.mxu0 %v12994_v50  ;;  %v13005_v50 = vld [vmem:[#allocation37_spill] sm:$0xff] }
0x15f9   :  { %8484 = vmatprep.subr.mxu1 %v11630_v36  ;;  %8402 = vmatpush1.msra.mxu0 %v12995_v63  ;;  %v13000_v36 = vld [vmem:[#allocation32_spill] sm:$0xff] }
0x15fa   :  { %8486 = vmatpush1.msra.mxu1 %v11632_v62  ;;  %8406 = vmatprep.subr.mxu0 %v12996_v34  ;;  %v13001_v62 = vld [vmem:[#allocation10_spill] sm:$0xff]  ;;  %v13006_v34 = vld [vmem:[#allocation41_spill] sm:$0xff] }
0x15fb   :  { %8488 = vmatprep.subr.mxu1 %v11634_v8  ;;  %8410 = vmatpush1.msra.mxu0 %v12997_v28 }
0x15fc   :  { %8490 = vmatpush1.msra.mxu1 %v11636_v46  ;;  %8414 = vmatprep.subr.mxu0 %v12998_v56  ;;  %v13007_v56 = vld [vmem:[#allocation6_spill] sm:$0xff] }
0x15fd   :  { %8492 = vmatprep.subr.mxu1 %v11686_v16  ;;  %8418 = vmatpush1.msra.mxu0 %v12999_v21 }
0x15fe   :  { %8494 = vmatpush1.msra.mxu1 %v11688_v17  ;;  %8422 = vmatprep.subr.mxu0 %v13000_v36  ;;  %v13008_v36 = vld [vmem:[#allocation26_spill] sm:$0xff] }
0x15ff   :  { %8496 = vmatprep.subr.mxu1 %v11693_v6  ;;  %8426 = vmatpush1.msra.mxu0 %v13001_v62 }
0x1600   :  { %8459 = vmatprep.mubr.f32.mxu0 %v12741_v20  ;;  %8498 = vmatpush1.msra.mxu1 %v11699_v53 }
0x1601   :  { %8461 = vmatmul.mubr.f32.vlgmr.msra.gmra.mxu0 %v12092_v9  ;;  %8500 = vmatprep.subr.mxu1 %v11708_v35 }
0x1602   :  { %8502 = vmatpush1.msra.mxu1 %v11718_v0  ;;  %8547 = vmatprep.mubr.f32.mxu1 %v12741_v20 }
0x1603   :  { %8504 = vmatprep.subr.mxu1 %v11729_v10  ;;  %9233 = vmatprep.subr.mxu0 %v12741_v20 }
0x1604   :  { %8506 = vmatpush1.msra.mxu1 %v11767_v58  ;;  %9241 = vmatprep.mubr.msk.f32.mxu0 %vm9431_vm9, %v12741_v20 }
0x1605   :  { %8508 = vmatprep.subr.mxu1 %v11774_v24 }
0x1606   :  { %8510 = vmatpush1.msra.mxu1 %v11776_v41 }
0x1607   :  { %8512 = vmatprep.subr.mxu1 %v11786_v39 }
0x1608   :  { %8514 = vmatpush1.msra.mxu1 %v11798_v15 }
0x1609   :  { %8549 = vmatmul.mubr.f32.vlgmr.msra.gmra.mxu1 %v12092_v9  ;;  %9244 = vmatprep.subr.mxu1 %v12741_v20 }
0x160a   :  { %9252 = vmatprep.mubr.msk.f32.mxu1 %vm9431_vm9, %v12741_v20 }
0x166d   :  { %v7472_v8 = vpop.f32.mrf.mxu0 }
0x166e   :  { %v7473_v35 = vadd.f32 %v7472_v8, %v7381_v12 }
0x166f   :  { %v9177_v46 = vpop.f32.mrf.mxu0 }
0x1675   :  { %v7563_v16 = vpop.f32.mrf.mxu1 }
0x1676   :  { %v7564_v59 = vadd.f32 %v7563_v16, %v7473_v35 }
0x1677   :  { %v9188_v17 = vpop.f32.mrf.mxu1 }
0x167d   :  { %v7643_v6 = vpop.f32.mrf.mxu0 }
0x167e   :  { %v7644_v38 = vadd.f32 %v7643_v6, %v7564_v59 }
0x167f   :  { %v9199_v54 = vpop.f32.mrf.mxu0 }
0x1685   :  { %v7720_v53 = vpop.f32.mrf.mxu1 }
0x1686   :  { %v7721_v27 = vadd.f32 %v7720_v53, %v7644_v38 }
0x1687   :  { %v9210_v25 = vpop.f32.mrf.mxu1 }
0x168d   :  { %v7803_v40 = vpop.f32.mrf.mxu0 }
0x168e   :  { %v7804_v10 = vadd.f32 %v7803_v40, %v7721_v27 }
0x168f   :  { %v9221_v0 = vpop.f32.mrf.mxu0 }
0x1695   :  { %v7878_v48 = vpop.f32.mrf.mxu1 }
0x1696   :  { %v7879_v32 = vadd.f32 %v7878_v48, %v7804_v10 }
0x1697   :  { %v9232_v58 = vpop.f32.mrf.mxu1 }
0x1698   :  { %7882 = vst.msk [vmem:[%s12320_s10] sm:$0xff] %vm105_vm0, %v7879_v32 }
0x169d   :  { %v7995_v24 = vpop.f32.mrf.mxu0 }
0x169e   :  { %v7996_v57 = vadd.f32 %v7995_v24, %v11981_v49 }
0x169f   :  { %v7997_v41 = vpop.f32.mrf.mxu0 }
0x16a0   :  { %v7998_v2 = vadd.f32 %v7997_v41, %v13002_v52 }
0x16a6   :  { %v8147_v44 = vpop.f32.mrf.mxu1 }
0x16a7   :  { %v8148_v37 = vadd.f32 %v8147_v44, %v7996_v57 }
0x16a8   :  { %v8149_v4 = vpop.f32.mrf.mxu1 }
0x16a9   :  { %v8150_v9 = vadd.f32 %v8149_v4, %v7998_v2 }
0x16af   :  { %v8252_v39 = vpop.f32.mrf.mxu0 }
0x16b0   :  { %v8253_v31 = vadd.f32 %v8252_v39, %v8148_v37 }
0x16b1   :  { %v8254_v15 = vpop.f32.mrf.mxu0 }
0x16b2   :  { %v8255_v30 = vadd.f32 %v8254_v15, %v8150_v9 }
0x16b8   :  { %v8342_v11 = vpop.f32.mrf.mxu1 }
0x16b9   :  { %v8343_v61 = vadd.f32 %v8342_v11, %v8253_v31 }
0x16ba   :  { %v8344_v60 = vpop.f32.mrf.mxu1 }
0x16bb   :  { %v8345_v7 = vadd.f32 %v8344_v60, %v8255_v30 }
0x16c1   :  { %v8462_v26 = vpop.f32.mrf.mxu0 }
0x16c2   :  { %v8463_v23 = vadd.f32 %v8462_v26, %v8343_v61 }
0x16c3   :  { %v8464_v18 = vpop.f32.mrf.mxu0 }
0x16c4   :  { %v8465_v55 = vadd.f32 %v8464_v18, %v8345_v7  ;;  %v9105_v7 = vld [vmem:[%s12319_s9 + $0x8] sm:$0xff] }
0x16c9   :  { %v8550_v1 = vpop.f32.mrf.mxu1 }
0x16ca   :  { %v8551_v33 = vadd.f32 %v8550_v1, %v8463_v23 }
0x16cb   :  { %v8552_v51 = vpop.f32.mrf.mxu1 }
0x16cc   :  { %v8555_v49 = vmul.f32 %v8551_v33, %v13003_v3  ;;  %v8553_v13 = vadd.f32 %v8552_v51, %v8465_v55 }
0x16ce   :  { %v8556_v19 = vmul.f32 %v8553_v13, %v13004_v5  ;;  %8558 = vrot.lane.b32.xlu0 %v8555_v49, %s9429_s3 }
0x16d0   :  { %8563 = vrot.lane.b32.xlu1 %v8556_v19, %s9429_s3 }
0x1740   :  { %v8559_v47 = vpop.permute.xlu0 %8558 }
0x1741   :  { %v8561_v14 = vadd.f32 %v8559_v47, %v8555_v49 }
0x1742   :  { %v8564_v43 = vpop.permute.xlu1 %8563 }
0x1743   :  { %v8566_v42 = vadd.f32 %v8564_v43, %v8556_v19  ;;  %v8582_v45 = vsel %vm1162_vm1, %v8561_v14, 0 }
0x1744   :  { %v12239_v8 = vand.u32 4294901760, %v8582_v45 }
0x1745   :  { %v8574_v22 = vmul.f32 %v8572_v29, %v8566_v42 }
0x1746   :  { %v8666_v40 = vsub.f32 %v8582_v45, %v12239_v8 }
0x1747   :  { %v8578_v63 = vmul.f32 %v8574_v22, %v13005_v50  ;;  %v8577_v28 = vmul.f32 %v8574_v22, %v13006_v34  ;;  %v8576_v21 = vmul.f32 %v8574_v22, %v13007_v56  ;;  %v8575_v62 = vmul.f32 %v8574_v22, %v13008_v36 }
0x1748   :  { %v8667_v48 = vand.u32 4294901760, %v8666_v40 }
0x1749   :  { %v8594_v46 = vsel %vm1162_vm1, %v8578_v63, 0  ;;  %v8591_v16 = vsel %vm1162_vm1, %v8577_v28, 0  ;;  %v8588_v17 = vsel %vm1162_vm1, %v8576_v21, 0  ;;  %v8585_v25 = vsel %vm1162_vm1, %v8575_v62, 0 }
0x174a   :  { %v12244_v6 = vand.u32 4294901760, %v8594_v46  ;;  %v12246_v54 = vand.u32 4294901760, %v8591_v16  ;;  %v12248_v53 = vand.u32 4294901760, %v8588_v17  ;;  %v12257_v38 = vand.u32 4294901760, %v8585_v25 }
0x174b   :  { %v8668_v44 = vsub.f32 %v8666_v40, %v8667_v48 }
0x174c   :  { %9234 = vmatpush3.xpose.msra.mxu0 %v12244_v6  ;;  %v8701_v12 = vsub.f32 %v8594_v46, %v12244_v6  ;;  %v8708_v35 = vsub.f32 %v8591_v16, %v12246_v54  ;;  %v8715_v59 = vsub.f32 %v8588_v17, %v12248_v53  ;;  %v8722_v58 = vsub.f32 %v8585_v25, %v12257_v38 }
0x174d   :  { %9235 = vmatprep.subr.mxu0 %v12741_v20  ;;  %v8669_v15 = vand.u32 4294901760, %v8668_v44 }
0x174e   :  { %v8702_v0 = vand.u32 4294901760, %v8701_v12  ;;  %v8709_v27 = vand.u32 4294901760, %v8708_v35  ;;  %v8716_v41 = vand.u32 4294901760, %v8715_v59  ;;  %v8723_v57 = vand.u32 4294901760, %v8722_v58 }
0x1750   :  { %9236 = vmatpush3.xpose.msra.mxu0 %v12246_v54  ;;  %v8703_v10 = vsub.f32 %v8701_v12, %v8702_v0  ;;  %v8710_v24 = vsub.f32 %v8708_v35, %v8709_v27  ;;  %v8717_v4 = vsub.f32 %v8715_v59, %v8716_v41  ;;  %v8724_v52 = vsub.f32 %v8722_v58, %v8723_v57 }
0x1751   :  { %9237 = vmatprep.subr.mxu0 %v12741_v20 }
0x1752   :  { %v8704_v32 = vand.u32 4294901760, %v8703_v10  ;;  %v8711_v39 = vand.u32 4294901760, %v8710_v24  ;;  %v8718_v11 = vand.u32 4294901760, %v8717_v4  ;;  %v8725_v2 = vand.u32 4294901760, %v8724_v52 }
0x1754   :  { %9238 = vmatpush3.xpose.msra.mxu0 %v12248_v53  ;;  %9245 = vmatpush3.xpose.msra.mxu1 %v8704_v32 }
0x1755   :  { %9239 = vmatprep.subr.mxu0 %v12741_v20  ;;  %9246 = vmatprep.subr.mxu1 %v12741_v20 }
0x1758   :  { %9240 = vmatpush3.xpose.msra.mxu0 %v12257_v38  ;;  %9247 = vmatpush3.xpose.msra.mxu1 %v8711_v39 }
0x1759   :  { %9248 = vmatprep.subr.mxu1 %v12741_v20  ;;  %9255 = vmatprep.subr.mxu0 %v12741_v20 }
0x175b   :  { %9242 = vmatmul.mubr.f32.vlgmr.msra.gmra.mxu0 %v8669_v15 }
0x175c   :  { %9249 = vmatpush3.xpose.msra.mxu1 %v8718_v11  ;;  %9256 = vmatpush3.xpose.msra.mxu0 %v8701_v12 }
0x175d   :  { %9250 = vmatprep.subr.mxu1 %v12741_v20  ;;  %9257 = vmatprep.subr.mxu0 %v12741_v20 }
0x175e   :  { %9263 = vmatprep.mubr.msk.f32.mxu0 %vm9431_vm9, %v12741_v20 }
0x1760   :  { %9251 = vmatpush3.xpose.msra.mxu1 %v8725_v2  ;;  %9258 = vmatpush3.xpose.msra.mxu0 %v8708_v35 }
0x1761   :  { %9259 = vmatprep.subr.mxu0 %v12741_v20  ;;  %9266 = vmatprep.subr.mxu1 %v12741_v20 }
0x1763   :  { %9253 = vmatmul.mubr.f32.vlgmr.msra.gmra.mxu1 %v12239_v8 }
0x1764   :  { %9260 = vmatpush3.xpose.msra.mxu0 %v8715_v59  ;;  %9267 = vmatpush3.xpose.msra.mxu1 %v12244_v6 }
0x1765   :  { %9261 = vmatprep.subr.mxu0 %v12741_v20  ;;  %9268 = vmatprep.subr.mxu1 %v12741_v20 }
0x1766   :  { %9274 = vmatprep.mubr.msk.f32.mxu1 %vm9431_vm9, %v12741_v20 }
0x1768   :  { %9262 = vmatpush3.xpose.msra.mxu0 %v8722_v58  ;;  %9269 = vmatpush3.xpose.msra.mxu1 %v12246_v54 }
0x1769   :  { %9270 = vmatprep.subr.mxu1 %v12741_v20  ;;  %9277 = vmatprep.subr.mxu0 %v12741_v20 }
0x176b   :  { %9264 = vmatmul.mubr.f32.vlgmr.msra.gmra.mxu0 %v8666_v40 }
0x176c   :  { %9271 = vmatpush3.xpose.msra.mxu1 %v12248_v53  ;;  %9278 = vmatpush3.xpose.msra.mxu0 %v8702_v0 }
0x176d   :  { %9272 = vmatprep.subr.mxu1 %v12741_v20  ;;  %9279 = vmatprep.subr.mxu0 %v12741_v20 }
0x176e   :  { %9285 = vmatprep.mubr.msk.f32.mxu0 %vm9431_vm9, %v12741_v20 }
0x1770   :  { %9273 = vmatpush3.xpose.msra.mxu1 %v12257_v38  ;;  %9280 = vmatpush3.xpose.msra.mxu0 %v8709_v27 }
0x1771   :  { %9281 = vmatprep.subr.mxu0 %v12741_v20  ;;  %9288 = vmatprep.subr.mxu1 %v12741_v20 }
0x1773   :  { %9275 = vmatmul.mubr.f32.vlgmr.msra.gmra.mxu1 %v8667_v48 }
0x1774   :  { %9282 = vmatpush3.xpose.msra.mxu0 %v8716_v41  ;;  %9289 = vmatpush3.xpose.msra.mxu1 %v12244_v6 }
0x1775   :  { %9283 = vmatprep.subr.mxu0 %v12741_v20  ;;  %9290 = vmatprep.subr.mxu1 %v12741_v20 }
0x1776   :  { %9296 = vmatprep.mubr.msk.f32.mxu1 %vm9431_vm9, %v12741_v20 }
0x1778   :  { %9284 = vmatpush3.xpose.msra.mxu0 %v8723_v57  ;;  %9291 = vmatpush3.xpose.msra.mxu1 %v12246_v54 }
0x1779   :  { %9292 = vmatprep.subr.mxu1 %v12741_v20 }
0x177b   :  { %9286 = vmatmul.mubr.f32.vlgmr.msra.gmra.mxu0 %v12239_v8 }
0x177c   :  { %9293 = vmatpush3.xpose.msra.mxu1 %v12248_v53 }
0x177d   :  { %9294 = vmatprep.subr.mxu1 %v12741_v20 }
0x1780   :  { %9295 = vmatpush3.xpose.msra.mxu1 %v12257_v38 }
0x1783   :  { %9297 = vmatmul.mubr.f32.vlgmr.msra.gmra.mxu1 %v12239_v8 }
0x181b   :  { %v8671_v37 = vpop.f32.mrf.mxu0 }
0x181c   :  { %v8672_v23 = vadd.f32 %v9105_v7, %v8671_v37 }
0x181d   :  { %v9243_v26 = vpop.f32.mrf.mxu0 }
0x1823   :  { %v8762_v9 = vpop.f32.mrf.mxu1 }
0x1824   :  { %v8763_v55 = vadd.f32 %v8762_v9, %v8672_v23 }
0x1825   :  { %v9254_v31 = vpop.f32.mrf.mxu1 }
0x182b   :  { %v8842_v60 = vpop.f32.mrf.mxu0 }
0x182c   :  { %v8843_v33 = vadd.f32 %v8842_v60, %v8763_v55 }
0x182d   :  { %v9265_v30 = vpop.f32.mrf.mxu0 }
0x1833   :  { %v8919_v61 = vpop.f32.mrf.mxu1 }
0x1834   :  { %v8920_v51 = vadd.f32 %v8919_v61, %v8843_v33 }
0x1835   :  { %v9276_v18 = vpop.f32.mrf.mxu1 }
0x183b   :  { %v9002_v1 = vpop.f32.mrf.mxu0 }
0x183c   :  { %v9003_v3 = vadd.f32 %v9002_v1, %v8920_v51 }
0x183d   :  { %v9287_v20 = vpop.f32.mrf.mxu0 }
0x1843   :  { %v9077_v49 = vpop.f32.mrf.mxu1 }
0x1844   :  { %v9078_v13 = vadd.f32 %v9077_v49, %v9003_v3 }
0x1845   :  { %v9298_v5 = vpop.f32.mrf.mxu1 }
0x1846   :  { %9106 = vst.msk [vmem:[%s12320_s10 + $0x8] sm:$0xff] %vm105_vm0, %v9078_v13 }
0x1847   :  { %9087 = vsyncpa [#allocation3], 1 }

</bundles_post_ra>
